<compile_context>
chip_gen: v5e
topology: v5e:2x2
jax: 0.10.0
libtpu: 0.0.40
codegen_flags: <defaults>
</compile_context>

<pallas_src>
import functools

import jax
import jax.numpy as jnp
from jax.experimental import pallas as pl
from jax.experimental.pallas import tpu as pltpu


def _default_mul_dtype():
    """bf16 multiply/partial-sum path on v6e/v7x (bf16 VPU); f32 elsewhere (v5e)."""
    try:
        kind = jax.devices()[0].device_kind.lower()
    except Exception:
        return jnp.float32
    if "v6" in kind or "v7" in kind:
        return jnp.bfloat16
    return jnp.float32


def _vmem_cap_bytes():
    """Generation-aware VMEM cap: ~3/4 of physical, clamped to [32, 96] MiB."""
    try:
        cap = int(pltpu.get_tpu_info().vmem_capacity_bytes)
    except Exception:
        cap = 128 << 20
    return int(min(max(cap * 3 // 4, 32 << 20), 96 << 20))


def _vmem_limit_bytes(tn, tm, D):
    f32 = 4
    inputs = 2 * f32 * (tn * D + D * tm + 2 * tm)   # double-buffered X, Z^T, hz2, alpha
    output = 2 * f32 * tn
    scratch = f32 * (tn + tn * 128)
    temporaries = 6 * f32 * tn * tm                 # [tn, tm] intermediates headroom
    est = inputs + output + scratch + temporaries
    return int(min(max(2 * est, 32 << 20), _vmem_cap_bytes()))


def _krr_mean_kernel(scale_ref, x_ref, zt_ref, hz2_ref, a_ref, o_ref,
                     hx2_ref, acc_ref, *, mul_dtype, lane_blocks):
    j = pl.program_id(1)

    x = x_ref[...].astype(jnp.float32)              # [tn, D], resident across j

    @pl.when(j == 0)
    def _():
        acc_ref[...] = jnp.zeros_like(acc_ref)
        inv_ls2 = scale_ref[0, 0]                   # runtime scalar from SMEM
        # 0.5 * ||x||^2 / ls^2 — depends only on the row tile; compute once.
        hx2_ref[...] = (0.5 * inv_ls2) * jnp.sum(x * x, axis=-1, keepdims=True)

    # MXU: [tn, D] @ [D, tm].  Z^T is pre-scaled by 1/ls^2 and pre-transposed
    # (lane-dense [D, tm]) in the wrapper -> no per-step rescale, no in-kernel
    # transpose/relayout.
    xz = jnp.dot(x, zt_ref[...], preferred_element_type=jnp.float32)

    # arg = -0.5 * ||x - z||^2 / ls^2  (may be a few f32 ulps positive; harmless).
    arg = xz - hx2_ref[...] - hz2_ref[...]          # two broadcast subs (VPU)
    k = jnp.exp(arg)                                # f32 exp on the EUP

    # Weight by the (outputscale-folded) alpha row and collapse tm lanes -> 128
    # lanes with pure VPU lane-block adds (vreg-aligned static slices).  The
    # final 128 -> 1 cross-lane (XLU) reduce is deferred to the epilogue, so the
    # XLU stays off the per-step critical path.
    p = k.astype(mul_dtype) * a_ref[...]            # [tn, tm] in mul_dtype
    partial = p[:, 0:128]
    for b in range(1, lane_blocks):
        partial = partial + p[:, b * 128:(b + 1) * 128]
    acc_ref[...] += partial.astype(jnp.float32)     # f32 accumulate of [tn, 128]

    @pl.when(j == pl.num_programs(1) - 1)
    def _():
        # One XLU reduce per row tile, then the tiny (tn, 1) store.
        o_ref[...] = jnp.sum(acc_ref[...], axis=-1,
                             keepdims=True).astype(o_ref.dtype)


def krr_mean(X, Z, alpha, *, lengthscale=1.0, outputscale=1.0,
             tile_n=None, tile_m=None, mul_dtype=None):
    """Computes K_rbf(X, Z) @ alpha with a fused Pallas TPU kernel."""
    N, D = X.shape
    M, Dz = Z.shape
    assert D == Dz, "feature dims must match"
    assert alpha.shape == (M, 1)

    # Tile selection: big tiles to amortize per-step pipeline overhead; keep the
    # parallel (N) axis >= 2 grid steps when possible so both v7x TCs get work.
    if tile_n is None:
        tn = min(N, 512)
        if N // tn < 2 and N % 2 == 0 and (N // 2) % 8 == 0:
            tn = N // 2
    else:
        tn = tile_n
    tm = tile_m if tile_m is not None else min(M, 1024)
    assert N % tn == 0 and M % tm == 0, "shapes must tile evenly for this demo"
    assert tm % 128 == 0, "tile_m must be a multiple of 128"
    assert tn % 8 == 0 or tn == N, "tile_n must be a multiple of 8"

    if mul_dtype is None:
        mul_dtype = _default_mul_dtype()

    # Runtime (traced) precomputes — tiny, one-time, and keep the learned
    # hyperparameters out of the compiled kernel (no recompile when they change).
    inv_ls2 = 1.0 / (lengthscale * lengthscale)
    inv_ls2_arr = jnp.full((1, 1), inv_ls2, dtype=jnp.float32)              # SMEM scalar
    zt = (Z.astype(jnp.float32) * inv_ls2).T                                # [D, M]
    hz2 = ((0.5 * inv_ls2)
           * jnp.sum(Z.astype(jnp.float32) ** 2, axis=-1))[None, :]         # [1, M] f32
    a_row = (outputscale * alpha.astype(jnp.float32)).reshape(1, M)         # [1, M]
    a_row = a_row.astype(mul_dtype)

    kernel = functools.partial(_krr_mean_kernel, mul_dtype=mul_dtype,
                               lane_blocks=tm // 128)

    cost = pl.CostEstimate(
        flops=int(2 * N * M * D + 6 * N * M),
        transcendentals=int(N * M),
        bytes_accessed=int(4 * (N * D + M * D + 2 * M + N)),
    )

    return pl.pallas_call(
        kernel,
        out_shape=jax.ShapeDtypeStruct((N, 1), X.dtype),
        grid_spec=pltpu.PrefetchScalarGridSpec(
            num_scalar_prefetch=0,
            grid=(N // tn, M // tm),           # reduction axis (M) last
            in_specs=[
                pl.BlockSpec(memory_space=pltpu.MemorySpace.SMEM),         # 1/ls^2
                pl.BlockSpec((tn, D), lambda i, j: (i, 0)),                # X tile
                pl.BlockSpec((D, tm), lambda i, j: (0, j)),                # (Z/ls^2)^T tile
                pl.BlockSpec((1, tm), lambda i, j: (0, j)),                # 0.5||z||^2/ls^2
                pl.BlockSpec((1, tm), lambda i, j: (0, j)),                # outscale*alpha^T
            ],
            out_specs=pl.BlockSpec((tn, 1), lambda i, j: (i, 0)),
            scratch_shapes=[
                pltpu.VMEM((tn, 1), jnp.float32),     # 0.5*||x||^2/ls^2 per row tile
                pltpu.VMEM((tn, 128), jnp.float32),   # deferred-reduce accumulator
            ],
        ),
        compiler_params=pltpu.CompilerParams(
            dimension_semantics=("parallel", "arbitrary"),
            vmem_limit_bytes=_vmem_limit_bytes(tn, tm, D)),
        cost_estimate=cost,
    )(inv_ls2_arr, X, zt, hz2, a_row)


def krr_mean_ref(X, Z, alpha, *, lengthscale=1.0, outputscale=1.0):
    inv_ls2 = 1.0 / (lengthscale * lengthscale)
    x2 = jnp.sum(X * X, axis=-1, keepdims=True)
    z2 = jnp.sum(Z * Z, axis=-1)[None, :]
    xz = jnp.dot(X, Z.T, precision=jax.lax.Precision.HIGHEST)
    arg = (-0.5 * inv_ls2) * (x2 + z2 - 2.0 * xz)
    K = jnp.exp(arg)
    return (K @ (outputscale * alpha.astype(jnp.float32))).astype(X.dtype)


if __name__ == "__main__":
    key = jax.random.PRNGKey(0)
    k_x, k_z, k_a = jax.random.split(key, 3)

    N, M, D = 512, 1024, 16      # 512 test points, 1024 inducing points, 16 features
    X = jax.random.normal(k_x, (N, D), dtype=jnp.float32)
    Z = jax.random.normal(k_z, (M, D), dtype=jnp.float32)          # r.Z
    alpha = jax.random.normal(k_a, (M, 1), dtype=jnp.float32)      # torch.randn(M, 1)

    lengthscale, outputscale = 1.5, 0.8

    ref = krr_mean_ref(X, Z, alpha, lengthscale=lengthscale, outputscale=outputscale)

    # 1) forced f32 multiply path — tight check against the f32 reference on any chip.
    out_f32 = jax.block_until_ready(
        krr_mean(X, Z, alpha, lengthscale=lengthscale, outputscale=outputscale,
                 mul_dtype=jnp.float32))
    assert out_f32.shape == (N, 1)
    assert jnp.allclose(out_f32, ref, atol=2e-3, rtol=2e-3), "f32 mismatch vs reference"

    # 2) auto path (bf16 multiply/partial sums on v6e/v7x, f32 on v5e).  exp is always
    #    f32, so this is compared directly against the true f32 reference.
    out_auto = jax.block_until_ready(
        krr_mean(X, Z, alpha, lengthscale=lengthscale, outputscale=outputscale))
    assert jnp.allclose(out_auto, ref, atol=1e-2, rtol=1e-2), "auto-dtype mismatch"

    print("KERNEL_OK")
</pallas_src>

<mosaic_0001>
module attributes {stable_mosaic.version = 11 : i64} {
  func.func @_krr_mean_kernel(%arg0: i32, %arg1: i32, %arg2: memref<1x1xf32, #tpu.memory_space<smem>>, %arg3: memref<256x16xf32, #tpu.memory_space<vmem>>, %arg4: memref<16x1024xf32, #tpu.memory_space<vmem>>, %arg5: memref<1x1024xf32, #tpu.memory_space<vmem>>, %arg6: memref<1x1024xf32, #tpu.memory_space<vmem>>, %arg7: memref<256x1xf32, #tpu.memory_space<vmem>>, %arg8: memref<256x1xf32, #tpu.memory_space<vmem>>, %arg9: memref<256x128xf32, #tpu.memory_space<vmem>>) attributes {dimension_semantics = [#tpu.dimension_semantics<parallel>, #tpu.dimension_semantics<arbitrary>], iteration_bounds = array<i64: 2, 1>, scalar_prefetch = 0 : i64, scratch_operands = 2 : i64, tpu.core_type = #tpu.core_type<tc>, window_params = [{transform_indices = @transform_0, window_bounds = array<i64: 1, 1>}, {transform_indices = @transform_1, window_bounds = array<i64: 256, 16>}, {transform_indices = @transform_2, window_bounds = array<i64: 16, 1024>}, {transform_indices = @transform_3, window_bounds = array<i64: 1, 1024>}, {transform_indices = @transform_4, window_bounds = array<i64: 1, 1024>}, {transform_indices = @transform_5, window_bounds = array<i64: 256, 1>}]} {
    %c0 = arith.constant 0 : index
    %c0_0 = arith.constant 0 : index
    %0 = vector.load %arg3[%c0, %c0_0] : memref<256x16xf32, #tpu.memory_space<vmem>>, vector<256x16xf32>
    %c0_i32 = arith.constant 0 : i32
    %1 = arith.cmpi eq, %arg1, %c0_i32 : i32
    %2 = arith.extui %1 : i1 to i32
    %c0_i32_1 = arith.constant 0 : i32
    %3 = arith.cmpi ne, %2, %c0_i32_1 : i32
    scf.if %3 {
      %cst_16 = arith.constant 0.000000e+00 : f32
      %37 = vector.broadcast %cst_16 : f32 to vector<256x128xf32>
      %c0_17 = arith.constant 0 : index
      %c0_18 = arith.constant 0 : index
      %38 = vector.load %arg9[%c0_17, %c0_18] : memref<256x128xf32, #tpu.memory_space<vmem>>, vector<256x128xf32>
      tpu.vector_store %arg9[%c0_17, %c0_18], %37 {strides = array<i32>} : memref<256x128xf32, #tpu.memory_space<vmem>>, vector<256x128xf32>,
      %c0_19 = arith.constant 0 : index
      %c0_20 = arith.constant 0 : index
      %39 = memref.load %arg2[%c0_19, %c0_20] : memref<1x1xf32, #tpu.memory_space<smem>>
      %cst_21 = arith.constant 5.000000e-01 : f32
      %40 = arith.mulf %cst_21, %39 : f32
      %41 = arith.mulf %0, %0 : vector<256x16xf32>
      %cst_22 = arith.constant dense<0.000000e+00> : vector<256xf32>
      %42 = vector.multi_reduction <add>, %41, %cst_22 [1] : vector<256x16xf32> to vector<256xf32>
      %43 = vector.shape_cast %42 : vector<256xf32> to vector<256x1xf32>
      %44 = vector.broadcast %40 : f32 to vector<256x1xf32>
      %45 = arith.mulf %44, %43 : vector<256x1xf32>
      %c0_23 = arith.constant 0 : index
      %c0_24 = arith.constant 0 : index
      %46 = vector.load %arg8[%c0_23, %c0_24] : memref<256x1xf32, #tpu.memory_space<vmem>>, vector<256x1xf32>
      tpu.vector_store %arg8[%c0_23, %c0_24], %45 {strides = array<i32>} : memref<256x1xf32, #tpu.memory_space<vmem>>, vector<256x1xf32>,
    } else {
    }
    %c0_2 = arith.constant 0 : index
    %c0_3 = arith.constant 0 : index
    %4 = vector.load %arg4[%c0_2, %c0_3] : memref<16x1024xf32, #tpu.memory_space<vmem>>, vector<16x1024xf32>
    %cst = arith.constant dense<0.000000e+00> : vector<256x1024xf32>
    %5 = tpu.matmul %0, %4, %cst {dimension_numbers = #tpu.dot_dimension_numbers<[1], [0], [0], [1], [0, 0, 1, 1], [], []>} : vector<256x16xf32>, vector<16x1024xf32>, vector<256x1024xf32> -> vector<256x1024xf32>
    %c0_4 = arith.constant 0 : index
    %c0_5 = arith.constant 0 : index
    %6 = vector.load %arg8[%c0_4, %c0_5] : memref<256x1xf32, #tpu.memory_space<vmem>>, vector<256x1xf32>
    %7 = vector.broadcast %6 : vector<256x1xf32> to vector<256x1024xf32>
    %8 = arith.subf %5, %7 : vector<256x1024xf32>
    %c0_6 = arith.constant 0 : index
    %c0_7 = arith.constant 0 : index
    %9 = vector.load %arg5[%c0_6, %c0_7] : memref<1x1024xf32, #tpu.memory_space<vmem>>, vector<1x1024xf32>
    %10 = vector.broadcast %9 : vector<1x1024xf32> to vector<256x1024xf32>
    %11 = arith.subf %8, %10 : vector<256x1024xf32>
    %12 = math.exp %11 : vector<256x1024xf32>
    %c0_8 = arith.constant 0 : index
    %c0_9 = arith.constant 0 : index
    %13 = vector.load %arg6[%c0_8, %c0_9] : memref<1x1024xf32, #tpu.memory_space<vmem>>, vector<1x1024xf32>
    %14 = vector.broadcast %13 : vector<1x1024xf32> to vector<256x1024xf32>
    %15 = arith.mulf %12, %14 : vector<256x1024xf32>
    %16 = vector.extract_strided_slice %15 {offsets = [0, 0], sizes = [256, 128], strides = [1, 1]} : vector<256x1024xf32> to vector<256x128xf32>
    %17 = vector.extract_strided_slice %15 {offsets = [0, 128], sizes = [256, 128], strides = [1, 1]} : vector<256x1024xf32> to vector<256x128xf32>
    %18 = arith.addf %16, %17 : vector<256x128xf32>
    %19 = vector.extract_strided_slice %15 {offsets = [0, 256], sizes = [256, 128], strides = [1, 1]} : vector<256x1024xf32> to vector<256x128xf32>
    %20 = arith.addf %18, %19 : vector<256x128xf32>
    %21 = vector.extract_strided_slice %15 {offsets = [0, 384], sizes = [256, 128], strides = [1, 1]} : vector<256x1024xf32> to vector<256x128xf32>
    %22 = arith.addf %20, %21 : vector<256x128xf32>
    %23 = vector.extract_strided_slice %15 {offsets = [0, 512], sizes = [256, 128], strides = [1, 1]} : vector<256x1024xf32> to vector<256x128xf32>
    %24 = arith.addf %22, %23 : vector<256x128xf32>
    %25 = vector.extract_strided_slice %15 {offsets = [0, 640], sizes = [256, 128], strides = [1, 1]} : vector<256x1024xf32> to vector<256x128xf32>
    %26 = arith.addf %24, %25 : vector<256x128xf32>
    %27 = vector.extract_strided_slice %15 {offsets = [0, 768], sizes = [256, 128], strides = [1, 1]} : vector<256x1024xf32> to vector<256x128xf32>
    %28 = arith.addf %26, %27 : vector<256x128xf32>
    %29 = vector.extract_strided_slice %15 {offsets = [0, 896], sizes = [256, 128], strides = [1, 1]} : vector<256x1024xf32> to vector<256x128xf32>
    %30 = arith.addf %28, %29 : vector<256x128xf32>
    %c0_10 = arith.constant 0 : index
    %c0_11 = arith.constant 0 : index
    %31 = vector.load %arg9[%c0_10, %c0_11] : memref<256x128xf32, #tpu.memory_space<vmem>>, vector<256x128xf32>
    %32 = arith.addf %31, %30 : vector<256x128xf32>
    %c0_12 = arith.constant 0 : index
    %c0_13 = arith.constant 0 : index
    %33 = vector.load %arg9[%c0_12, %c0_13] : memref<256x128xf32, #tpu.memory_space<vmem>>, vector<256x128xf32>
    tpu.vector_store %arg9[%c0_12, %c0_13], %32 {strides = array<i32>} : memref<256x128xf32, #tpu.memory_space<vmem>>, vector<256x128xf32>,
    %c0_i32_14 = arith.constant 0 : i32
    %34 = arith.cmpi eq, %arg1, %c0_i32_14 : i32
    %35 = arith.extui %34 : i1 to i32
    %c0_i32_15 = arith.constant 0 : i32
    %36 = arith.cmpi ne, %35, %c0_i32_15 : i32
    scf.if %36 {
      %c0_16 = arith.constant 0 : index
      %c0_17 = arith.constant 0 : index
      %37 = vector.load %arg9[%c0_16, %c0_17] : memref<256x128xf32, #tpu.memory_space<vmem>>, vector<256x128xf32>
      %cst_18 = arith.constant dense<0.000000e+00> : vector<256xf32>
      %38 = vector.multi_reduction <add>, %37, %cst_18 [1] : vector<256x128xf32> to vector<256xf32>
      %39 = vector.shape_cast %38 : vector<256xf32> to vector<256x1xf32>
      %c0_19 = arith.constant 0 : index
      %c0_20 = arith.constant 0 : index
      %40 = vector.load %arg7[%c0_19, %c0_20] : memref<256x1xf32, #tpu.memory_space<vmem>>, vector<256x1xf32>
      tpu.vector_store %arg7[%c0_19, %c0_20], %39 {strides = array<i32>} : memref<256x1xf32, #tpu.memory_space<vmem>>, vector<256x1xf32>,
    } else {
    }
    return
  }
  func.func @transform_0(%arg0: i32, %arg1: i32) -> (i32, i32) {
    %c0_i32 = arith.constant 0 : i32
    %c0_i32_0 = arith.constant 0 : i32
    %c0_i32_1 = arith.constant 0 : i32
    return %c0_i32, %c0_i32_0 : i32, i32
  }
  func.func @transform_1(%arg0: i32, %arg1: i32) -> (i32, i32) {
    %c0_i32 = arith.constant 0 : i32
    %c0_i32_0 = arith.constant 0 : i32
    return %arg0, %c0_i32 : i32, i32
  }
  func.func @transform_2(%arg0: i32, %arg1: i32) -> (i32, i32) {
    %c0_i32 = arith.constant 0 : i32
    %c0_i32_0 = arith.constant 0 : i32
    return %c0_i32, %arg1 : i32, i32
  }
  func.func @transform_3(%arg0: i32, %arg1: i32) -> (i32, i32) {
    %c0_i32 = arith.constant 0 : i32
    %c0_i32_0 = arith.constant 0 : i32
    return %c0_i32, %arg1 : i32, i32
  }
  func.func @transform_4(%arg0: i32, %arg1: i32) -> (i32, i32) {
    %c0_i32 = arith.constant 0 : i32
    %c0_i32_0 = arith.constant 0 : i32
    return %c0_i32, %arg1 : i32, i32
  }
  func.func @transform_5(%arg0: i32, %arg1: i32) -> (i32, i32) {
    %c0_i32 = arith.constant 0 : i32
    %c0_i32_0 = arith.constant 0 : i32
    return %arg0, %c0_i32 : i32, i32
  }
}

</mosaic_0001>

<bundles_post_ra>
// kernel: tpu_custom_call.1
= control target key start
LH: loop header
LB: loop body
LE: loop exit
PB: predicated region body
PF: predicated region fallthrough
CT: control target
= control target key end

     0   :  { %s4549_s20 = smov 0   ;;  %s4551_s21 = smov 0   ;;  %s6928_s0 = inlined_call_operand.<no memory space> [shape: f32[1,1], index: 0, kind: input, shape index: {}]   ;;  %s6929_s1 = inlined_call_operand.vmem [shape: f32[512,16], index: 1, kind: input, shape index: {}]   ;;  %s6930_s2 = inlined_call_operand.vmem [shape: f32[16,1024], index: 2, kind: input, shape index: {}]   ;;  %s6931_s3 = inlined_call_operand.vmem [shape: f32[1,1024], index: 3, kind: input, shape index: {}]   ;;  %s6932_s4 = inlined_call_operand.vmem [shape: f32[1,1024], index: 4, kind: input, shape index: {}]   ;;  %s6933_s5 = inlined_call_operand.vmem [shape: f32[512,1], index: 5, kind: output, shape index: {}]  }
   0x1   :  { %10 = sst [smem:[#allocation4]] %s6928_s0  ;;  %s4553_s22 = smov 0  }
   0x2 LB: > { %s28_s0 = sadd.s32 1, %s4509_s21  ;;  %p3654_p0 = scmp.ge.s32.totalorder %s4513_s22, 1  ;;  %s4513_s22 = sphi %s4553_s22, %s16_s22   ;;  %s4509_s21 = sphi %s4551_s21, %s7289_s21   ;;  %s4505_s20 = sphi %s4549_s20, %s7288_s20  }
   0x3   : > { %p30_p1 = scmp.ge.s32.totalorder %s28_s0, 2  ;;  %p232_p2 = scmp.lt.s32.totalorder %s4513_s22, 3 }
   0x5   : > { %s7291_s0 = smov (%p30_p1, %s28_s0), 0  ;;  %p233_p3 = pnand %p3654_p0, %p232_p2 }
   0x7   : > { %236 = sbr.rel (%p233_p3) target bundleno = 798 (0x31e), region = 40 }
   0xc   : > { %v574_v0 = vld [vmem:[%s6930_s2 + $0x40] sm:$0xff]  ;;  %v575_v1 = vld [vmem:[%s6930_s2 + $0x48] sm:$0xff]  ;;  %v576_v2 = vld [vmem:[%s6930_s2 + $0x50] sm:$0xff]  ;;  %s3655_s29 = sshll.u32 %s4505_s20, 5  ;;  %vm403_vm0 = vcmask 130048   ;;  %s369_s13 = sld [smem:[#allocation4]] }
   0xd   : > { %693 = vmatpush.msra.mxu0 %v574_v0  ;;  %806 = vmatpush.msra.mxu1 %v575_v1  ;;  %v577_v3 = vld [vmem:[%s6930_s2 + $0x58] sm:$0xff]  ;;  %v566_v4 = vld [vmem:[%s6930_s2] sm:$0xff]  ;;  %v567_v5 = vld [vmem:[%s6930_s2 + $0x8] sm:$0xff]  ;;  %p274_p4 = scmp.lt.s32.totalorder %s3655_s29, 63  ;;  %vm533_vm1 = vcmask 7168  }
   0xe   : > { %919 = vmatpush.msra.mxu2 %v576_v2  ;;  %1032 = vmatpush.msra.mxu3 %v577_v3  ;;  %v568_v6 = vld [vmem:[%s6930_s2 + $0x10] sm:$0xff]  ;;  %v569_v7 = vld [vmem:[%s6930_s2 + $0x18] sm:$0xff]  ;;  %v578_v9 = vld [vmem:[%s6930_s2 + $0x60] sm:$0xff] }
   0xf   : > { %v580_v8 = vld [vmem:[%s6930_s2 + $0x70] sm:$0xff]  ;;  %694 = vmatpush.msra.mxu0 %v566_v4  ;;  %807 = vmatpush.msra.mxu1 %v567_v5  ;;  %s7293_s29 = smov (!%p274_p4, %s3655_s29), 63  ;;  %v581_v10 = vld [vmem:[%s6930_s2 + $0x78] sm:$0xff]  ;;  %v579_v11 = vld [vmem:[%s6930_s2 + $0x68] sm:$0xff] }
  0x10   : > { %920 = vmatpush.msra.mxu2 %v568_v6  ;;  %1033 = vmatpush.msra.mxu3 %v569_v7  ;;  %s3656_s25 = sshll.u32 %s7293_s29, 3 }
  0x11   : > { %1145 = vmatpush.msrb.mxu0 %v578_v9  ;;  %s4611_s28 = scalar_lea.vmem %s6929_s1, %s3656_s25  ;;  %1258 = vmatpush.msrb.mxu1 %v579_v11 }
  0x12   : > { %1371 = vmatpush.msrb.mxu2 %v580_v8  ;;  %1484 = vmatpush.msrb.mxu3 %v581_v10  ;;  %v301_v12 = vld [vmem:[%s4611_s28] sm:$0xff]  ;;  %v303_v14 = vld [vmem:[%s4611_s28 + $0x10] sm:$0xff]  ;;  %v4625_v18 = vld [vmem:[%s4611_s28 + $0x28] sm:$0xff]  ;;  %s370_s14 = smul.f32 0.5, %s369_s13 }
  0x13   : > { %v4615_v13 = vld [vmem:[%s4611_s28 + $0x20] sm:$0xff]  ;;  %3659 = vmatmul.msk.f32.vlgmr.msra.gmra.mxu0 %vm403_vm0, %v301_v12  ;;  %3691 = vmatmul.msk.f32.vlgmr.msra.gmra.mxu1 %vm403_vm0, %v301_v12  ;;  %v373_v16 = vmul.f32 %v303_v14, %v303_v14  ;;  %v371_v17 = vmul.f32 %v301_v12, %v301_v12  ;;  %v304_v19 = vld [vmem:[%s4611_s28 + $0x18] sm:$0xff]  ;;  %v302_v23 = vld [vmem:[%s4611_s28 + $0x8] sm:$0xff]  ;;  %v376_v24 = vmul.f32 %v4625_v18, %v4625_v18 }
  0x14   : > { %v375_v15 = vmul.f32 %v4615_v13, %v4615_v13  ;;  %3723 = vmatmul.msk.f32.vlgmr.msra.gmra.mxu2 %vm403_vm0, %v301_v12  ;;  %3755 = vmatmul.msk.f32.vlgmr.msra.gmra.mxu3 %vm403_vm0, %v301_v12  ;;  %v374_v25 = vmul.f32 %v304_v19, %v304_v19  ;;  %v372_v26 = vmul.f32 %v302_v23, %v302_v23  ;;  %v4642_v30 = vld [vmem:[%s4611_s28 + $0x40] sm:$0xff]  ;;  %v4645_v31 = vld [vmem:[%s4611_s28 + $0x38] sm:$0xff]  ;;  %v4648_v32 = vld [vmem:[%s4611_s28 + $0x30] sm:$0xff] }
  0x15   : > { %v410_v21 = vsel %vm403_vm0, %v373_v16, 0.0  ;;  %v404_v22 = vsel %vm403_vm0, %v371_v17, 0.0  ;;  %v419_v27 = vsel %vm403_vm0, %v376_v24, 0.0  ;;  %v379_v33 = vmul.f32 %v4642_v30, %v4642_v30  ;;  %v4663_v38 = vld [vmem:[%s4611_s28 + $0x58] sm:$0xff]  ;;  %v4666_v39 = vld [vmem:[%s4611_s28 + $0x50] sm:$0xff]  ;;  %v4670_v41 = vld [vmem:[%s4611_s28 + $0x48] sm:$0xff] }
  0x16   : > { %v416_v20 = vsel %vm403_vm0, %v375_v15, 0.0  ;;  %411 = vadd.xlane.f32.xlu1 %v410_v21  ;;  %405 = vadd.xlane.f32.xlu0 %v404_v22  ;;  %v413_v28 = vsel %vm403_vm0, %v374_v25, 0.0  ;;  %v407_v29 = vsel %vm403_vm0, %v372_v26, 0.0  ;;  %v378_v34 = vmul.f32 %v4645_v31, %v4645_v31  ;;  %v4685_v47 = vld [vmem:[%s4611_s28 + $0x70] sm:$0xff]  ;;  %v4688_v48 = vld [vmem:[%s4611_s28 + $0x68] sm:$0xff]  ;;  %v4692_v50 = vld [vmem:[%s4611_s28 + $0x60] sm:$0xff] }
  0x17   : > { %417 = vadd.xlane.f32.xlu2 %v416_v20  ;;  %v377_v35 = vmul.f32 %v4648_v32, %v4648_v32  ;;  %v428_v36 = vsel %vm403_vm0, %v379_v33, 0.0  ;;  %v382_v42 = vmul.f32 %v4663_v38, %v4663_v38  ;;  %v381_v43 = vmul.f32 %v4666_v39, %v4666_v39  ;;  %v4711_v56 = vld [vmem:[%s4611_s28 + $0x88] sm:$0xff]  ;;  %v4714_v57 = vld [vmem:[%s4611_s28 + $0x80] sm:$0xff]  ;;  %v4718_v59 = vld [vmem:[%s4611_s28 + $0x78] sm:$0xff] }
  0x18   : > { %v425_v37 = vsel %vm403_vm0, %v378_v34, 0.0  ;;  %v380_v44 = vmul.f32 %v4670_v41, %v4670_v41  ;;  %v385_v51 = vmul.f32 %v4685_v47, %v4685_v47  ;;  %v384_v52 = vmul.f32 %v4688_v48, %v4688_v48  ;;  %v4737_v1 = vld [vmem:[%s4611_s28 + $0xa0] sm:$0xff]  ;;  %v4740_v2 = vld [vmem:[%s4611_s28 + $0x98] sm:$0xff]  ;;  %v4744_v4 = vld [vmem:[%s4611_s28 + $0x90] sm:$0xff] }
  0x19   : > { %v422_v40 = vsel %vm403_vm0, %v377_v35, 0.0  ;;  %v437_v45 = vsel %vm403_vm0, %v382_v42, 0.0  ;;  %v434_v46 = vsel %vm403_vm0, %v381_v43, 0.0  ;;  %v383_v53 = vmul.f32 %v4692_v50, %v4692_v50  ;;  %v4764_v11 = vld [vmem:[%s4611_s28 + $0xb0] sm:$0xff]  ;;  %v4767_v12 = vld [vmem:[%s4611_s28 + $0xb8] sm:$0xff]  ;;  %v4790_v20 = vld [vmem:[%s4611_s28 + $0xc8] sm:$0xff] }
  0x1a   : > { %v431_v49 = vsel %vm403_vm0, %v380_v44, 0.0  ;;  %v446_v54 = vsel %vm403_vm0, %v385_v51, 0.0  ;;  %v443_v55 = vsel %vm403_vm0, %v384_v52, 0.0  ;;  %v388_v60 = vmul.f32 %v4711_v56, %v4711_v56  ;;  %v4793_v21 = vld [vmem:[%s4611_s28 + $0xd0] sm:$0xff]  ;;  %v4810_v26 = vld [vmem:[%s4611_s28 + $0xe8] sm:$0xff]  ;;  %v4836_v35 = vld [vmem:[%s4611_s28 + $0xf8] sm:$0xff] }
  0x1b   : > { %3660 = vmatmul.msk.f32.gmra.mxu0 %vm403_vm0, %v302_v23  ;;  %3692 = vmatmul.msk.f32.gmra.mxu1 %vm403_vm0, %v302_v23  ;;  %v440_v58 = vsel %vm403_vm0, %v383_v53, 0.0  ;;  %v387_v61 = vmul.f32 %v4714_v57, %v4714_v57  ;;  %v386_v62 = vmul.f32 %v4718_v59, %v4718_v59  ;;  %v391_v5 = vmul.f32 %v4737_v1, %v4737_v1  ;;  %v4856_v43 = vld [vmem:[%s4611_s28 + $0xf0] sm:$0xff] }
  0x1c   : > { %3724 = vmatmul.msk.f32.gmra.mxu2 %vm403_vm0, %v302_v23  ;;  %3756 = vmatmul.msk.f32.gmra.mxu3 %vm403_vm0, %v302_v23  ;;  %v455_v63 = vsel %vm403_vm0, %v388_v60, 0.0  ;;  %v390_v6 = vmul.f32 %v4740_v2, %v4740_v2  ;;  %v389_v7 = vmul.f32 %v4744_v4, %v4744_v4  ;;  %v394_v15 = vmul.f32 %v4767_v12, %v4767_v12 }
  0x1d   : > { %v452_v0 = vsel %vm403_vm0, %v387_v61, 0.0  ;;  %v449_v3 = vsel %vm403_vm0, %v386_v62, 0.0  ;;  %v464_v8 = vsel %vm403_vm0, %v391_v5, 0.0  ;;  %v396_v22 = vmul.f32 %v4790_v20, %v4790_v20 }
  0x1e   : > { %414 = vadd.xlane.f32.xlu1 %v413_v28  ;;  %408 = vadd.xlane.f32.xlu0 %v407_v29  ;;  %v461_v9 = vsel %vm403_vm0, %v390_v6, 0.0  ;;  %v458_v10 = vsel %vm403_vm0, %v389_v7, 0.0  ;;  %v397_v23 = vmul.f32 %v4793_v21, %v4793_v21  ;;  %v4816_v28 = vld [vmem:[%s4611_s28 + $0xc0] sm:$0xff]  ;;  %v401_v44 = vmul.f32 %v4856_v43, %v4856_v43 }
  0x1f   : > { %420 = vadd.xlane.f32.xlu2 %v419_v27  ;;  %v479_v24 = vsel %vm403_vm0, %v396_v22, 0.0  ;;  %v4813_v27 = vld [vmem:[%s4611_s28 + $0xe0] sm:$0xff]  ;;  %v395_v29 = vmul.f32 %v4816_v28, %v4816_v28  ;;  %v4905_v51 = vstv %s370_s14 }
  0x20   : > { %v482_v25 = vsel %vm403_vm0, %v397_v23, 0.0 }
  0x23   : > { %3661 = vmatmul.msk.f32.gmra.mxu0 %vm403_vm0, %v303_v14  ;;  %3693 = vmatmul.msk.f32.gmra.mxu1 %vm403_vm0, %v303_v14 }
  0x24   : > { %3725 = vmatmul.msk.f32.gmra.mxu2 %vm403_vm0, %v303_v14  ;;  %3757 = vmatmul.msk.f32.gmra.mxu3 %vm403_vm0, %v303_v14  ;;  %v393_v14 = vmul.f32 %v4764_v11, %v4764_v11 }
  0x26   : > { %426 = vadd.xlane.f32.xlu1 %v425_v37  ;;  %423 = vadd.xlane.f32.xlu0 %v422_v40  ;;  %v470_v17 = vsel %vm403_vm0, %v393_v14, 0.0  ;;  %v402_v40 = vmul.f32 %v4836_v35, %v4836_v35 }
  0x27   : > { %429 = vadd.xlane.f32.xlu2 %v428_v36  ;;  %v4839_v36 = vld [vmem:[%s4611_s28 + $0xd8] sm:$0xff] }
  0x28   : > { %v398_v37 = vmul.f32 %v4839_v36, %v4839_v36 }
  0x2a   : > { %v485_v42 = vsel %vm403_vm0, %v398_v37, 0.0 }
  0x2b   : > { %3662 = vmatmul.msk.f32.gmra.mxu0 %vm403_vm0, %v304_v19  ;;  %3694 = vmatmul.msk.f32.gmra.mxu1 %vm403_vm0, %v304_v19 }
  0x2c   : > { %3726 = vmatmul.msk.f32.gmra.mxu2 %vm403_vm0, %v304_v19  ;;  %3758 = vmatmul.msk.f32.gmra.mxu3 %vm403_vm0, %v304_v19 }
  0x2e   : > { %435 = vadd.xlane.f32.xlu1 %v434_v46  ;;  %432 = vadd.xlane.f32.xlu0 %v431_v49  ;;  %v572_v46 = vld [vmem:[%s6930_s2 + $0x30] sm:$0xff]  ;;  %v573_v49 = vld [vmem:[%s6930_s2 + $0x38] sm:$0xff] }
  0x2f   : > { %438 = vadd.xlane.f32.xlu2 %v437_v45  ;;  %v494_v45 = vsel %vm403_vm0, %v401_v44, 0.0  ;;  %1372 = vmatpush.msrb.mxu2 %v572_v46 }
  0x30   : > { %1485 = vmatpush.msrb.mxu3 %v573_v49 }
  0x33   : > { %3663 = vmatmul.msk.f32.gmra.mxu0 %vm403_vm0, %v4615_v13  ;;  %3695 = vmatmul.msk.f32.gmra.mxu1 %vm403_vm0, %v4615_v13 }
  0x34   : > { %3727 = vmatmul.msk.f32.gmra.mxu2 %vm403_vm0, %v4615_v13  ;;  %3759 = vmatmul.msk.f32.gmra.mxu3 %vm403_vm0, %v4615_v13  ;;  %v4770_v13 = vld [vmem:[%s4611_s28 + $0xa8] sm:$0xff] }
  0x35   : > { %v392_v16 = vmul.f32 %v4770_v13, %v4770_v13 }
  0x36   : > { %444 = vadd.xlane.f32.xlu1 %v443_v55  ;;  %441 = vadd.xlane.f32.xlu0 %v440_v58 }
  0x37   : > { %447 = vadd.xlane.f32.xlu2 %v446_v54  ;;  %v467_v19 = vsel %vm403_vm0, %v392_v16, 0.0 }
  0x3b   : > { %3664 = vmatmul.msk.f32.gmra.mxu0 %vm403_vm0, %v4625_v18  ;;  %3696 = vmatmul.msk.f32.gmra.mxu1 %vm403_vm0, %v4625_v18 }
  0x3c   : > { %3728 = vmatmul.msk.f32.gmra.mxu2 %vm403_vm0, %v4625_v18  ;;  %3760 = vmatmul.msk.f32.gmra.mxu3 %vm403_vm0, %v4625_v18  ;;  %v473_v18 = vsel %vm403_vm0, %v394_v15, 0.0 }
  0x3e   : > { %453 = vadd.xlane.f32.xlu1 %v452_v0  ;;  %450 = vadd.xlane.f32.xlu0 %v449_v3 }
  0x3f   : > { %456 = vadd.xlane.f32.xlu2 %v455_v63 }
  0x43   : > { %3665 = vmatmul.msk.f32.gmra.mxu0 %vm403_vm0, %v4648_v32  ;;  %3697 = vmatmul.msk.f32.gmra.mxu1 %vm403_vm0, %v4648_v32 }
  0x44   : > { %3729 = vmatmul.msk.f32.gmra.mxu2 %vm403_vm0, %v4648_v32  ;;  %3761 = vmatmul.msk.f32.gmra.mxu3 %vm403_vm0, %v4648_v32  ;;  %v399_v32 = vmul.f32 %v4813_v27, %v4813_v27 }
  0x46   : > { %462 = vadd.xlane.f32.xlu1 %v461_v9  ;;  %459 = vadd.xlane.f32.xlu0 %v458_v10  ;;  %v488_v34 = vsel %vm403_vm0, %v399_v32, 0.0 }
  0x47   : > { %465 = vadd.xlane.f32.xlu2 %v464_v8 }
  0x4b   : > { %3666 = vmatmul.msk.f32.gmra.mxu0 %vm403_vm0, %v4645_v31  ;;  %3698 = vmatmul.msk.f32.gmra.mxu1 %vm403_vm0, %v4645_v31 }
  0x4c   : > { %3730 = vmatmul.msk.f32.gmra.mxu2 %vm403_vm0, %v4645_v31  ;;  %3762 = vmatmul.msk.f32.gmra.mxu3 %vm403_vm0, %v4645_v31  ;;  %v400_v31 = vmul.f32 %v4810_v26, %v4810_v26 }
  0x4e   : > { %471 = vadd.xlane.f32.xlu1 %v470_v17  ;;  %468 = vadd.xlane.f32.xlu0 %v467_v19  ;;  %v491_v33 = vsel %vm403_vm0, %v400_v31, 0.0 }
  0x4f   : > { %474 = vadd.xlane.f32.xlu2 %v473_v18 }
  0x53   : > { %3667 = vmatmul.msk.f32.gmra.mxu0 %vm403_vm0, %v4642_v30  ;;  %3699 = vmatmul.msk.f32.gmra.mxu1 %vm403_vm0, %v4642_v30 }
  0x54   : > { %3731 = vmatmul.msk.f32.gmra.mxu2 %vm403_vm0, %v4642_v30  ;;  %3763 = vmatmul.msk.f32.gmra.mxu3 %vm403_vm0, %v4642_v30  ;;  %v476_v30 = vsel %vm403_vm0, %v395_v29, 0.0 }
  0x56   : > { %480 = vadd.xlane.f32.xlu1 %v479_v24  ;;  %477 = vadd.xlane.f32.xlu0 %v476_v30 }
  0x57   : > { %483 = vadd.xlane.f32.xlu2 %v482_v25 }
  0x5b   : > { %3668 = vmatmul.msk.f32.gmra.mxu0 %vm403_vm0, %v4670_v41  ;;  %3700 = vmatmul.msk.f32.gmra.mxu1 %vm403_vm0, %v4670_v41 }
  0x5c   : > { %3732 = vmatmul.msk.f32.gmra.mxu2 %vm403_vm0, %v4670_v41  ;;  %3764 = vmatmul.msk.f32.gmra.mxu3 %vm403_vm0, %v4670_v41  ;;  %v497_v41 = vsel %vm403_vm0, %v402_v40, 0.0 }
  0x5e   : > { %489 = vadd.xlane.f32.xlu1 %v488_v34  ;;  %486 = vadd.xlane.f32.xlu0 %v485_v42 }
  0x5f   : > { %492 = vadd.xlane.f32.xlu2 %v491_v33 }
  0x63   : > { %3669 = vmatmul.msk.f32.gmra.mxu0 %vm403_vm0, %v4666_v39  ;;  %3701 = vmatmul.msk.f32.gmra.mxu1 %vm403_vm0, %v4666_v39 }
  0x64   : > { %3733 = vmatmul.msk.f32.gmra.mxu2 %vm403_vm0, %v4666_v39  ;;  %3765 = vmatmul.msk.f32.gmra.mxu3 %vm403_vm0, %v4666_v39  ;;  %v4515_v39 = vmov 0  }
  0x65   : > { %3944 = vset.pattern.permute.xlu1 %v4515_v39  ;;  %3942 = vset.pattern.permute.xlu2 %v4515_v39 }
  0x66   : > { %498 = vadd.xlane.f32.xlu1 %v497_v41  ;;  %495 = vadd.xlane.f32.xlu0 %v494_v45 }
  0x67   : > { %3943 = vset.pattern.permute.xlu0 %v4515_v39 }
  0x6b   : > { %3670 = vmatmul.msk.f32.gmra.mxu0 %vm403_vm0, %v4663_v38  ;;  %3702 = vmatmul.msk.f32.gmra.mxu1 %vm403_vm0, %v4663_v38 }
  0x6c   : > { %3734 = vmatmul.msk.f32.gmra.mxu2 %vm403_vm0, %v4663_v38  ;;  %3766 = vmatmul.msk.f32.gmra.mxu3 %vm403_vm0, %v4663_v38  ;;  %v570_v38 = vld [vmem:[%s6930_s2 + $0x20] sm:$0xff] }
  0x6d   : > { %1146 = vmatpush.msrb.mxu0 %v570_v38 }
  0x73   : > { %3671 = vmatmul.msk.f32.gmra.mxu0 %vm403_vm0, %v4692_v50  ;;  %3703 = vmatmul.msk.f32.gmra.mxu1 %vm403_vm0, %v4692_v50 }
  0x74   : > { %3735 = vmatmul.msk.f32.gmra.mxu2 %vm403_vm0, %v4692_v50  ;;  %3767 = vmatmul.msk.f32.gmra.mxu3 %vm403_vm0, %v4692_v50  ;;  %v571_v50 = vld [vmem:[%s6930_s2 + $0x28] sm:$0xff] }
  0x75   : > { %1259 = vmatpush.msrb.mxu1 %v571_v50 }
  0x7b   : > { %3672 = vmatmul.msk.f32.gmra.mxu0 %vm403_vm0, %v4688_v48  ;;  %3704 = vmatmul.msk.f32.gmra.mxu1 %vm403_vm0, %v4688_v48 }
  0x7c   : > { %3736 = vmatmul.msk.f32.gmra.mxu2 %vm403_vm0, %v4688_v48  ;;  %3768 = vmatmul.msk.f32.gmra.mxu3 %vm403_vm0, %v4688_v48 }
  0x83   : > { %3673 = vmatmul.msk.f32.gmra.mxu0 %vm403_vm0, %v4685_v47  ;;  %3705 = vmatmul.msk.f32.gmra.mxu1 %vm403_vm0, %v4685_v47 }
  0x84   : > { %3737 = vmatmul.msk.f32.gmra.mxu2 %vm403_vm0, %v4685_v47  ;;  %3769 = vmatmul.msk.f32.gmra.mxu3 %vm403_vm0, %v4685_v47 }
  0x89   : > { %v412_v53 = vpop.xlane.xlu1 %411  ;;  %v406_v55 = vpop.xlane.xlu0 %405 }
  0x8a   : > { %v418_v52 = vpop.xlane.xlu2 %417  ;;  %v503_v54 = vmul.f32 %v4905_v51, %v412_v53  ;;  %v501_v58 = vmul.f32 %v4905_v51, %v406_v55 }
  0x8b   : > { %v505_v48 = vmul.f32 %v4905_v51, %v418_v52  ;;  %3674 = vmatmul.msk.f32.gmra.mxu0 %vm403_vm0, %v4718_v59  ;;  %3706 = vmatmul.msk.f32.gmra.mxu1 %vm403_vm0, %v4718_v59 }
  0x8c   : > { %3738 = vmatmul.msk.f32.gmra.mxu2 %vm403_vm0, %v4718_v59  ;;  %3770 = vmatmul.msk.f32.gmra.mxu3 %vm403_vm0, %v4718_v59  ;;  %536 = vst.msk [vmem:[#allocation2 + $0x10] sm:$0xff] %vm533_vm1, %v503_v54 }
  0x8d   : > { %538 = vst.msk [vmem:[#allocation2 + $0x20] sm:$0xff] %vm533_vm1, %v505_v48 }
  0x8e   : > { %534 = vst.msk [vmem:[#allocation2] sm:$0xff] %vm533_vm1, %v501_v58 }
  0x90   : > { %v4921_v47 = vpop.f32.mrf.mxu0  ;;  %v4923_v60 = vpop.f32.mrf.mxu1 }
  0x91   : > { %v415_v62 = vpop.xlane.xlu1 %414  ;;  %v409_v3 = vpop.xlane.xlu0 %408 }
  0x92   : > { %v421_v61 = vpop.xlane.xlu2 %420  ;;  %v504_v0 = vmul.f32 %v4905_v51, %v415_v62  ;;  %v502_v5 = vmul.f32 %v4905_v51, %v409_v3 }
  0x93   : > { %v506_v63 = vmul.f32 %v4905_v51, %v421_v61  ;;  %3675 = vmatmul.msk.f32.gmra.mxu0 %vm403_vm0, %v4714_v57  ;;  %3707 = vmatmul.msk.f32.gmra.mxu1 %vm403_vm0, %v4714_v57  ;;  %v1585_v59 = vld [vmem:[#allocation2 + $0x10] sm:$0xff] }
  0x94   : > { %3739 = vmatmul.msk.f32.gmra.mxu2 %vm403_vm0, %v4714_v57  ;;  %3771 = vmatmul.msk.f32.gmra.mxu3 %vm403_vm0, %v4714_v57  ;;  %537 = vst.msk [vmem:[#allocation2 + $0x18] sm:$0xff] %vm533_vm1, %v504_v0  ;;  %v1587_v37 = vld [vmem:[#allocation2 + $0x20] sm:$0xff] }
  0x95   : > { %539 = vst.msk [vmem:[#allocation2 + $0x28] sm:$0xff] %vm533_vm1, %v506_v63  ;;  %1627 = vperm.xlu1 %3944, %v1585_v59   ;;  %v1583_v6 = vld [vmem:[#allocation2] sm:$0xff] }
  0x96   : > { %535 = vst.msk [vmem:[#allocation2 + $0x8] sm:$0xff] %vm533_vm1, %v502_v5  ;;  %1617 = vperm.xlu2 %3942, %v1583_v6  }
  0x97   : > { %v4939_v7 = vpop.f32.mrf.mxu2  ;;  %v4941_v8 = vpop.f32.mrf.mxu3 }
  0x98   : > { %v4943_v9 = vpop.f32.mrf.mxu0  ;;  %v4945_v10 = vpop.f32.mrf.mxu1 }
  0x99   : > { %v427_v15 = vpop.xlane.xlu1 %426  ;;  %v424_v17 = vpop.xlane.xlu0 %423 }
  0x9a   : > { %v430_v14 = vpop.xlane.xlu2 %429  ;;  %v508_v16 = vmul.f32 %v4905_v51, %v427_v15  ;;  %v507_v19 = vmul.f32 %v4905_v51, %v424_v17 }
  0x9b   : > { %v509_v57 = vmul.f32 %v4905_v51, %v430_v14  ;;  %3676 = vmatmul.msk.f32.gmra.mxu0 %vm403_vm0, %v4711_v56  ;;  %3708 = vmatmul.msk.f32.gmra.mxu1 %vm403_vm0, %v4711_v56  ;;  %v1586_v22 = vld [vmem:[#allocation2 + $0x18] sm:$0xff] }
  0x9c   : > { %v1588_v18 = vld [vmem:[#allocation2 + $0x28] sm:$0xff]  ;;  %3740 = vmatmul.msk.f32.gmra.mxu2 %vm403_vm0, %v4711_v56  ;;  %3772 = vmatmul.msk.f32.gmra.mxu3 %vm403_vm0, %v4711_v56  ;;  %541 = vst.msk [vmem:[#allocation2 + $0x38] sm:$0xff] %vm533_vm1, %v508_v16 }
  0x9d   : > { %542 = vst.msk [vmem:[#allocation2 + $0x40] sm:$0xff] %vm533_vm1, %v509_v57  ;;  %1642 = vperm.xlu1 %3944, %v1588_v18   ;;  %v1584_v23 = vld [vmem:[#allocation2 + $0x8] sm:$0xff] }
  0x9e   : > { %1632 = vperm.xlu2 %3942, %v1586_v22   ;;  %1622 = vperm.xlu0 %3943, %v1584_v23   ;;  %540 = vst.msk [vmem:[#allocation2 + $0x30] sm:$0xff] %vm533_vm1, %v507_v19 }
  0x9f   : > { %v4961_v24 = vpop.f32.mrf.mxu2  ;;  %v4963_v25 = vpop.f32.mrf.mxu3 }
  0xa0   : > { %v4965_v29 = vpop.f32.mrf.mxu0  ;;  %v4967_v31 = vpop.f32.mrf.mxu1 }
  0xa1   : > { %v436_v30 = vpop.xlane.xlu1 %435  ;;  %v433_v34 = vpop.xlane.xlu0 %432 }
  0xa2   : > { %v439_v32 = vpop.xlane.xlu2 %438  ;;  %v511_v33 = vmul.f32 %v4905_v51, %v436_v30  ;;  %v510_v42 = vmul.f32 %v4905_v51, %v433_v34 }
  0xa3   : > { %v512_v56 = vmul.f32 %v4905_v51, %v439_v32  ;;  %3677 = vmatmul.msk.f32.gmra.mxu0 %vm403_vm0, %v4744_v4  ;;  %3709 = vmatmul.msk.f32.gmra.mxu1 %vm403_vm0, %v4744_v4  ;;  %v1590_v41 = vld [vmem:[#allocation2 + $0x38] sm:$0xff] }
  0xa4   : > { %v1591_v40 = vld [vmem:[#allocation2 + $0x40] sm:$0xff]  ;;  %3741 = vmatmul.msk.f32.gmra.mxu2 %vm403_vm0, %v4744_v4  ;;  %3773 = vmatmul.msk.f32.gmra.mxu3 %vm403_vm0, %v4744_v4  ;;  %544 = vst.msk [vmem:[#allocation2 + $0x50] sm:$0xff] %vm533_vm1, %v511_v33 }
  0xa5   : > { %545 = vst.msk [vmem:[#allocation2 + $0x58] sm:$0xff] %vm533_vm1, %v512_v56  ;;  %1652 = vperm.xlu1 %3944, %v1590_v41   ;;  %v1589_v48 = vld [vmem:[#allocation2 + $0x30] sm:$0xff] }
  0xa6   : > { %1637 = vperm.xlu2 %3942, %v1587_v37   ;;  %1657 = vperm.xlu0 %3943, %v1591_v40   ;;  %543 = vst.msk [vmem:[#allocation2 + $0x48] sm:$0xff] %vm533_vm1, %v510_v42 }
  0xa7   : > { %v4983_v44 = vpop.f32.mrf.mxu2  ;;  %v4985_v45 = vpop.f32.mrf.mxu3 }
  0xa8   : > { %v4987_v39 = vpop.f32.mrf.mxu0  ;;  %v4989_v46 = vpop.f32.mrf.mxu1 }
  0xa9   : > { %v445_v49 = vpop.xlane.xlu1 %444  ;;  %v442_v52 = vpop.xlane.xlu0 %441 }
  0xaa   : > { %v448_v38 = vpop.xlane.xlu2 %447  ;;  %v514_v50 = vmul.f32 %v4905_v51, %v445_v49  ;;  %v513_v54 = vmul.f32 %v4905_v51, %v442_v52 }
  0xab   : > { %v515_v4 = vmul.f32 %v4905_v51, %v448_v38  ;;  %3678 = vmatmul.msk.f32.gmra.mxu0 %vm403_vm0, %v4740_v2  ;;  %3710 = vmatmul.msk.f32.gmra.mxu1 %vm403_vm0, %v4740_v2  ;;  %v1593_v55 = vld [vmem:[#allocation2 + $0x50] sm:$0xff] }
  0xac   : > { %v1594_v53 = vld [vmem:[#allocation2 + $0x58] sm:$0xff]  ;;  %3742 = vmatmul.msk.f32.gmra.mxu2 %vm403_vm0, %v4740_v2  ;;  %3774 = vmatmul.msk.f32.gmra.mxu3 %vm403_vm0, %v4740_v2  ;;  %547 = vst.msk [vmem:[#allocation2 + $0x68] sm:$0xff] %vm533_vm1, %v514_v50 }
  0xad   : > { %548 = vst.msk [vmem:[#allocation2 + $0x70] sm:$0xff] %vm533_vm1, %v515_v4  ;;  %1667 = vperm.xlu1 %3944, %v1593_v55   ;;  %v1592_v14 = vld [vmem:[#allocation2 + $0x48] sm:$0xff] }
  0xae   : > { %1672 = vperm.xlu0 %3943, %v1594_v53   ;;  %1647 = vperm.xlu2 %3942, %v1589_v48   ;;  %546 = vst.msk [vmem:[#allocation2 + $0x60] sm:$0xff] %vm533_vm1, %v513_v54 }
  0xaf   : > { %v5005_v58 = vpop.f32.mrf.mxu2  ;;  %v5007_v61 = vpop.f32.mrf.mxu3 }
  0xb0   : > { %v5009_v62 = vpop.f32.mrf.mxu0  ;;  %v5011_v63 = vpop.f32.mrf.mxu1 }
  0xb1   : > { %v454_v3 = vpop.xlane.xlu1 %453  ;;  %v451_v59 = vpop.xlane.xlu0 %450 }
  0xb2   : > { %v457_v0 = vpop.xlane.xlu2 %456  ;;  %v517_v5 = vmul.f32 %v4905_v51, %v454_v3  ;;  %v516_v15 = vmul.f32 %v4905_v51, %v451_v59 }
  0xb3   : > { %v518_v2 = vmul.f32 %v4905_v51, %v457_v0  ;;  %3679 = vmatmul.msk.f32.gmra.mxu0 %vm403_vm0, %v4737_v1  ;;  %3711 = vmatmul.msk.f32.gmra.mxu1 %vm403_vm0, %v4737_v1  ;;  %v1596_v57 = vld [vmem:[#allocation2 + $0x68] sm:$0xff] }
  0xb4   : > { %v1597_v6 = vld [vmem:[#allocation2 + $0x70] sm:$0xff]  ;;  %3743 = vmatmul.msk.f32.gmra.mxu2 %vm403_vm0, %v4737_v1  ;;  %3775 = vmatmul.msk.f32.gmra.mxu3 %vm403_vm0, %v4737_v1  ;;  %550 = vst.msk [vmem:[#allocation2 + $0x80] sm:$0xff] %vm533_vm1, %v517_v5 }
  0xb5   : > { %551 = vst.msk [vmem:[#allocation2 + $0x88] sm:$0xff] %vm533_vm1, %v518_v2  ;;  %1682 = vperm.xlu1 %3944, %v1596_v57   ;;  %v1595_v33 = vld [vmem:[#allocation2 + $0x60] sm:$0xff] }
  0xb6   : > { %1687 = vperm.xlu0 %3943, %v1597_v6   ;;  %1662 = vperm.xlu2 %3942, %v1592_v14   ;;  %549 = vst.msk [vmem:[#allocation2 + $0x78] sm:$0xff] %vm533_vm1, %v516_v15 }
  0xb7   : > { %v5027_v16 = vpop.f32.mrf.mxu2  ;;  %v5029_v17 = vpop.f32.mrf.mxu3 }
  0xb8   : > { %v5031_v18 = vpop.f32.mrf.mxu0  ;;  %v5033_v19 = vpop.f32.mrf.mxu1 }
  0xb9   : > { %v463_v23 = vpop.xlane.xlu1 %462  ;;  %v460_v30 = vpop.xlane.xlu0 %459 }
  0xba   : > { %v466_v22 = vpop.xlane.xlu2 %465  ;;  %v520_v32 = vmul.f32 %v4905_v51, %v463_v23  ;;  %v519_v34 = vmul.f32 %v4905_v51, %v460_v30 }
  0xbb   : > { %v521_v1 = vmul.f32 %v4905_v51, %v466_v22  ;;  %3680 = vmatmul.msk.f32.gmra.mxu0 %vm403_vm0, %v4770_v13  ;;  %3712 = vmatmul.msk.f32.gmra.mxu1 %vm403_vm0, %v4770_v13  ;;  %v1599_v37 = vld [vmem:[#allocation2 + $0x80] sm:$0xff] }
  0xbc   : > { %v1600_v56 = vld [vmem:[#allocation2 + $0x88] sm:$0xff]  ;;  %3744 = vmatmul.msk.f32.gmra.mxu2 %vm403_vm0, %v4770_v13  ;;  %3776 = vmatmul.msk.f32.gmra.mxu3 %vm403_vm0, %v4770_v13  ;;  %553 = vst.msk [vmem:[#allocation2 + $0x98] sm:$0xff] %vm533_vm1, %v520_v32 }
  0xbd   : > { %554 = vst.msk [vmem:[#allocation2 + $0xa0] sm:$0xff] %vm533_vm1, %v521_v1  ;;  %1697 = vperm.xlu1 %3944, %v1599_v37   ;;  %v1598_v48 = vld [vmem:[#allocation2 + $0x78] sm:$0xff] }
  0xbe   : > { %1702 = vperm.xlu0 %3943, %v1600_v56   ;;  %1677 = vperm.xlu2 %3942, %v1595_v33   ;;  %552 = vst.msk [vmem:[#allocation2 + $0x90] sm:$0xff] %vm533_vm1, %v519_v34 }
  0xbf   : > { %v5049_v40 = vpop.f32.mrf.mxu2  ;;  %v5051_v42 = vpop.f32.mrf.mxu3 }
  0xc0   : > { %v5053_v41 = vpop.f32.mrf.mxu0  ;;  %v5055_v38 = vpop.f32.mrf.mxu1 }
  0xc1   : > { %v472_v49 = vpop.xlane.xlu1 %471  ;;  %v469_v52 = vpop.xlane.xlu0 %468 }
  0xc2   : > { %v475_v4 = vpop.xlane.xlu2 %474  ;;  %v523_v13 = vmul.f32 %v4905_v51, %v472_v49  ;;  %v522_v54 = vmul.f32 %v4905_v51, %v469_v52 }
  0xc3   : > { %v524_v50 = vmul.f32 %v4905_v51, %v475_v4  ;;  %3681 = vmatmul.msk.f32.gmra.mxu0 %vm403_vm0, %v4764_v11  ;;  %3713 = vmatmul.msk.f32.gmra.mxu1 %vm403_vm0, %v4764_v11  ;;  %v1602_v55 = vld [vmem:[#allocation2 + $0x98] sm:$0xff] }
  0xc4   : > { %v1603_v53 = vld [vmem:[#allocation2 + $0xa0] sm:$0xff]  ;;  %3745 = vmatmul.msk.f32.gmra.mxu2 %vm403_vm0, %v4764_v11  ;;  %3777 = vmatmul.msk.f32.gmra.mxu3 %vm403_vm0, %v4764_v11  ;;  %556 = vst.msk [vmem:[#allocation2 + $0xb0] sm:$0xff] %vm533_vm1, %v523_v13 }
  0xc5   : > { %1712 = vperm.xlu1 %3944, %v1602_v55   ;;  %557 = vst.msk [vmem:[#allocation2 + $0xb8] sm:$0xff] %vm533_vm1, %v524_v50  ;;  %v1601_v15 = vld [vmem:[#allocation2 + $0x90] sm:$0xff] }
  0xc6   : > { %1717 = vperm.xlu0 %3943, %v1603_v53   ;;  %1692 = vperm.xlu2 %3942, %v1598_v48   ;;  %555 = vst.msk [vmem:[#allocation2 + $0xa8] sm:$0xff] %vm533_vm1, %v522_v54 }
  0xc7   : > { %v5071_v0 = vpop.f32.mrf.mxu2  ;;  %v5073_v3 = vpop.f32.mrf.mxu3 }
  0xc8   : > { %v5075_v2 = vpop.f32.mrf.mxu0  ;;  %v5077_v5 = vpop.f32.mrf.mxu1 }
  0xc9   : > { %v481_v59 = vpop.xlane.xlu1 %480  ;;  %v478_v23 = vpop.xlane.xlu0 %477 }
  0xca   : > { %v484_v11 = vpop.xlane.xlu2 %483  ;;  %v526_v6 = vmul.f32 %v4905_v51, %v481_v59  ;;  %v525_v1 = vmul.f32 %v4905_v51, %v478_v23 }
  0xcb   : > { %v527_v14 = vmul.f32 %v4905_v51, %v484_v11  ;;  %3682 = vmatmul.msk.f32.gmra.mxu0 %vm403_vm0, %v4767_v12  ;;  %3714 = vmatmul.msk.f32.gmra.mxu1 %vm403_vm0, %v4767_v12  ;;  %v1605_v57 = vld [vmem:[#allocation2 + $0xb0] sm:$0xff] }
  0xcc   : > { %3746 = vmatmul.msk.f32.gmra.mxu2 %vm403_vm0, %v4767_v12  ;;  %3778 = vmatmul.msk.f32.gmra.mxu3 %vm403_vm0, %v4767_v12  ;;  %v1606_v22 = vld [vmem:[#allocation2 + $0xb8] sm:$0xff]  ;;  %559 = vst.msk [vmem:[#allocation2 + $0xc8] sm:$0xff] %vm533_vm1, %v526_v6 }
  0xcd   : > { %1727 = vperm.xlu1 %3944, %v1605_v57   ;;  %560 = vst.msk [vmem:[#allocation2 + $0xd0] sm:$0xff] %vm533_vm1, %v527_v14  ;;  %v1604_v37 = vld [vmem:[#allocation2 + $0xa8] sm:$0xff] }
  0xce   : > { %1707 = vperm.xlu2 %3942, %v1601_v15   ;;  %1732 = vperm.xlu0 %3943, %v1606_v22   ;;  %558 = vst.msk [vmem:[#allocation2 + $0xc0] sm:$0xff] %vm533_vm1, %v525_v1 }
  0xcf   : > { %v5092_v32 = vpop.f32.mrf.mxu2  ;;  %v5094_v30 = vpop.f32.mrf.mxu3 }
  0xd0   : > { %v5097_v56 = vpop.f32.mrf.mxu0  ;;  %v5099_v12 = vpop.f32.mrf.mxu1 }
  0xd1   : > { %v490_v13 = vpop.xlane.xlu1 %489  ;;  %v487_v22 = vpop.xlane.xlu0 %486 }
  0xd2   : > { %v493_v33 = vpop.xlane.xlu2 %492  ;;  %v529_v50 = vmul.f32 %v4905_v51, %v490_v13 }
  0xd3   : > { %v530_v34 = vmul.f32 %v4905_v51, %v493_v33  ;;  %3683 = vmatmul.msk.f32.gmra.mxu0 %vm403_vm0, %v4816_v28  ;;  %3715 = vmatmul.msk.f32.gmra.mxu1 %vm403_vm0, %v4816_v28  ;;  %v1608_v49 = vld [vmem:[#allocation2 + $0xc8] sm:$0xff] }
  0xd4   : > { %3747 = vmatmul.msk.f32.gmra.mxu2 %vm403_vm0, %v4816_v28  ;;  %3779 = vmatmul.msk.f32.gmra.mxu3 %vm403_vm0, %v4816_v28  ;;  %v1609_v4 = vld [vmem:[#allocation2 + $0xd0] sm:$0xff]  ;;  %562 = vst.msk [vmem:[#allocation2 + $0xe0] sm:$0xff] %vm533_vm1, %v529_v50 }
  0xd5   : > { %563 = vst.msk [vmem:[#allocation2 + $0xe8] sm:$0xff] %vm533_vm1, %v530_v34  ;;  %1742 = vperm.xlu1 %3944, %v1608_v49   ;;  %v1607_v28 = vld [vmem:[#allocation2 + $0xc0] sm:$0xff] }
  0xd6   : > { %1722 = vperm.xlu2 %3942, %v1604_v37   ;;  %1747 = vperm.xlu0 %3943, %v1609_v4  }
  0xd7   : > { %v5112_v52 = vpop.f32.mrf.mxu2  ;;  %v5114_v53 = vpop.f32.mrf.mxu3 }
  0xd8   : > { %7023 = vst [vmem:[#allocation5_spill] sm:$0xff] %v5114_v53  ;;  %v5116_v48 = vpop.f32.mrf.mxu0  ;;  %v5118_v54 = vpop.f32.mrf.mxu1 }
  0xd9   : > { %v499_v55 = vpop.xlane.xlu1 %498  ;;  %v496_v49 = vpop.xlane.xlu0 %495 }
  0xda   : > { %v532_v59 = vmul.f32 %v4905_v51, %v499_v55  ;;  %v531_v4 = vmul.f32 %v4905_v51, %v496_v49 }
  0xdb   : > { %3684 = vmatmul.msk.f32.gmra.mxu0 %vm403_vm0, %v4790_v20  ;;  %3716 = vmatmul.msk.f32.gmra.mxu1 %vm403_vm0, %v4790_v20  ;;  %v1611_v57 = vld [vmem:[#allocation2 + $0xe0] sm:$0xff] }
  0xdc   : > { %3748 = vmatmul.msk.f32.gmra.mxu2 %vm403_vm0, %v4790_v20  ;;  %3780 = vmatmul.msk.f32.gmra.mxu3 %vm403_vm0, %v4790_v20  ;;  %565 = vst.msk [vmem:[#allocation2 + $0xf8] sm:$0xff] %vm533_vm1, %v532_v59  ;;  %v528_v20 = vmul.f32 %v4905_v51, %v487_v22  ;;  %v1612_v37 = vld [vmem:[#allocation2 + $0xe8] sm:$0xff] }
  0xdd   : > { %1757 = vperm.xlu1 %3944, %v1611_v57   ;;  %564 = vst.msk [vmem:[#allocation2 + $0xf0] sm:$0xff] %vm533_vm1, %v531_v4 }
  0xde   : > { %1737 = vperm.xlu2 %3942, %v1607_v28   ;;  %561 = vst.msk [vmem:[#allocation2 + $0xd8] sm:$0xff] %vm533_vm1, %v528_v20  ;;  %1762 = vperm.xlu0 %3943, %v1612_v37  }
  0xdf   : > { %v5130_v11 = vpop.f32.mrf.mxu2  ;;  %v5132_v6 = vpop.f32.mrf.mxu3 }
  0xe0   : > { %7024 = vst [vmem:[#allocation6_spill] sm:$0xff] %v5130_v11  ;;  %v5134_v14 = vpop.f32.mrf.mxu0  ;;  %v5136_v15 = vpop.f32.mrf.mxu1 }
  0xe1   : > { %7025 = vst [vmem:[#allocation7_spill] sm:$0xff] %v5132_v6  ;;  %v4458_v6 = vld [vmem:[%s4611_s28 + $0x8] sm:$0xff] }
  0xe2   : > { %7026 = vst [vmem:[#allocation8_spill] sm:$0xff] %v5136_v15 }
  0xe3   : > { %3685 = vmatmul.msk.f32.gmra.mxu0 %vm403_vm0, %v4793_v21  ;;  %3717 = vmatmul.msk.f32.gmra.mxu1 %vm403_vm0, %v4793_v21 }
  0xe4   : > { %3749 = vmatmul.msk.f32.gmra.mxu2 %vm403_vm0, %v4793_v21  ;;  %3781 = vmatmul.msk.f32.gmra.mxu3 %vm403_vm0, %v4793_v21  ;;  %v2031_v21 = vld [vmem:[%s6931_s3] sm:$0xff] }
  0xe5   : > { %v5173_v28 = vperm.slane %v2031_v21, 0  ;;  %v5175_v55 = vperm.slane %v2031_v21, 1  ;;  %v5182_v57 = vperm.slane %v2031_v21, 2  ;;  %v5194_v4 = vperm.slane %v2031_v21, 3 }
  0xe7   : > { %v5148_v23 = vpop.f32.mrf.mxu2  ;;  %v5150_v1 = vpop.f32.mrf.mxu3 }
  0xe8   : > { %7027 = vst [vmem:[#allocation9_spill] sm:$0xff] %v5148_v23  ;;  %v5153_v33 = vpop.f32.mrf.mxu0  ;;  %v5155_v34 = vpop.f32.mrf.mxu1 }
  0xe9   : > { %7028 = vst [vmem:[#allocation10_spill] sm:$0xff] %v5150_v1 }
  0xea   : > { %7029 = vst [vmem:[#allocation11_spill] sm:$0xff] %v5153_v33 }
  0xeb   : > { %7030 = vst [vmem:[#allocation12_spill] sm:$0xff] %v5155_v34  ;;  %3686 = vmatmul.msk.f32.gmra.mxu0 %vm403_vm0, %v4839_v36  ;;  %3718 = vmatmul.msk.f32.gmra.mxu1 %vm403_vm0, %v4839_v36 }
  0xec   : > { %3750 = vmatmul.msk.f32.gmra.mxu2 %vm403_vm0, %v4839_v36  ;;  %3782 = vmatmul.msk.f32.gmra.mxu3 %vm403_vm0, %v4839_v36 }
  0xef   : > { %v5169_v13 = vpop.f32.mrf.mxu2  ;;  %v5171_v50 = vpop.f32.mrf.mxu3 }
  0xf0   : > { %7031 = vst [vmem:[#allocation13_spill] sm:$0xff] %v5169_v13  ;;  %v5178_v59 = vpop.permute.xlu2 %1617  ;;  %v5180_v36 = vpop.f32.mrf.mxu0 }
  0xf1   : > { %7032 = vst [vmem:[#allocation14_spill] sm:$0xff] %v5171_v50  ;;  %v1775_v22 = vsub.f32 %v4921_v47, %v5178_v59  ;;  %v1776_v51 = vsub.f32 %v4923_v60, %v5178_v59  ;;  %v1777_v20 = vsub.f32 %v4939_v7, %v5178_v59  ;;  %v5190_v37 = vpop.f32.mrf.mxu1  ;;  %v1778_v49 = vsub.f32 %v4941_v8, %v5178_v59  ;;  %v1610_v47 = vld [vmem:[#allocation2 + $0xd8] sm:$0xff] }
  0xf2   : > { %7033 = vst [vmem:[#allocation15_spill] sm:$0xff] %v5178_v59  ;;  %1752 = vperm.xlu2 %3942, %v1610_v47  }
  0xf3   : > { %v2049_v50 = vsub.f32 %v1775_v22, %v5173_v28  ;;  %v2050_v13 = vsub.f32 %v1776_v51, %v5175_v55  ;;  %3687 = vmatmul.msk.f32.gmra.mxu0 %vm403_vm0, %v4813_v27  ;;  %3719 = vmatmul.msk.f32.gmra.mxu1 %vm403_vm0, %v4813_v27  ;;  %v2051_v60 = vsub.f32 %v1777_v20, %v5182_v57 }
  0xf4   : > { %3751 = vmatmul.msk.f32.gmra.mxu2 %vm403_vm0, %v4813_v27  ;;  %3783 = vmatmul.msk.f32.gmra.mxu3 %vm403_vm0, %v4813_v27  ;;  %v2052_v21 = vsub.f32 %v1778_v49, %v5194_v4  ;;  %v2817_v27 = vld [vmem:[%s6932_s4] sm:$0xff] }
  0xf5   : > { %v2305_v7 = vmul.f32 1.442695, %v2049_v50  ;;  %v2307_v8 = vmul.f32 1.442695, %v2050_v13  ;;  %v2309_v20 = vmul.f32 1.442695, %v2051_v60 }
  0xf7   : > { %v5208_v22 = vpop.f32.mrf.mxu2  ;;  %v5210_v51 = vpop.f32.mrf.mxu3  ;;  %3945 = vpow2.f32 %v2305_v7 }
  0xf8   : > { %7034 = vst [vmem:[#allocation16_spill] sm:$0xff] %v5208_v22  ;;  %v5212_v59 = vpop.permute.xlu2 %1632  ;;  %v5214_v1 = vpop.f32.mrf.mxu0  ;;  %3947 = vpow2.f32 %v2307_v8 }
  0xf9   : > { %7035 = vst [vmem:[#allocation17_spill] sm:$0xff] %v5210_v51  ;;  %v1799_v13 = vsub.f32 %v4987_v39, %v5212_v59  ;;  %v1800_v50 = vsub.f32 %v4989_v46, %v5212_v59  ;;  %v1801_v49 = vsub.f32 %v5005_v58, %v5212_v59  ;;  %v5225_v47 = vpop.f32.mrf.mxu1  ;;  %v1802_v7 = vsub.f32 %v5007_v61, %v5212_v59  ;;  %v1614_v39 = vld [vmem:[#allocation2 + $0xf8] sm:$0xff] }
  0xfa   : > { %7036 = vst [vmem:[#allocation18_spill] sm:$0xff] %v5212_v59  ;;  %v5235_v46 = vperm.slane %v2817_v27, 0  ;;  %v5237_v58 = vperm.slane %v2817_v27, 1  ;;  %3949 = vpow2.f32 %v2309_v20  ;;  %1772 = vperm.xlu1 %3944, %v1614_v39  }
  0xfb   : > { %7037 = vst [vmem:[#allocation19_spill] sm:$0xff] %v5214_v1  ;;  %v2311_v1 = vmul.f32 1.442695, %v2052_v21  ;;  %v2073_v34 = vsub.f32 %v1799_v13, %v5173_v28  ;;  %v2074_v8 = vsub.f32 %v1800_v50, %v5175_v55  ;;  %3688 = vmatmul.msk.f32.gmra.mxu0 %vm403_vm0, %v4810_v26  ;;  %3720 = vmatmul.msk.f32.gmra.mxu1 %vm403_vm0, %v4810_v26 }
  0xfc   : > { %7038 = vst [vmem:[#allocation20_spill] sm:$0xff] %v5225_v47  ;;  %3752 = vmatmul.msk.f32.gmra.mxu2 %vm403_vm0, %v4810_v26  ;;  %3784 = vmatmul.msk.f32.gmra.mxu3 %vm403_vm0, %v4810_v26  ;;  %v2075_v13 = vsub.f32 %v1801_v49, %v5182_v57  ;;  %v2076_v59 = vsub.f32 %v1802_v7, %v5194_v4  ;;  %v5259_v49 = vperm.slane %v2817_v27, 2 }
  0xfd   : > { %v3946_v61 = vpop.eup %3945  ;;  %v2353_v60 = vmul.f32 1.442695, %v2073_v34  ;;  %v2355_v21 = vmul.f32 1.442695, %v2074_v8  ;;  %3951 = vpow2.f32 %v2311_v1 }
  0xfe   : > { %v3948_v50 = vpop.eup %3947  ;;  %v2835_v23 = vmul.f32 %v3946_v61, %v5235_v46  ;;  %v2357_v7 = vmul.f32 1.442695, %v2075_v13  ;;  %v2359_v61 = vmul.f32 1.442695, %v2076_v59 }
  0xff   : > { %v5245_v47 = vpop.f32.mrf.mxu2  ;;  %v5247_v33 = vpop.f32.mrf.mxu3  ;;  %v2836_v15 = vmul.f32 %v3948_v50, %v5237_v58  ;;  %3953 = vpow2.f32 %v2353_v60 }
 0x100   : > { %7039 = vst [vmem:[#allocation21_spill] sm:$0xff] %v5245_v47  ;;  %v5251_v26 = vpop.permute.xlu2 %1637  ;;  %v5253_v34 = vpop.f32.mrf.mxu0  ;;  %3955 = vpow2.f32 %v2355_v21 }
 0x101   : > { %7040 = vst [vmem:[#allocation22_spill] sm:$0xff] %v5247_v33  ;;  %v1807_v20 = vsub.f32 %v5009_v62, %v5251_v26  ;;  %v5257_v1 = vpop.f32.mrf.mxu1  ;;  %v3950_v8 = vpop.eup %3949  ;;  %v1808_v39 = vsub.f32 %v5011_v63, %v5251_v26  ;;  %v1809_v60 = vsub.f32 %v5027_v16, %v5251_v26  ;;  %v1810_v50 = vsub.f32 %v5029_v17, %v5251_v26 }
 0x102   : > { %7041 = vst [vmem:[#allocation23_spill] sm:$0xff] %v5251_v26  ;;  %v5271_v62 = vperm.slane %v2817_v27, 3  ;;  %v3091_v21 = vadd.f32 %v2836_v15, %v2835_v23  ;;  %v2837_v17 = vmul.f32 %v3950_v8, %v5259_v49  ;;  %3957 = vpow2.f32 %v2357_v7 }
 0x103   : > { %7042 = vst [vmem:[#allocation24_spill] sm:$0xff] %v5253_v34  ;;  %3689 = vmatmul.msk.f32.gmra.mxu0 %vm403_vm0, %v4856_v43  ;;  %3721 = vmatmul.msk.f32.gmra.mxu1 %vm403_vm0, %v4856_v43  ;;  %v3952_v13 = vpop.eup %3951  ;;  %v2081_v16 = vsub.f32 %v1807_v20, %v5173_v28  ;;  %v2082_v26 = vsub.f32 %v1808_v39, %v5175_v55  ;;  %3959 = vpow2.f32 %v2359_v61 }
 0x104   : > { %7043 = vst [vmem:[#allocation25_spill] sm:$0xff] %v5257_v1  ;;  %3753 = vmatmul.msk.f32.gmra.mxu2 %vm403_vm0, %v4856_v43  ;;  %3785 = vmatmul.msk.f32.gmra.mxu3 %vm403_vm0, %v4856_v43  ;;  %v2838_v23 = vmul.f32 %v3952_v13, %v5271_v62  ;;  %v3123_v33 = vadd.f32 %v3091_v21, %v2837_v17 }
 0x105   : > { %v3954_v63 = vpop.eup %3953  ;;  %v2083_v1 = vsub.f32 %v1809_v60, %v5182_v57  ;;  %v2084_v43 = vsub.f32 %v1810_v50, %v5194_v4  ;;  %v2369_v21 = vmul.f32 1.442695, %v2081_v16 }
 0x106   : > { %v3956_v59 = vpop.eup %3955 }
 0x107   : > { %v5280_v27 = vpop.permute.xlu1 %1627  ;;  %v5282_v15 = vpop.f32.mrf.mxu2  ;;  %v2860_v17 = vmul.f32 %v3956_v59, %v5237_v58  ;;  %3961 = vpow2.f32 %v2369_v21 }
 0x108   : > { %7044 = vst [vmem:[#allocation26_spill] sm:$0xff] %v5280_v27  ;;  %v1791_v20 = vsub.f32 %v4965_v29, %v5280_v27  ;;  %v1792_v7 = vsub.f32 %v4967_v31, %v5280_v27  ;;  %v1793_v8 = vsub.f32 %v4983_v44, %v5280_v27  ;;  %v1794_v39 = vsub.f32 %v4985_v45, %v5280_v27  ;;  %v5295_v61 = vpop.f32.mrf.mxu3  ;;  %v5297_v13 = vpop.permute.xlu2 %1647 }
 0x109   : > { %7045 = vst [vmem:[#allocation27_spill] sm:$0xff] %v5282_v15  ;;  %v1823_v60 = vsub.f32 %v5053_v41, %v5297_v13  ;;  %v5301_v50 = vpop.f32.mrf.mxu0  ;;  %v5303_v29 = vpop.f32.mrf.mxu1  ;;  %v2859_v31 = vmul.f32 %v3954_v63, %v5235_v46  ;;  %v2371_v44 = vmul.f32 1.442695, %v2082_v26  ;;  %v1824_v27 = vsub.f32 %v5055_v38, %v5297_v13  ;;  %v1613_v41 = vld [vmem:[#allocation2 + $0xf0] sm:$0xff] }
 0x10a   : > { %7046 = vst [vmem:[#allocation28_spill] sm:$0xff] %v5295_v61  ;;  %v2065_v15 = vsub.f32 %v1791_v20, %v5173_v28  ;;  %v2066_v45 = vsub.f32 %v1792_v7, %v5175_v55  ;;  %v3958_v16 = vpop.eup %3957  ;;  %v2067_v63 = vsub.f32 %v1793_v8, %v5182_v57  ;;  %v5317_v26 = vmul.f32 1.442695, %v2083_v1  ;;  %1767 = vperm.xlu2 %3942, %v1613_v41  }
 0x10b   : > { %7047 = vst [vmem:[#allocation29_spill] sm:$0xff] %v5297_v13  ;;  %v2097_v61 = vsub.f32 %v1823_v60, %v5173_v28  ;;  %3690 = vmatmul.msk.f32.gmra.mxu0 %vm403_vm0, %v4836_v35  ;;  %3722 = vmatmul.msk.f32.gmra.mxu1 %vm403_vm0, %v4836_v35  ;;  %v3960_v59 = vpop.eup %3959  ;;  %v5323_v38 = vadd.f32 %v3123_v33, %v2838_v23  ;;  %v5328_v1 = vmul.f32 1.442695, %v2084_v43  ;;  %3963 = vpow2.f32 %v2371_v44 }
 0x10c   : > { %v2337_v20 = vmul.f32 1.442695, %v2065_v15  ;;  %v2339_v7 = vmul.f32 1.442695, %v2066_v45  ;;  %3754 = vmatmul.msk.f32.gmra.mxu2 %vm403_vm0, %v4836_v35  ;;  %3786 = vmatmul.msk.f32.gmra.mxu3 %vm403_vm0, %v4836_v35  ;;  %v2068_v60 = vsub.f32 %v1794_v39, %v5194_v4  ;;  %v3094_v8 = vadd.f32 %v2860_v17, %v2859_v31 }
 0x10d   : > { %7048 = vst [vmem:[#allocation30_spill] sm:$0xff] %v5323_v38  ;;  %v2098_v45 = vsub.f32 %v1824_v27, %v5175_v55  ;;  %v2861_v47 = vmul.f32 %v3958_v16, %v5259_v49  ;;  %v5334_v35 = vmul.f32 1.442695, %v2097_v61  ;;  %v2341_v39 = vmul.f32 1.442695, %v2067_v63  ;;  %v5371_v15 = vpop.eup %3961 }
 0x10e   : > { %3965 = vpow2.f32 %v2337_v20  ;;  %v5341_v21 = vmul.f32 %v3960_v59, %v5271_v62  ;;  %v2343_v61 = vmul.f32 1.442695, %v2068_v60 }
 0x10f   : > { %7049 = vst [vmem:[#allocation31_spill] sm:$0xff] %v5334_v35  ;;  %v5336_v33 = vpop.permute.xlu1 %1642  ;;  %v5338_v23 = vpop.f32.mrf.mxu2  ;;  %3967 = vpow2.f32 %v2339_v7 }
 0x110   : > { %7050 = vst [vmem:[#allocation32_spill] sm:$0xff] %v5336_v33  ;;  %v1815_v43 = vsub.f32 %v5031_v18, %v5336_v33  ;;  %v1816_v27 = vsub.f32 %v5033_v19, %v5336_v33  ;;  %v5347_v31 = vpop.f32.mrf.mxu3  ;;  %v5349_v17 = vpop.permute.xlu2 %1662  ;;  %v5361_v19 = vadd.f32 %v3094_v8, %v2861_v47  ;;  %3969 = vpow2.f32 %v2341_v39 }
 0x111   : > { %7051 = vst [vmem:[#allocation33_spill] sm:$0xff] %v5338_v23  ;;  %v1847_v16 = vsub.f32 %v5116_v48, %v5349_v17  ;;  %v1848_v41 = vsub.f32 %v5118_v54, %v5349_v17  ;;  %v5357_v18 = vpop.permute.xlu0 %1622  ;;  %v5359_v63 = vpop.f32.mrf.mxu0  ;;  %3971 = vpow2.f32 %v2343_v61 }
 0x112   : > { %7052 = vst [vmem:[#allocation34_spill] sm:$0xff] %v5347_v31  ;;  %v2089_v59 = vsub.f32 %v1815_v43, %v5173_v28  ;;  %v2090_v20 = vsub.f32 %v1816_v27, %v5175_v55  ;;  %v1783_v7 = vsub.f32 %v4943_v9, %v5357_v18  ;;  %v1784_v60 = vsub.f32 %v4945_v10, %v5357_v18  ;;  %v5369_v48 = vpop.f32.mrf.mxu1  ;;  %v4457_v43 = vld [vmem:[%s4611_s28] sm:$0xff]  ;;  %v5381_v9 = vpop.eup %3963 }
 0x113   : > { %7053 = vst [vmem:[#allocation35_spill] sm:$0xff] %v5349_v17  ;;  %v2121_v54 = vsub.f32 %v1847_v16, %v5173_v28  ;;  %v2122_v34 = vsub.f32 %v1848_v41, %v5175_v55  ;;  %v1785_v47 = vsub.f32 %v4961_v24, %v5357_v18  ;;  %v1786_v8 = vsub.f32 %v4963_v25, %v5357_v18 }
 0x114   : > { %7054 = vst [vmem:[#allocation36_spill] sm:$0xff] %v5357_v18  ;;  %3787 = vmatmul.msk.f32.vlgmr.msrb.gmra.mxu0 %vm403_vm0, %v4457_v43  ;;  %v5383_v10 = vmul.f32 1.442695, %v2098_v45  ;;  %v2057_v16 = vsub.f32 %v1783_v7, %v5173_v28  ;;  %v2058_v41 = vsub.f32 %v1784_v60, %v5175_v55  ;;  %3819 = vmatmul.msk.f32.vlgmr.msrb.gmra.mxu1 %vm403_vm0, %v4457_v43  ;;  %v3966_v24 = vpop.eup %3965  ;;  %v5391_v25 = vmul.f32 1.442695, %v2089_v59 }
 0x115   : > { %3851 = vmatmul.msk.f32.vlgmr.msrb.gmra.mxu2 %vm403_vm0, %v4457_v43  ;;  %3883 = vmatmul.msk.f32.vlgmr.msrb.gmra.mxu3 %vm403_vm0, %v4457_v43  ;;  %v2059_v27 = vsub.f32 %v1785_v47, %v5182_v57  ;;  %v3968_v7 = vpop.eup %3967  ;;  %v5399_v38 = vmul.f32 1.442695, %v2090_v20  ;;  %v5401_v60 = vmul.f32 1.442695, %v2121_v54  ;;  %v5403_v18 = vmul.f32 1.442695, %v2122_v34 }
 0x116   : > { %7055 = vst [vmem:[#allocation37_spill] sm:$0xff] %v5383_v10  ;;  %v2321_v59 = vmul.f32 1.442695, %v2057_v16  ;;  %v2323_v10 = vmul.f32 1.442695, %v2058_v41  ;;  %v2060_v45 = vsub.f32 %v1786_v8, %v5194_v4  ;;  %v2851_v43 = vmul.f32 %v3966_v24, %v5235_v46 }
 0x117   : > { %7056 = vst [vmem:[#allocation38_spill] sm:$0xff] %v5401_v60  ;;  %v5405_v35 = vpop.permute.xlu1 %1652  ;;  %v5407_v44 = vpop.f32.mrf.mxu2  ;;  %v2325_v39 = vmul.f32 1.442695, %v2059_v27  ;;  %v2852_v41 = vmul.f32 %v3968_v7, %v5237_v58 }
 0x118   : > { %7057 = vst [vmem:[#allocation39_spill] sm:$0xff] %v5403_v18  ;;  %v1831_v47 = vsub.f32 %v5075_v2, %v5405_v35  ;;  %v1832_v20 = vsub.f32 %v5077_v5, %v5405_v35  ;;  %v5414_v54 = vpop.f32.mrf.mxu3  ;;  %v5416_v34 = vpop.permute.xlu2 %1677  ;;  %v2327_v60 = vmul.f32 1.442695, %v2060_v45  ;;  %3973 = vpow2.f32 %v2321_v59  ;;  %v7065_v59 = vld [vmem:[#allocation8_spill] sm:$0xff] }
 0x119   : > { %7058 = vst [vmem:[#allocation40_spill] sm:$0xff] %v5405_v35  ;;  %v1871_v61 = vsub.f32 %v5180_v36, %v5416_v34  ;;  %v1872_v2 = vsub.f32 %v5190_v37, %v5416_v34  ;;  %v5425_v8 = vpop.permute.xlu0 %1657  ;;  %v5427_v5 = vpop.f32.mrf.mxu0  ;;  %3975 = vpow2.f32 %v2323_v10  ;;  %v3093_v10 = vadd.f32 %v2852_v41, %v2851_v43  ;;  %v7070_v41 = vld [vmem:[#allocation11_spill] sm:$0xff] }
 0x11a   : > { %7059 = vst [vmem:[#allocation41_spill] sm:$0xff] %v5416_v34  ;;  %v2105_v27 = vsub.f32 %v1831_v47, %v5173_v28  ;;  %v2106_v24 = vsub.f32 %v1832_v20, %v5175_v55  ;;  %v1839_v18 = vsub.f32 %v5097_v56, %v5425_v8  ;;  %v1840_v16 = vsub.f32 %v5099_v12, %v5425_v8  ;;  %v5436_v36 = vpop.f32.mrf.mxu1  ;;  %v3970_v20 = vpop.eup %3969 }
 0x11b   : > { %7060 = vst [vmem:[#allocation42_spill] sm:$0xff] %v5425_v8  ;;  %v2145_v7 = vsub.f32 %v1871_v61, %v5173_v28  ;;  %v2146_v47 = vsub.f32 %v1872_v2, %v5175_v55  ;;  %v3972_v61 = vpop.eup %3971  ;;  %3977 = vpow2.f32 %v2325_v39  ;;  %v5497_v43 = vmul.f32 %v5371_v15, %v5235_v46 }
 0x11c   : > { %3788 = vmatmul.msk.f32.gmra.mxu0 %vm403_vm0, %v4458_v6  ;;  %v2113_v17 = vsub.f32 %v1839_v18, %v5173_v28  ;;  %3820 = vmatmul.msk.f32.gmra.mxu1 %vm403_vm0, %v4458_v6  ;;  %v5453_v37 = vmul.f32 1.442695, %v2105_v27  ;;  %v5455_v2 = vmul.f32 1.442695, %v2106_v24  ;;  %v2114_v18 = vsub.f32 %v1840_v16, %v5175_v55 }
 0x11d   : > { %3852 = vmatmul.msk.f32.gmra.mxu2 %vm403_vm0, %v4458_v6  ;;  %3884 = vmatmul.msk.f32.gmra.mxu3 %vm403_vm0, %v4458_v6  ;;  %v5460_v56 = vmul.f32 1.442695, %v2145_v7  ;;  %v5462_v12 = vmul.f32 1.442695, %v2146_v47  ;;  %v2853_v24 = vmul.f32 %v3970_v20, %v5259_v49  ;;  %v5473_v22 = vmul.f32 %v3972_v61, %v5271_v62 }
 0x11e   : > { %v5465_v51 = vmul.f32 1.442695, %v2113_v17  ;;  %v5485_v47 = vadd.f32 %v5361_v19, %v5341_v21  ;;  %v3974_v34 = vpop.eup %3973  ;;  %3979 = vpow2.f32 %v2327_v60 }
 0x11f   : > { %7061 = vst [vmem:[#allocation43_spill] sm:$0xff] %v5460_v56  ;;  %v5467_v45 = vpop.permute.xlu1 %1667  ;;  %v5469_v27 = vpop.f32.mrf.mxu2  ;;  %3981 = vpow2.f32 %v5317_v26 }
 0x120   : > { %7062 = vst [vmem:[#allocation44_spill] sm:$0xff] %v5462_v12  ;;  %v1855_v6 = vsub.f32 %v5134_v14, %v5467_v45  ;;  %v1856_v7 = vsub.f32 %v7065_v59, %v5467_v45  ;;  %v5479_v16 = vpop.f32.mrf.mxu3  ;;  %v5481_v17 = vpop.permute.xlu2 %1692  ;;  %3983 = vpow2.f32 %v5328_v1 }
 0x121   : > { %7063 = vst [vmem:[#allocation45_spill] sm:$0xff] %v5465_v51  ;;  %v1895_v61 = vsub.f32 %v5301_v50, %v5481_v17  ;;  %v1896_v14 = vsub.f32 %v5303_v29, %v5481_v17  ;;  %v5493_v59 = vpop.permute.xlu0 %1672  ;;  %v750_v12 = vpop.f32.mrf.mxu0  ;;  %v4459_v51 = vld [vmem:[%s4611_s28 + $0x10] sm:$0xff]  ;;  %3985 = vpow2.f32 %v5391_v25 }
 0x122   : > { %7064 = vst [vmem:[#allocation46_spill] sm:$0xff] %v5467_v45  ;;  %v2129_v21 = vsub.f32 %v1855_v6, %v5173_v28  ;;  %v2130_v19 = vsub.f32 %v1856_v7, %v5175_v55  ;;  %v1863_v20 = vsub.f32 %v7070_v41, %v5493_v59  ;;  %v863_v56 = vpop.f32.mrf.mxu1  ;;  %v3976_v7 = vpop.eup %3975  ;;  %v5513_v41 = vmul.f32 1.442695, %v2114_v18  ;;  %v7089_v18 = vld [vmem:[#allocation24_spill] sm:$0xff] }
 0x123   : > { %7066 = vst [vmem:[#allocation8_spill] sm:$0xff] %v5481_v17  ;;  %v2169_v15 = vsub.f32 %v1895_v61, %v5173_v28  ;;  %v2170_v6 = vsub.f32 %v1896_v14, %v5175_v55  ;;  %v3978_v61 = vpop.eup %3977  ;;  %v2844_v17 = vmul.f32 %v3976_v7, %v5237_v58  ;;  %3987 = vpow2.f32 %v5399_v38 }
 0x124   : > { %7067 = vst [vmem:[#allocation47_spill] sm:$0xff] %v5485_v47  ;;  %v7071_v47 = vld [vmem:[#allocation12_spill] sm:$0xff]  ;;  %3789 = vmatmul.msk.f32.gmra.mxu0 %vm403_vm0, %v4459_v51  ;;  %v2137_v39 = vsub.f32 %v1863_v20, %v5173_v28  ;;  %3821 = vmatmul.msk.f32.gmra.mxu1 %vm403_vm0, %v4459_v51  ;;  %v5522_v14 = vmul.f32 1.442695, %v2129_v21  ;;  %v5524_v11 = vmul.f32 1.442695, %v2130_v19  ;;  %v2843_v20 = vmul.f32 %v3974_v34, %v5235_v46 }
 0x125   : > { %7069 = vst [vmem:[#allocation48_spill] sm:$0xff] %v5493_v59  ;;  %v1864_v50 = vsub.f32 %v7071_v47, %v5493_v59  ;;  %3853 = vmatmul.msk.f32.gmra.mxu2 %vm403_vm0, %v4459_v51  ;;  %3885 = vmatmul.msk.f32.gmra.mxu3 %vm403_vm0, %v4459_v51  ;;  %v5530_v47 = vmul.f32 1.442695, %v2169_v15  ;;  %v5532_v8 = vmul.f32 1.442695, %v2170_v6  ;;  %v2845_v23 = vmul.f32 %v3978_v61, %v5259_v49  ;;  %v7082_v51 = vld [vmem:[#allocation19_spill] sm:$0xff] }
 0x126   : > { %7074 = vst [vmem:[#allocation11_spill] sm:$0xff] %v5522_v14  ;;  %v5535_v31 = vmul.f32 1.442695, %v2137_v39  ;;  %v7083_v6 = vld [vmem:[#allocation20_spill] sm:$0xff]  ;;  %v2868_v39 = vmul.f32 %v5381_v9, %v5237_v58 }
 0x127   : > { %7075 = vst [vmem:[#allocation12_spill] sm:$0xff] %v5524_v11  ;;  %v2138_v29 = vsub.f32 %v1864_v50, %v5175_v55  ;;  %v5537_v21 = vpop.permute.xlu1 %1682  ;;  %v5539_v19 = vpop.f32.mrf.mxu2  ;;  %v3125_v50 = vadd.f32 %v3093_v10, %v2853_v24  ;;  %v3092_v11 = vadd.f32 %v2844_v17, %v2843_v20  ;;  %v7095_v17 = vsub.f32 %v5051_v42, %v5336_v33 }
 0x128   : > { %7077 = vst [vmem:[#allocation49_spill] sm:$0xff] %v5530_v47  ;;  %v1879_v15 = vsub.f32 %v7082_v51, %v5537_v21  ;;  %v5547_v60 = vpop.f32.mrf.mxu3  ;;  %v5549_v34 = vpop.permute.xlu2 %1707  ;;  %v7088_v47 = vsub.f32 %v5049_v40, %v5336_v33 }
 0x129   : > { %7078 = vst [vmem:[#allocation50_spill] sm:$0xff] %v5532_v8  ;;  %v1880_v8 = vsub.f32 %v7083_v6, %v5537_v21  ;;  %v1919_v24 = vsub.f32 %v750_v12, %v5549_v34  ;;  %v1920_v10 = vsub.f32 %v863_v56, %v5549_v34  ;;  %v5558_v51 = vpop.permute.xlu0 %1687  ;;  %v5560_v6 = vpop.f32.mrf.mxu0  ;;  %v7090_v12 = vld [vmem:[#allocation25_spill] sm:$0xff]  ;;  %v2092_v20 = vsub.f32 %v7095_v17, %v5194_v4 }
 0x12a   : > { %7079 = vst [vmem:[#allocation51_spill] sm:$0xff] %v5535_v31  ;;  %v2091_v26 = vsub.f32 %v7088_v47, %v5182_v57  ;;  %v2153_v31 = vsub.f32 %v1879_v15, %v5173_v28  ;;  %v1887_v61 = vsub.f32 %v7089_v18, %v5558_v51  ;;  %v1888_v7 = vsub.f32 %v7090_v12, %v5558_v51  ;;  %v5572_v56 = vpop.f32.mrf.mxu1  ;;  %v4460_v15 = vld [vmem:[%s4611_s28 + $0x18] sm:$0xff]  ;;  %v7109_v17 = vld [vmem:[#allocation37_spill] sm:$0xff] }
 0x12b   : > { %7080 = vst [vmem:[#allocation52_spill] sm:$0xff] %v5537_v21  ;;  %v2154_v9 = vsub.f32 %v1880_v8, %v5175_v55  ;;  %v2193_v40 = vsub.f32 %v1919_v24, %v5173_v28  ;;  %v2194_v47 = vsub.f32 %v1920_v10, %v5175_v55  ;;  %v3980_v8 = vpop.eup %3979  ;;  %v5582_v18 = vmul.f32 1.442695, %v2138_v29  ;;  %v7092_v10 = vld [vmem:[#allocation27_spill] sm:$0xff] }
 0x12c   : > { %7081 = vst [vmem:[#allocation53_spill] sm:$0xff] %v5539_v19  ;;  %3790 = vmatmul.msk.f32.gmra.mxu0 %vm403_vm0, %v4460_v15  ;;  %v2161_v14 = vsub.f32 %v1887_v61, %v5173_v28  ;;  %v2162_v59 = vsub.f32 %v1888_v7, %v5175_v55  ;;  %3822 = vmatmul.msk.f32.gmra.mxu1 %vm403_vm0, %v4460_v15  ;;  %v5590_v24 = vmul.f32 1.442695, %v2153_v31  ;;  %v3982_v12 = vpop.eup %3981 }
 0x12d   : > { %7084 = vst [vmem:[#allocation19_spill] sm:$0xff] %v5547_v60  ;;  %3854 = vmatmul.msk.f32.gmra.mxu2 %vm403_vm0, %v4460_v15  ;;  %3886 = vmatmul.msk.f32.gmra.mxu3 %vm403_vm0, %v4460_v15  ;;  %v5597_v60 = vmul.f32 1.442695, %v2154_v9  ;;  %v5599_v61 = vmul.f32 1.442695, %v2193_v40  ;;  %v2846_v29 = vmul.f32 %v3980_v8, %v5271_v62  ;;  %v3124_v19 = vadd.f32 %v3092_v11, %v2845_v23 }
 0x12e   : > { %7085 = vst [vmem:[#allocation20_spill] sm:$0xff] %v5549_v34  ;;  %v5601_v7 = vmul.f32 1.442695, %v2194_v47  ;;  %v5604_v31 = vmul.f32 1.442695, %v2161_v14  ;;  %v3095_v47 = vadd.f32 %v2868_v39, %v5497_v43 }
 0x12f   : > { %7087 = vst [vmem:[#allocation54_spill] sm:$0xff] %v5558_v51  ;;  %v5606_v34 = vpop.permute.xlu1 %1697  ;;  %v5608_v53 = vpop.f32.mrf.mxu2  ;;  %v5615_v9 = vmul.f32 1.442695, %v2162_v59  ;;  %v5631_v59 = vadd.f32 %v3125_v50, %v5473_v22  ;;  %v2389_v15 = vmul.f32 1.442695, %v2091_v26  ;;  %v4461_v50 = vld [vmem:[%s4611_s28 + $0x20] sm:$0xff]  ;;  %v5647_v26 = vadd.f32 %v3124_v19, %v2846_v29 }
 0x130   : > { %7094 = vst [vmem:[#allocation24_spill] sm:$0xff] %v5606_v34  ;;  %v1903_v40 = vsub.f32 %v5359_v63, %v5606_v34  ;;  %v1904_v1 = vsub.f32 %v5369_v48, %v5606_v34  ;;  %v5621_v14 = vpop.f32.mrf.mxu3  ;;  %v2869_v63 = vmul.f32 %v3982_v12, %v5259_v49  ;;  %v2391_v12 = vmul.f32 1.442695, %v2092_v20 }
 0x131   : > { %7096 = vst [vmem:[#allocation25_spill] sm:$0xff] %v5621_v14  ;;  %v5626_v23 = vpop.permute.xlu0 %1702  ;;  %v5628_v42 = vpop.f32.mrf.mxu0  ;;  %3989 = vpow2.f32 %v2389_v15  ;;  %v7100_v19 = vsub.f32 %v5071_v0, %v5297_v13  ;;  %v7101_v20 = vsub.f32 %v5073_v3, %v5297_v13  ;;  %v7104_v3 = vld [vmem:[#allocation31_spill] sm:$0xff] }
 0x132   : > { %7097 = vst [vmem:[#allocation27_spill] sm:$0xff] %v5626_v23  ;;  %v2177_v48 = vsub.f32 %v1903_v40, %v5173_v28  ;;  %v1911_v8 = vsub.f32 %v5427_v5, %v5626_v23  ;;  %v1912_v43 = vsub.f32 %v5436_v36, %v5626_v23  ;;  %v5639_v39 = vpop.f32.mrf.mxu1  ;;  %v2178_v22 = vsub.f32 %v1904_v1, %v5175_v55  ;;  %v3984_v40 = vpop.eup %3983 }
 0x133   : > { %7098 = vst [vmem:[#allocation55_spill] sm:$0xff] %v5631_v59  ;;  %v3127_v25 = vadd.f32 %v3095_v47, %v2869_v63  ;;  %v2099_v29 = vsub.f32 %v7100_v19, %v5182_v57  ;;  %v2870_v47 = vmul.f32 %v3984_v40, %v5271_v62  ;;  %3991 = vpow2.f32 %v2391_v12 }
 0x134   : > { %3791 = vmatmul.msk.f32.gmra.mxu0 %vm403_vm0, %v4461_v50  ;;  %7099 = vst [vmem:[#allocation56_spill] sm:$0xff] %v5647_v26  ;;  %v2185_v5 = vsub.f32 %v1911_v8, %v5173_v28  ;;  %v2186_v36 = vsub.f32 %v1912_v43, %v5175_v55  ;;  %3823 = vmatmul.msk.f32.gmra.mxu1 %vm403_vm0, %v4461_v50  ;;  %v5665_v43 = vmul.f32 1.442695, %v2177_v48  ;;  %v5670_v63 = vmul.f32 1.442695, %v2178_v22  ;;  %v3986_v48 = vpop.eup %3985  ;;  %v5687_v22 = vpop.permute.xlu2 %1722 }
 0x135   : > { %3855 = vmatmul.msk.f32.gmra.mxu2 %vm403_vm0, %v4461_v50  ;;  %3887 = vmatmul.msk.f32.gmra.mxu3 %vm403_vm0, %v4461_v50  ;;  %v2100_v8 = vsub.f32 %v7101_v20, %v5194_v4  ;;  %3993 = vpow2.f32 %v7104_v3  ;;  %7105 = vst [vmem:[#allocation31_spill] sm:$0xff] %v5687_v22  ;;  %v3988_v13 = vpop.eup %3987 }
 0x136   : > { %v5672_v15 = vmul.f32 1.442695, %v2185_v5  ;;  %v5674_v50 = vmul.f32 1.442695, %v2186_v36  ;;  %v5689_v5 = vadd.f32 %v3127_v25, %v2870_v47  ;;  %v7107_v36 = vsub.f32 %v5092_v32, %v5405_v35 }
 0x137   : > { %v5676_v0 = vpop.permute.xlu1 %1712  ;;  %v5678_v19 = vpop.f32.mrf.mxu2  ;;  %3995 = vpow2.f32 %v7109_v17  ;;  %v2407_v11 = vmul.f32 1.442695, %v2100_v8  ;;  %v4462_v8 = vld [vmem:[%s4611_s28 + $0x28] sm:$0xff] }
 0x138   : > { %7102 = vst [vmem:[#allocation57_spill] sm:$0xff] %v5676_v0  ;;  %v1927_v20 = vsub.f32 %v5560_v6, %v5676_v0  ;;  %v1928_v40 = vsub.f32 %v5572_v56, %v5676_v0  ;;  %v5685_v12 = vpop.f32.mrf.mxu3  ;;  %v2107_v38 = vsub.f32 %v7107_v36, %v5182_v57  ;;  %v2405_v56 = vmul.f32 1.442695, %v2099_v29 }
 0x139   : > { %7103 = vst [vmem:[#allocation58_spill] sm:$0xff] %v5678_v19  ;;  %v5697_v1 = vpop.permute.xlu0 %1717  ;;  %v759_v6 = vpop.f32.mrf.mxu0 }
 0x13a   : > { %7106 = vst [vmem:[#allocation59_spill] sm:$0xff] %v5689_v5  ;;  %v2201_v25 = vsub.f32 %v1927_v20, %v5173_v28  ;;  %v2202_v47 = vsub.f32 %v1928_v40, %v5175_v55  ;;  %v1935_v32 = vsub.f32 %v5628_v42, %v5697_v1  ;;  %v1936_v36 = vsub.f32 %v5639_v39, %v5697_v1  ;;  %v872_v3 = vpop.f32.mrf.mxu1  ;;  %v3990_v5 = vpop.eup %3989 }
 0x13b   : > { %7108 = vst [vmem:[#allocation60_spill] sm:$0xff] %v5697_v1  ;;  %v1943_v17 = vsub.f32 %v759_v6, %v5687_v22  ;;  %v1944_v29 = vsub.f32 %v872_v3, %v5687_v22  ;;  %v2875_v20 = vmul.f32 %v3986_v48, %v5235_v46  ;;  %v3992_v40 = vpop.eup %3991  ;;  %v7110_v6 = vsub.f32 %v5094_v30, %v5405_v35 }
 0x13c   : > { %3792 = vmatmul.msk.f32.gmra.mxu0 %vm403_vm0, %v4462_v8  ;;  %v2209_v39 = vsub.f32 %v1935_v32, %v5173_v28  ;;  %3824 = vmatmul.msk.f32.gmra.mxu1 %vm403_vm0, %v4462_v8  ;;  %v2421_v33 = vmul.f32 1.442695, %v2107_v38  ;;  %v3994_v59 = vpop.eup %3993  ;;  %v5722_v26 = vmul.f32 1.442695, %v2201_v25  ;;  %v2210_v42 = vsub.f32 %v1936_v36, %v5175_v55 }
 0x13d   : > { %3856 = vmatmul.msk.f32.gmra.mxu2 %vm403_vm0, %v4462_v8  ;;  %v2108_v3 = vsub.f32 %v7110_v6, %v5194_v4  ;;  %3888 = vmatmul.msk.f32.gmra.mxu3 %vm403_vm0, %v4462_v8  ;;  %v2876_v32 = vmul.f32 %v3988_v13, %v5237_v58  ;;  %v5729_v19 = vmul.f32 1.442695, %v2202_v47  ;;  %v2217_v14 = vsub.f32 %v1943_v17, %v5173_v28  ;;  %v3996_v38 = vpop.eup %3995 }
 0x13e   : > { %v2218_v30 = vsub.f32 %v1944_v29, %v5175_v55  ;;  %3997 = vpow2.f32 %v2405_v56  ;;  %v5733_v6 = vmul.f32 1.442695, %v2209_v39  ;;  %v2877_v48 = vmul.f32 %v3990_v5, %v5259_v49 }
 0x13f   : > { %v985_v25 = vpop.f32.mrf.mxu2  ;;  %v5735_v35 = vpop.permute.xlu1 %1727  ;;  %v3096_v36 = vadd.f32 %v2876_v32, %v2875_v20  ;;  %3999 = vpow2.f32 %v2407_v11  ;;  %v2883_v47 = vmul.f32 %v3994_v59, %v5235_v46  ;;  %v2884_v17 = vmul.f32 %v3996_v38, %v5237_v58 }
 0x140   : > { %7111 = vst [vmem:[#allocation37_spill] sm:$0xff] %v5733_v6  ;;  %v1945_v8 = vsub.f32 %v985_v25, %v5687_v22  ;;  %v1098_v13 = vpop.f32.mrf.mxu3  ;;  %4001 = vpow2.f32 %v5453_v37  ;;  %v5742_v56 = vmul.f32 1.442695, %v2210_v42  ;;  %v2423_v5 = vmul.f32 1.442695, %v2108_v3  ;;  %v4463_v42 = vld [vmem:[%s4611_s28 + $0x30] sm:$0xff] }
 0x141   : > { %7112 = vst [vmem:[#allocation61_spill] sm:$0xff] %v5735_v35  ;;  %v1946_v29 = vsub.f32 %v1098_v13, %v5687_v22  ;;  %v762_v39 = vpop.f32.mrf.mxu0  ;;  %4003 = vpow2.f32 %v5455_v2  ;;  %v2878_v25 = vmul.f32 %v3992_v40, %v5271_v62  ;;  %v3128_v59 = vadd.f32 %v3096_v36, %v2877_v48  ;;  %v7113_v40 = vld [vmem:[#allocation42_spill] sm:$0xff]  ;;  %v7115_v48 = vld [vmem:[#allocation5_spill] sm:$0xff] }
 0x142   : > { %v2219_v11 = vsub.f32 %v1945_v8, %v5182_v57  ;;  %v875_v20 = vpop.f32.mrf.mxu1  ;;  %v1951_v32 = vsub.f32 %v762_v39, %v5735_v35  ;;  %v5749_v6 = vmul.f32 1.442695, %v2217_v14  ;;  %v3097_v38 = vadd.f32 %v2884_v17, %v2883_v47  ;;  %v7118_v39 = vld [vmem:[#allocation45_spill] sm:$0xff] }
 0x143   : > { %v2220_v37 = vsub.f32 %v1946_v29, %v5194_v4  ;;  %4005 = vpow2.f32 %v2421_v33  ;;  %v7114_v3 = vsub.f32 %v5112_v52, %v7113_v40  ;;  %v7116_v36 = vsub.f32 %v7115_v48, %v7113_v40 }
 0x144   : > { %3793 = vmatmul.msk.f32.gmra.mxu0 %vm403_vm0, %v4463_v42  ;;  %v3998_v13 = vpop.eup %3997  ;;  %v2645_v2 = vmul.f32 1.442695, %v2219_v11  ;;  %3825 = vmatmul.msk.f32.gmra.mxu1 %vm403_vm0, %v4463_v42  ;;  %4007 = vpow2.f32 %v2423_v5  ;;  %v5764_v47 = vmul.f32 1.442695, %v2218_v30  ;;  %v1952_v33 = vsub.f32 %v875_v20, %v5735_v35  ;;  %v5773_v30 = vpop.permute.xlu0 %1732 }
 0x145   : > { %3857 = vmatmul.msk.f32.gmra.mxu2 %vm403_vm0, %v4463_v42  ;;  %v2115_v14 = vsub.f32 %v7114_v3, %v5182_v57  ;;  %v2116_v8 = vsub.f32 %v7116_v36, %v5194_v4  ;;  %v4000_v29 = vpop.eup %3999  ;;  %3889 = vmatmul.msk.f32.gmra.mxu3 %vm403_vm0, %v4463_v42  ;;  %v2885_v17 = vmul.f32 %v3998_v13, %v5259_v49  ;;  %4009 = vpow2.f32 %v7118_v39 }
 0x146   : > { %7117 = vst [vmem:[#allocation5_spill] sm:$0xff] %v5764_v47  ;;  %v4002_v5 = vpop.eup %4001  ;;  %4011 = vpow2.f32 %v2645_v2  ;;  %v2225_v52 = vsub.f32 %v1951_v32, %v5173_v28  ;;  %v5771_v11 = vadd.f32 %v3128_v59, %v2878_v25  ;;  %v2647_v36 = vmul.f32 1.442695, %v2220_v37  ;;  %v4464_v47 = vld [vmem:[%s4611_s28 + $0x38] sm:$0xff] }
 0x147   : > { %v2437_v3 = vmul.f32 1.442695, %v2115_v14  ;;  %v4004_v48 = vpop.eup %4003  ;;  %v988_v22 = vpop.f32.mrf.mxu2  ;;  %7120 = vst [vmem:[#allocation62_spill] sm:$0xff] %v5773_v30  ;;  %v2886_v20 = vmul.f32 %v4000_v29, %v5271_v62  ;;  %v3129_v40 = vadd.f32 %v3097_v38, %v2885_v17  ;;  %v2891_v42 = vmul.f32 %v4002_v5, %v5235_v46 }
 0x148   : > { %7119 = vst [vmem:[#allocation45_spill] sm:$0xff] %v5771_v11  ;;  %v1953_v13 = vsub.f32 %v988_v22, %v5735_v35  ;;  %v1101_v39 = vpop.f32.mrf.mxu3  ;;  %v2892_v2 = vmul.f32 %v4004_v48, %v5237_v58  ;;  %4013 = vpow2.f32 %v5513_v41  ;;  %v2439_v32 = vmul.f32 1.442695, %v2116_v8 }
 0x149   : > { %v4006_v25 = vpop.eup %4005  ;;  %v2226_v59 = vsub.f32 %v1952_v33, %v5175_v55  ;;  %v1954_v37 = vsub.f32 %v1101_v39, %v5735_v35  ;;  %v765_v14 = vpop.f32.mrf.mxu0  ;;  %v5782_v11 = vadd.f32 %v3129_v40, %v2886_v20  ;;  %4015 = vpow2.f32 %v2437_v3  ;;  %v7123_v40 = vld [vmem:[#allocation6_spill] sm:$0xff]  ;;  %v7124_v3 = vld [vmem:[#allocation35_spill] sm:$0xff] }
 0x14a   : > { %v4008_v38 = vpop.eup %4007  ;;  %v5784_v29 = vmul.f32 1.442695, %v2225_v52  ;;  %v2227_v22 = vsub.f32 %v1953_v13, %v5182_v57  ;;  %v878_v17 = vpop.f32.mrf.mxu1  ;;  %v1959_v5 = vsub.f32 %v765_v14, %v5773_v30  ;;  %v3098_v41 = vadd.f32 %v2892_v2, %v2891_v42 }
 0x14b   : > { %7121 = vst [vmem:[#allocation63_spill] sm:$0xff] %v5782_v11  ;;  %v4010_v8 = vpop.eup %4009  ;;  %v2228_v48 = vsub.f32 %v1954_v37, %v5194_v4  ;;  %v1960_v33 = vsub.f32 %v878_v17, %v5773_v30  ;;  %4017 = vpow2.f32 %v2439_v32  ;;  %v7125_v52 = vsub.f32 %v7123_v40, %v7124_v3  ;;  %v7127_v17 = vld [vmem:[#allocation7_spill] sm:$0xff] }
 0x14c   : > { %7122 = vst [vmem:[#allocation64_spill] sm:$0xff] %v5784_v29  ;;  %3794 = vmatmul.msk.f32.gmra.mxu0 %vm403_vm0, %v4464_v47  ;;  %v4012_v39 = vpop.eup %4011  ;;  %4019 = vpow2.f32 %v2647_v36  ;;  %v2661_v13 = vmul.f32 1.442695, %v2227_v22  ;;  %v2233_v14 = vsub.f32 %v1959_v5, %v5173_v28  ;;  %3826 = vmatmul.msk.f32.gmra.mxu1 %vm403_vm0, %v4464_v47  ;;  %v2893_v42 = vmul.f32 %v4006_v25, %v5259_v49 }
 0x14d   : > { %v2123_v20 = vsub.f32 %v7125_v52, %v5182_v57  ;;  %3858 = vmatmul.msk.f32.gmra.mxu2 %vm403_vm0, %v4464_v47  ;;  %v5800_v2 = vmul.f32 1.442695, %v2226_v59  ;;  %3890 = vmatmul.msk.f32.gmra.mxu3 %vm403_vm0, %v4464_v47  ;;  %v2894_v32 = vmul.f32 %v4008_v38, %v5271_v62  ;;  %v2899_v37 = vmul.f32 %v4010_v8, %v5235_v46  ;;  %v5813_v38 = vpop.permute.xlu2 %1737 }
 0x14e   : > { %v7128_v36 = vsub.f32 %v7127_v17, %v7124_v3  ;;  %v4014_v5 = vpop.eup %4013  ;;  %v5810_v40 = vmul.f32 %v4012_v39, %v5259_v49  ;;  %4021 = vpow2.f32 %v2661_v13  ;;  %v3130_v52 = vadd.f32 %v3098_v41, %v2893_v42  ;;  %7130 = vst [vmem:[#allocation65_spill] sm:$0xff] %v5813_v38  ;;  %v7132_v41 = vld [vmem:[#allocation38_spill] sm:$0xff]  ;;  %v7133_v42 = vld [vmem:[#allocation39_spill] sm:$0xff] }
 0x14f   : > { %7126 = vst [vmem:[#allocation6_spill] sm:$0xff] %v5800_v2  ;;  %v2453_v25 = vmul.f32 1.442695, %v2123_v20  ;;  %v4016_v59 = vpop.eup %4015  ;;  %v2663_v35 = vmul.f32 1.442695, %v2228_v48  ;;  %v2234_v47 = vsub.f32 %v1960_v33, %v5175_v55  ;;  %v991_v11 = vpop.f32.mrf.mxu2  ;;  %v2900_v8 = vmul.f32 %v4014_v5, %v5237_v58  ;;  %v7134_v5 = vld [vmem:[#allocation9_spill] sm:$0xff] }
 0x150   : > { %v2124_v22 = vsub.f32 %v7128_v36, %v5194_v4  ;;  %7129 = vst [vmem:[#allocation7_spill] sm:$0xff] %v5810_v40  ;;  %v5816_v29 = vmul.f32 1.442695, %v2233_v14  ;;  %v1961_v17 = vsub.f32 %v991_v11, %v5773_v30  ;;  %v1104_v36 = vpop.f32.mrf.mxu3  ;;  %v2901_v39 = vmul.f32 %v4016_v59, %v5259_v49 }
 0x151   : > { %4023 = vpow2.f32 %v7132_v41  ;;  %v4018_v20 = vpop.eup %4017  ;;  %v1962_v48 = vsub.f32 %v1104_v36, %v5773_v30  ;;  %v768_v33 = vpop.f32.mrf.mxu0  ;;  %v3099_v13 = vadd.f32 %v2900_v8, %v2899_v37  ;;  %v7135_v14 = vsub.f32 %v7134_v5, %v5467_v45  ;;  %v7136_v41 = vld [vmem:[#allocation10_spill] sm:$0xff] }
 0x152   : > { %v2455_v2 = vmul.f32 1.442695, %v2124_v22  ;;  %7131 = vst [vmem:[#allocation66_spill] sm:$0xff] %v5816_v29  ;;  %4025 = vpow2.f32 %v7133_v42  ;;  %v5827_v3 = vpop.eup %4019  ;;  %v2235_v11 = vsub.f32 %v1961_v17, %v5182_v57  ;;  %v881_v29 = vpop.f32.mrf.mxu1  ;;  %v1967_v59 = vsub.f32 %v768_v33, %v5813_v38  ;;  %v4465_v42 = vld [vmem:[%s4611_s28 + $0x40] sm:$0xff]  ;;  %v7139_v33 = vld [vmem:[#allocation11_spill] sm:$0xff] }
 0x153   : > { %v2131_v22 = vsub.f32 %v7135_v14, %v5182_v57  ;;  %4027 = vpow2.f32 %v2453_v25  ;;  %v7137_v36 = vsub.f32 %v7136_v41, %v5467_v45  ;;  %v2236_v8 = vsub.f32 %v1962_v48, %v5194_v4  ;;  %v7148_v45 = vld [vmem:[#allocation14_spill] sm:$0xff] }
 0x154   : > { %3795 = vmatmul.msk.f32.gmra.mxu0 %vm403_vm0, %v4465_v42  ;;  %v2902_v5 = vmul.f32 %v4018_v20, %v5271_v62  ;;  %v3131_v14 = vadd.f32 %v3099_v13, %v2901_v39  ;;  %4029 = vpow2.f32 %v2455_v2  ;;  %v4022_v30 = vpop.eup %4021  ;;  %v2677_v17 = vmul.f32 1.442695, %v2235_v11  ;;  %3827 = vmatmul.msk.f32.gmra.mxu1 %vm403_vm0, %v4465_v42  ;;  %v7142_v13 = vld [vmem:[#allocation13_spill] sm:$0xff]  ;;  %v7143_v11 = vld [vmem:[#allocation48_spill] sm:$0xff] }
 0x155   : > { %v2132_v37 = vsub.f32 %v7137_v36, %v5194_v4  ;;  %v1968_v40 = vsub.f32 %v881_v29, %v5813_v38  ;;  %3859 = vmatmul.msk.f32.gmra.mxu2 %vm403_vm0, %v4465_v42  ;;  %v5842_v25 = vadd.f32 %v3130_v52, %v2894_v32  ;;  %4031 = vpow2.f32 %v7139_v33  ;;  %3891 = vmatmul.msk.f32.gmra.mxu3 %vm403_vm0, %v4465_v42  ;;  %v5858_v42 = vpop.permute.xlu1 %1742 }
 0x156   : > { %4033 = vpow2.f32 %v2663_v35  ;;  %v2679_v48 = vmul.f32 1.442695, %v2236_v8  ;;  %v5846_v41 = vadd.f32 %v3131_v14, %v2902_v5  ;;  %v2469_v39 = vmul.f32 1.442695, %v2131_v22  ;;  %7146 = vst [vmem:[#allocation11_spill] sm:$0xff] %v5858_v42 }
 0x157   : > { %7138 = vst [vmem:[#allocation38_spill] sm:$0xff] %v5842_v25  ;;  %v4024_v2 = vpop.eup %4023  ;;  %v5848_v20 = vmul.f32 1.442695, %v2234_v47  ;;  %4035 = vpow2.f32 %v2677_v17  ;;  %v2241_v29 = vsub.f32 %v1967_v59, %v5173_v28  ;;  %v7144_v32 = vsub.f32 %v7142_v13, %v7143_v11  ;;  %v994_v8 = vpop.f32.mrf.mxu2  ;;  %v7147_v13 = vld [vmem:[#allocation12_spill] sm:$0xff] }
 0x158   : > { %7140 = vst [vmem:[#allocation39_spill] sm:$0xff] %v5846_v41  ;;  %v4026_v36 = vpop.eup %4025  ;;  %v5856_v35 = vmul.f32 %v4022_v30, %v5259_v49  ;;  %4037 = vpow2.f32 %v2679_v48  ;;  %v2907_v22 = vmul.f32 %v4024_v2, %v5235_v46  ;;  %v2471_v47 = vmul.f32 1.442695, %v2132_v37  ;;  %v1107_v17 = vpop.f32.mrf.mxu3 }
 0x159   : > { %7141 = vst [vmem:[#allocation9_spill] sm:$0xff] %v5848_v20  ;;  %v2139_v52 = vsub.f32 %v7144_v32, %v5182_v57  ;;  %v4028_v5 = vpop.eup %4027  ;;  %v2242_v14 = vsub.f32 %v1968_v40, %v5175_v55  ;;  %v1969_v59 = vsub.f32 %v994_v8, %v5813_v38  ;;  %v2908_v33 = vmul.f32 %v4026_v36, %v5237_v58  ;;  %v771_v32 = vpop.f32.mrf.mxu0 }
 0x15a   : > { %7145 = vst [vmem:[#allocation10_spill] sm:$0xff] %v5856_v35  ;;  %4039 = vpow2.f32 %v7147_v13  ;;  %v4030_v30 = vpop.eup %4029  ;;  %v1970_v48 = vsub.f32 %v1107_v17, %v5813_v38  ;;  %v7149_v37 = vsub.f32 %v7148_v45, %v7143_v11  ;;  %v884_v25 = vpop.f32.mrf.mxu1  ;;  %v1975_v36 = vsub.f32 %v771_v32, %v5858_v42  ;;  %v4466_v38 = vld [vmem:[%s4611_s28 + $0x48] sm:$0xff] }
 0x15b   : > { %4041 = vpow2.f32 %v2469_v39  ;;  %v2485_v41 = vmul.f32 1.442695, %v2139_v52  ;;  %v4032_v40 = vpop.eup %4031  ;;  %v2243_v8 = vsub.f32 %v1969_v59, %v5182_v57  ;;  %v2909_v13 = vmul.f32 %v4028_v5, %v5259_v49  ;;  %v7150_v5 = vld [vmem:[#allocation51_spill] sm:$0xff] }
 0x15c   : > { %v2140_v2 = vsub.f32 %v7149_v37, %v5194_v4  ;;  %v3100_v35 = vadd.f32 %v2908_v33, %v2907_v22  ;;  %v5873_v20 = vpop.eup %4033  ;;  %v2244_v17 = vsub.f32 %v1970_v48, %v5194_v4  ;;  %v1976_v39 = vsub.f32 %v884_v25, %v5858_v42  ;;  %3796 = vmatmul.msk.f32.gmra.mxu0 %vm403_vm0, %v4466_v38 }
 0x15d   : > { %v2910_v45 = vmul.f32 %v4030_v30, %v5271_v62  ;;  %4043 = vpow2.f32 %v2471_v47  ;;  %v4036_v52 = vpop.eup %4035  ;;  %v2693_v59 = vmul.f32 1.442695, %v2243_v8  ;;  %v2249_v37 = vsub.f32 %v1975_v36, %v5173_v28  ;;  %3828 = vmatmul.msk.f32.gmra.mxu1 %vm403_vm0, %v4466_v38  ;;  %3860 = vmatmul.msk.f32.gmra.mxu2 %vm403_vm0, %v4466_v38 }
 0x15e   : > { %v3132_v22 = vadd.f32 %v3100_v35, %v2909_v13  ;;  %4045 = vpow2.f32 %v7150_v5  ;;  %v5884_v33 = vpop.eup %4037  ;;  %v5886_v25 = vmul.f32 1.442695, %v2241_v29  ;;  %3892 = vmatmul.msk.f32.gmra.mxu3 %vm403_vm0, %v4466_v38  ;;  %v2915_v30 = vmul.f32 %v4032_v40, %v5235_v46  ;;  %v5901_v40 = vpop.permute.xlu0 %1747 }
 0x15f   : > { %7151 = vst [vmem:[#allocation13_spill] sm:$0xff] %v5884_v33  ;;  %4047 = vpow2.f32 %v5582_v18  ;;  %v2487_v47 = vmul.f32 1.442695, %v2140_v2  ;;  %v5892_v32 = vmul.f32 %v4036_v52, %v5259_v49  ;;  %v5894_v8 = vmul.f32 1.442695, %v2242_v14  ;;  %v997_v38 = vpop.f32.mrf.mxu2  ;;  %v7157_v14 = vld [vmem:[#allocation16_spill] sm:$0xff] }
 0x160   : > { %v4040_v48 = vpop.eup %4039  ;;  %4049 = vpow2.f32 %v2693_v59  ;;  %v5896_v35 = vadd.f32 %v3132_v22, %v2910_v45  ;;  %v2695_v13 = vmul.f32 1.442695, %v2244_v17  ;;  %v2250_v29 = vsub.f32 %v1976_v39, %v5175_v55  ;;  %7156 = vst [vmem:[#allocation68_spill] sm:$0xff] %v5901_v40  ;;  %v1110_v52 = vpop.f32.mrf.mxu3  ;;  %v7158_v59 = vld [vmem:[#allocation41_spill] sm:$0xff]  ;;  %v7162_v33 = vld [vmem:[#allocation43_spill] sm:$0xff] }
 0x161   : > { %7152 = vst [vmem:[#allocation12_spill] sm:$0xff] %v5892_v32  ;;  %v4042_v36 = vpop.eup %4041  ;;  %v5899_v5 = vmul.f32 1.442695, %v2249_v37  ;;  %v2916_v18 = vmul.f32 %v4040_v48, %v5237_v58  ;;  %v1977_v2 = vsub.f32 %v997_v38, %v5858_v42  ;;  %4051 = vpow2.f32 %v2485_v41  ;;  %v7160_v17 = vld [vmem:[#allocation17_spill] sm:$0xff] }
 0x162   : > { %7153 = vst [vmem:[#allocation14_spill] sm:$0xff] %v5894_v8  ;;  %v7159_v45 = vsub.f32 %v7157_v14, %v7158_v59  ;;  %v7161_v39 = vsub.f32 %v7160_v17, %v7158_v59  ;;  %v2917_v48 = vmul.f32 %v4042_v36, %v5259_v49  ;;  %4053 = vpow2.f32 %v2487_v47  ;;  %v887_v8 = vpop.f32.mrf.mxu1 }
 0x163   : > { %7154 = vst [vmem:[#allocation51_spill] sm:$0xff] %v5896_v35  ;;  %v4044_v11 = vpop.eup %4043  ;;  %v1978_v35 = vsub.f32 %v1110_v52, %v5858_v42  ;;  %v3101_v38 = vadd.f32 %v2916_v18, %v2915_v30  ;;  %v2251_v32 = vsub.f32 %v1977_v2, %v5182_v57  ;;  %4055 = vpow2.f32 %v7162_v33  ;;  %v4467_v42 = vld [vmem:[%s4611_s28 + $0x50] sm:$0xff]  ;;  %v7163_v33 = vld [vmem:[#allocation44_spill] sm:$0xff] }
 0x164   : > { %7155 = vst [vmem:[#allocation67_spill] sm:$0xff] %v5899_v5  ;;  %v2147_v22 = vsub.f32 %v7159_v45, %v5182_v57  ;;  %v2148_v37 = vsub.f32 %v7161_v39, %v5194_v4  ;;  %v774_v5 = vpop.f32.mrf.mxu0  ;;  %v4046_v41 = vpop.eup %4045  ;;  %v2918_v45 = vmul.f32 %v4044_v11, %v5271_v62  ;;  %v1984_v52 = vsub.f32 %v887_v8, %v5901_v40 }
 0x165   : > { %v1983_v14 = vsub.f32 %v774_v5, %v5901_v40  ;;  %v4048_v17 = vpop.eup %4047  ;;  %v2252_v39 = vsub.f32 %v1978_v35, %v5194_v4  ;;  %3797 = vmatmul.msk.f32.gmra.mxu0 %vm403_vm0, %v4467_v42  ;;  %v3133_v30 = vadd.f32 %v3101_v38, %v2917_v48  ;;  %v2923_v47 = vmul.f32 %v4046_v41, %v5235_v46  ;;  %v7166_v41 = vld [vmem:[#allocation21_spill] sm:$0xff] }
 0x166   : > { %v4050_v36 = vpop.eup %4049  ;;  %v2709_v18 = vmul.f32 1.442695, %v2251_v32  ;;  %3829 = vmatmul.msk.f32.gmra.mxu1 %vm403_vm0, %v4467_v42  ;;  %3861 = vmatmul.msk.f32.gmra.mxu2 %vm403_vm0, %v4467_v42  ;;  %v2924_v11 = vmul.f32 %v4048_v17, %v5237_v58  ;;  %4057 = vpow2.f32 %v7163_v33  ;;  %v2501_v5 = vmul.f32 1.442695, %v2147_v22 }
 0x167   : > { %4059 = vpow2.f32 %v2695_v13  ;;  %v5928_v35 = vmul.f32 1.442695, %v2250_v29  ;;  %3893 = vmatmul.msk.f32.gmra.mxu3 %vm403_vm0, %v4467_v42  ;;  %v5931_v8 = vadd.f32 %v3133_v30, %v2918_v45  ;;  %v2503_v2 = vmul.f32 1.442695, %v2148_v37  ;;  %v4052_v48 = vpop.eup %4051  ;;  %v1000_v22 = vpop.f32.mrf.mxu2 }
 0x168   : > { %4061 = vpow2.f32 %v2709_v18  ;;  %v2257_v32 = vsub.f32 %v1983_v14, %v5173_v28  ;;  %v3102_v38 = vadd.f32 %v2924_v11, %v2923_v47  ;;  %v7167_v17 = vsub.f32 %v7166_v41, %v5537_v21  ;;  %v4054_v33 = vpop.eup %4053  ;;  %v5942_v45 = vpop.permute.xlu2 %1752  ;;  %v7170_v11 = vld [vmem:[#allocation22_spill] sm:$0xff] }
 0x169   : > { %7164 = vst [vmem:[#allocation16_spill] sm:$0xff] %v5928_v35  ;;  %v5939_v13 = vmul.f32 %v4050_v36, %v5259_v49  ;;  %v2711_v29 = vmul.f32 1.442695, %v2252_v39  ;;  %v2258_v42 = vsub.f32 %v1984_v52, %v5175_v55  ;;  %v2925_v37 = vmul.f32 %v4052_v48, %v5259_v49  ;;  %v4056_v30 = vpop.eup %4055  ;;  %v1113_v47 = vpop.f32.mrf.mxu3 }
 0x16a   : > { %7165 = vst [vmem:[#allocation17_spill] sm:$0xff] %v5931_v8  ;;  %v2155_v59 = vsub.f32 %v7167_v17, %v5182_v57  ;;  %v1985_v14 = vsub.f32 %v1000_v22, %v5901_v40  ;;  %v2926_v18 = vmul.f32 %v4054_v33, %v5271_v62  ;;  %4063 = vpow2.f32 %v2501_v5 }
 0x16b   : > { %7168 = vst [vmem:[#allocation43_spill] sm:$0xff] %v5939_v13  ;;  %v7171_v36 = vsub.f32 %v7170_v11, %v5537_v21  ;;  %v1986_v52 = vsub.f32 %v1113_v47, %v5901_v40  ;;  %v3134_v17 = vadd.f32 %v3102_v38, %v2925_v37  ;;  %4065 = vpow2.f32 %v2503_v2  ;;  %v890_v13 = vpop.f32.mrf.mxu1 }
 0x16c   : > { %7169 = vst [vmem:[#allocation44_spill] sm:$0xff] %v5942_v45  ;;  %v777_v41 = vpop.f32.mrf.mxu0  ;;  %v2931_v48 = vmul.f32 %v4056_v30, %v5235_v46  ;;  %v4058_v8 = vpop.eup %4057  ;;  %v2259_v22 = vsub.f32 %v1985_v14, %v5182_v57  ;;  %4067 = vpow2.f32 %v5590_v24  ;;  %v2517_v5 = vmul.f32 1.442695, %v2155_v59 }
 0x16d   : > { %v2156_v39 = vsub.f32 %v7171_v36, %v5194_v4  ;;  %v1991_v33 = vsub.f32 %v777_v41, %v5942_v45  ;;  %v5956_v35 = vpop.eup %4059  ;;  %v2260_v11 = vsub.f32 %v1986_v52, %v5194_v4  ;;  %v1992_v47 = vsub.f32 %v890_v13, %v5942_v45  ;;  %v4468_v36 = vld [vmem:[%s4611_s28 + $0x58] sm:$0xff] }
 0x16e   : > { %3798 = vmatmul.msk.f32.gmra.mxu0 %vm403_vm0, %v4468_v36  ;;  %v5962_v2 = vadd.f32 %v3134_v17, %v2926_v18  ;;  %v2932_v38 = vmul.f32 %v4058_v8, %v5237_v58  ;;  %v4062_v37 = vpop.eup %4061  ;;  %v2725_v30 = vmul.f32 1.442695, %v2259_v22  ;;  %3830 = vmatmul.msk.f32.gmra.mxu1 %vm403_vm0, %v4468_v36  ;;  %4069 = vpow2.f32 %v5597_v60 }
 0x16f   : > { %v2265_v14 = vsub.f32 %v1991_v33, %v5173_v28  ;;  %3862 = vmatmul.msk.f32.gmra.mxu2 %vm403_vm0, %v4468_v36  ;;  %v7173_v24 = vsub.f32 %v7092_v10, %v5558_v51  ;;  %4071 = vpow2.f32 %v2711_v29  ;;  %v5973_v13 = vmul.f32 1.442695, %v2257_v32  ;;  %3894 = vmatmul.msk.f32.gmra.mxu3 %vm403_vm0, %v4468_v36  ;;  %v1003_v29 = vpop.f32.mrf.mxu2  ;;  %v5984_v32 = vpop.permute.xlu1 %1757 }
 0x170   : > { %7172 = vst [vmem:[#allocation21_spill] sm:$0xff] %v5962_v2  ;;  %v3103_v8 = vadd.f32 %v2932_v38, %v2931_v48  ;;  %v2519_v18 = vmul.f32 1.442695, %v2156_v39  ;;  %v4064_v52 = vpop.eup %4063  ;;  %v5977_v41 = vmul.f32 %v4062_v37, %v5259_v49  ;;  %v5979_v17 = vmul.f32 1.442695, %v2258_v42  ;;  %v7176_v39 = vld [vmem:[#allocation28_spill] sm:$0xff] }
 0x171   : > { %v2163_v59 = vsub.f32 %v7173_v24, %v5182_v57  ;;  %4073 = vpow2.f32 %v2725_v30  ;;  %v2727_v60 = vmul.f32 1.442695, %v2260_v11  ;;  %v4066_v22 = vpop.eup %4065  ;;  %v2266_v33 = vsub.f32 %v1992_v47, %v5175_v55  ;;  %7175 = vst [vmem:[#allocation69_spill] sm:$0xff] %v5984_v32  ;;  %v1116_v30 = vpop.f32.mrf.mxu3  ;;  %v7178_v47 = vld [vmem:[#allocation33_spill] sm:$0xff] }
 0x172   : > { %v5982_v10 = vmul.f32 1.442695, %v2265_v14  ;;  %v2933_v36 = vmul.f32 %v4064_v52, %v5259_v49  ;;  %v7177_v48 = vsub.f32 %v7176_v39, %v5558_v51  ;;  %v4068_v37 = vpop.eup %4067  ;;  %v1993_v42 = vsub.f32 %v1003_v29, %v5942_v45  ;;  %v7179_v14 = vld [vmem:[#allocation8_spill] sm:$0xff] }
 0x173   : > { %4075 = vpow2.f32 %v2517_v5  ;;  %v2533_v11 = vmul.f32 1.442695, %v2163_v59  ;;  %v7180_v24 = vsub.f32 %v7178_v47, %v7179_v14  ;;  %v1994_v21 = vsub.f32 %v1116_v30, %v5942_v45  ;;  %v893_v29 = vpop.f32.mrf.mxu1  ;;  %v4469_v45 = vld [vmem:[%s4611_s28 + $0x60] sm:$0xff] }
 0x174   : > { %7174 = vst [vmem:[#allocation22_spill] sm:$0xff] %v5982_v10  ;;  %v2164_v38 = vsub.f32 %v7177_v48, %v5194_v4  ;;  %v780_v52 = vpop.f32.mrf.mxu0  ;;  %v2934_v2 = vmul.f32 %v4066_v22, %v5271_v62  ;;  %v3135_v10 = vadd.f32 %v3103_v8, %v2933_v36  ;;  %4077 = vpow2.f32 %v2519_v18  ;;  %v4070_v39 = vpop.eup %4069 }
 0x175   : > { %v2171_v40 = vsub.f32 %v7180_v24, %v5182_v57  ;;  %v2267_v48 = vsub.f32 %v1993_v42, %v5182_v57  ;;  %v1999_v5 = vsub.f32 %v780_v52, %v5984_v32  ;;  %v2939_v59 = vmul.f32 %v4068_v37, %v5235_v46  ;;  %v6002_v47 = vpop.eup %4071 }
 0x176   : > { %4079 = vpow2.f32 %v5604_v31  ;;  %v2268_v24 = vsub.f32 %v1994_v21, %v5194_v4  ;;  %v2000_v30 = vsub.f32 %v893_v29, %v5984_v32  ;;  %3799 = vmatmul.msk.f32.gmra.mxu0 %vm403_vm0, %v4469_v45  ;;  %v6008_v8 = vadd.f32 %v3135_v10, %v2934_v2  ;;  %3831 = vmatmul.msk.f32.gmra.mxu1 %vm403_vm0, %v4469_v45  ;;  %v7182_v21 = vld [vmem:[#allocation34_spill] sm:$0xff] }
 0x177   : > { %v2940_v18 = vmul.f32 %v4070_v39, %v5237_v58  ;;  %v4074_v22 = vpop.eup %4073  ;;  %v2741_v36 = vmul.f32 1.442695, %v2267_v48  ;;  %v2273_v42 = vsub.f32 %v1999_v5, %v5173_v28  ;;  %3863 = vmatmul.msk.f32.gmra.mxu2 %vm403_vm0, %v4469_v45  ;;  %4081 = vpow2.f32 %v5615_v9  ;;  %3895 = vmatmul.msk.f32.gmra.mxu3 %vm403_vm0, %v4469_v45  ;;  %v4470_v45 = vld [vmem:[%s6931_s3] sm:$0xff] }
 0x178   : > { %7181 = vst [vmem:[#allocation28_spill] sm:$0xff] %v6008_v8  ;;  %v7183_v31 = vsub.f32 %v7182_v21, %v7179_v14  ;;  %4083 = vpow2.f32 %v2727_v60  ;;  %v6019_v2 = vmul.f32 1.442695, %v2266_v33  ;;  %v2743_v10 = vmul.f32 1.442695, %v2268_v24  ;;  %v6028_v60 = vpop.permute.xlu0 %1762 }
 0x179   : > { %v2535_v52 = vmul.f32 1.442695, %v2164_v38  ;;  %v4076_v39 = vpop.eup %4075  ;;  %v6023_v48 = vmul.f32 %v4074_v22, %v5259_v49  ;;  %4085 = vpow2.f32 %v2741_v36  ;;  %v3104_v29 = vadd.f32 %v2940_v18, %v2939_v59  ;;  %7184 = vst [vmem:[#allocation33_spill] sm:$0xff] %v6028_v60  ;;  %v1119_v59 = vpop.f32.mrf.mxu3 }
 0x17a   : > { %v2172_v37 = vsub.f32 %v7183_v31, %v5194_v4  ;;  %v6025_v5 = vmul.f32 1.442695, %v2171_v40  ;;  %v4078_v9 = vpop.eup %4077  ;;  %4087 = vpow2.f32 %v2743_v10  ;;  %v2274_v21 = vsub.f32 %v2000_v30, %v5175_v55  ;;  %v1006_v31 = vpop.f32.mrf.mxu2 }
 0x17b   : > { %v6033_v33 = vperm.slane %v4470_v45, 4  ;;  %v2941_v38 = vmul.f32 %v4076_v39, %v5259_v49  ;;  %v6036_v22 = vmul.f32 1.442695, %v2273_v42  ;;  %v2001_v40 = vsub.f32 %v1006_v31, %v5984_v32  ;;  %v896_v39 = vpop.f32.mrf.mxu1  ;;  %v7186_v31 = vld [vmem:[#allocation49_spill] sm:$0xff] }
 0x17c   : > { %v4080_v24 = vpop.eup %4079  ;;  %4089 = vpow2.f32 %v2533_v11  ;;  %v2551_v18 = vmul.f32 1.442695, %v2172_v37  ;;  %v2002_v30 = vsub.f32 %v1119_v59, %v5984_v32  ;;  %v783_v36 = vpop.f32.mrf.mxu0  ;;  %v2942_v10 = vmul.f32 %v4078_v9, %v5271_v62 }
 0x17d   : > { %7185 = vst [vmem:[#allocation34_spill] sm:$0xff] %v6036_v22  ;;  %v3136_v14 = vadd.f32 %v3104_v29, %v2941_v38  ;;  %4091 = vpow2.f32 %v2535_v52  ;;  %v4082_v51 = vpop.eup %4081  ;;  %v2275_v8 = vsub.f32 %v2001_v40, %v5182_v57  ;;  %v2007_v42 = vsub.f32 %v783_v36, %v6028_v60  ;;  %v4471_v29 = vld [vmem:[%s4611_s28 + $0x68] sm:$0xff] }
 0x17e   : > { %v2947_v22 = vmul.f32 %v4080_v24, %v5235_v46  ;;  %4093 = vpow2.f32 %v7186_v31  ;;  %v6045_v11 = vpop.eup %4083  ;;  %v6047_v37 = vmul.f32 1.442695, %v2274_v21  ;;  %v2276_v59 = vsub.f32 %v2002_v30, %v5194_v4  ;;  %3800 = vmatmul.msk.f32.gmra.mxu0 %vm403_vm0, %v4471_v29  ;;  %3832 = vmatmul.msk.f32.gmra.mxu1 %vm403_vm0, %v4471_v29  ;;  %v7189_v24 = vld [vmem:[#allocation50_spill] sm:$0xff] }
 0x17f   : > { %v2008_v9 = vsub.f32 %v896_v39, %v6028_v60  ;;  %v6053_v52 = vadd.f32 %v3136_v14, %v2942_v10  ;;  %v4086_v38 = vpop.eup %4085  ;;  %v2757_v40 = vmul.f32 1.442695, %v2275_v8  ;;  %v2281_v36 = vsub.f32 %v2007_v42, %v5173_v28  ;;  %3864 = vmatmul.msk.f32.gmra.mxu2 %vm403_vm0, %v4471_v29  ;;  %3896 = vmatmul.msk.f32.gmra.mxu3 %vm403_vm0, %v4471_v29 }
 0x180   : > { %7187 = vst [vmem:[#allocation49_spill] sm:$0xff] %v6047_v37  ;;  %v2948_v21 = vmul.f32 %v4082_v51, %v5237_v58  ;;  %4095 = vpow2.f32 %v7189_v24  ;;  %v6060_v30 = vpop.eup %4087  ;;  %v2759_v39 = vmul.f32 1.442695, %v2276_v59  ;;  %v6063_v31 = vperm.slane %v4470_v45, 5 }
 0x181   : > { %7188 = vst [vmem:[#allocation70_spill] sm:$0xff] %v6053_v52  ;;  %v7191_v14 = vsub.f32 %v5407_v44, %v5606_v34  ;;  %v7192_v10 = vsub.f32 %v5414_v54, %v5606_v34  ;;  %v6074_v24 = vmul.f32 %v4086_v38, %v5259_v49  ;;  %4097 = vpow2.f32 %v2757_v40  ;;  %v6079_v44 = vpop.permute.xlu2 %1767  ;;  %v1122_v40 = vpop.f32.mrf.mxu3 }
 0x182   : > { %7190 = vst [vmem:[#allocation50_spill] sm:$0xff] %v6060_v30  ;;  %v4090_v51 = vpop.eup %4089  ;;  %v6076_v59 = vperm.slane %v4470_v45, 6  ;;  %v3105_v29 = vadd.f32 %v2948_v21, %v2947_v22  ;;  %4099 = vpow2.f32 %v2759_v39  ;;  %v2282_v52 = vsub.f32 %v2008_v9, %v5175_v55  ;;  %v1009_v37 = vpop.f32.mrf.mxu2  ;;  %v4472_v30 = vld [vmem:[%s4611_s28 + $0x70] sm:$0xff] }
 0x183   : > { %v2179_v8 = vsub.f32 %v7191_v14, %v5182_v57  ;;  %v2180_v42 = vsub.f32 %v7192_v10, %v5194_v4  ;;  %7193 = vst [vmem:[#allocation71_spill] sm:$0xff] %v6074_v24  ;;  %v4092_v32 = vpop.eup %4091  ;;  %v6081_v14 = vperm.slane %v4470_v45, 7  ;;  %v2949_v54 = vmul.f32 %v4090_v51, %v5259_v49 }
 0x184   : > { %7194 = vst [vmem:[#allocation72_spill] sm:$0xff] %v6079_v44  ;;  %v4094_v10 = vpop.eup %4093  ;;  %v6084_v34 = vmul.f32 1.442695, %v2281_v36  ;;  %v2009_v38 = vsub.f32 %v1009_v37, %v6028_v60  ;;  %v2950_v22 = vmul.f32 %v4092_v32, %v5271_v62  ;;  %4101 = vpow2.f32 %v6025_v5  ;;  %v786_v21 = vpop.f32.mrf.mxu0 }
 0x185   : > { %v2010_v9 = vsub.f32 %v1122_v40, %v6028_v60  ;;  %v3137_v39 = vadd.f32 %v3105_v29, %v2949_v54  ;;  %4103 = vpow2.f32 %v2551_v18  ;;  %v2955_v45 = vmul.f32 %v4094_v10, %v5235_v46  ;;  %v899_v36 = vpop.f32.mrf.mxu1 }
 0x186   : > { %7195 = vst [vmem:[#allocation73_spill] sm:$0xff] %v6084_v34  ;;  %v4096_v24 = vpop.eup %4095  ;;  %v2283_v51 = vsub.f32 %v2009_v38, %v5182_v57  ;;  %v2015_v34 = vsub.f32 %v786_v21, %v6079_v44  ;;  %4105 = vpow2.f32 %v5665_v43  ;;  %v2565_v37 = vmul.f32 1.442695, %v2179_v8  ;;  %3801 = vmatmul.msk.f32.gmra.mxu0 %vm403_vm0, %v4472_v30  ;;  %3833 = vmatmul.msk.f32.gmra.mxu1 %vm403_vm0, %v4472_v30 }
 0x187   : > { %v2284_v32 = vsub.f32 %v2010_v9, %v5194_v4  ;;  %v2016_v5 = vsub.f32 %v899_v36, %v6079_v44  ;;  %v6098_v29 = vadd.f32 %v3137_v39, %v2950_v22  ;;  %v2956_v18 = vmul.f32 %v4096_v24, %v5237_v58  ;;  %v4098_v54 = vpop.eup %4097  ;;  %3865 = vmatmul.msk.f32.gmra.mxu2 %vm403_vm0, %v4472_v30  ;;  %v6127_v36 = vpop.permute.xlu1 %1772 }
 0x188   : > { %v6101_v10 = vmul.f32 1.442695, %v2282_v52  ;;  %v2773_v38 = vmul.f32 1.442695, %v2283_v51  ;;  %v2289_v40 = vsub.f32 %v2015_v34, %v5173_v28  ;;  %4107 = vpow2.f32 %v5670_v63  ;;  %v6107_v43 = vpop.eup %4099  ;;  %3897 = vmatmul.msk.f32.gmra.mxu3 %vm403_vm0, %v4472_v30  ;;  %v4473_v63 = vld [vmem:[%s6932_s4] sm:$0xff]  ;;  %7201 = vst [vmem:[#allocation78_spill] sm:$0xff] %v6127_v36 }
 0x189   : > { %7196 = vst [vmem:[#allocation74_spill] sm:$0xff] %v6098_v29  ;;  %v2775_v8 = vmul.f32 1.442695, %v2284_v32  ;;  %v3106_v22 = vadd.f32 %v2956_v18, %v2955_v45  ;;  %v2567_v9 = vmul.f32 1.442695, %v2180_v42  ;;  %v7198_v52 = vsub.f32 %v5469_v27, %v5626_v23 }
 0x18a   : > { %7197 = vst [vmem:[#allocation75_spill] sm:$0xff] %v6101_v10  ;;  %v4102_v21 = vpop.eup %4101  ;;  %v6115_v34 = vmul.f32 %v4098_v54, %v5259_v49  ;;  %4109 = vpow2.f32 %v2773_v38  ;;  %v6120_v39 = vperm.slane %v4473_v63, 4  ;;  %v6122_v51 = vperm.slane %v4473_v63, 5  ;;  %v1012_v27 = vpop.f32.mrf.mxu2 }
 0x18b   : > { %v2187_v24 = vsub.f32 %v7198_v52, %v5182_v57  ;;  %v4104_v30 = vpop.eup %4103  ;;  %4111 = vpow2.f32 %v2775_v8  ;;  %v2290_v42 = vsub.f32 %v2016_v5, %v5175_v55  ;;  %v6125_v45 = vmul.f32 1.442695, %v2289_v40  ;;  %v1125_v38 = vpop.f32.mrf.mxu3 }
 0x18c   : > { %7199 = vst [vmem:[#allocation76_spill] sm:$0xff] %v6115_v34  ;;  %v2957_v32 = vmul.f32 %v4102_v21, %v5259_v49  ;;  %v4106_v18 = vpop.eup %4105  ;;  %v2017_v54 = vsub.f32 %v1012_v27, %v6079_v44  ;;  %v2958_v52 = vmul.f32 %v4104_v30, %v5271_v62  ;;  %4113 = vpow2.f32 %v2565_v37  ;;  %v789_v60 = vpop.f32.mrf.mxu0 }
 0x18d   : > { %7200 = vst [vmem:[#allocation77_spill] sm:$0xff] %v6125_v45  ;;  %v7202_v8 = vsub.f32 %v5479_v16, %v5626_v23  ;;  %v2018_v40 = vsub.f32 %v1125_v38, %v6079_v44  ;;  %4115 = vpow2.f32 %v2567_v9  ;;  %v2963_v21 = vmul.f32 %v4106_v18, %v5235_v46  ;;  %v902_v34 = vpop.f32.mrf.mxu1  ;;  %v7209_v23 = vld [vmem:[#allocation15_spill] sm:$0xff] }
 0x18e   : > { %v3138_v29 = vadd.f32 %v3106_v22, %v2957_v32  ;;  %v4108_v45 = vpop.eup %4107  ;;  %v2291_v27 = vsub.f32 %v2017_v54, %v5182_v57  ;;  %v2023_v30 = vsub.f32 %v789_v60, %v6127_v36  ;;  %4117 = vpow2.f32 %v5672_v15 }
 0x18f   : > { %v2188_v5 = vsub.f32 %v7202_v8, %v5194_v4  ;;  %v2581_v37 = vmul.f32 1.442695, %v2187_v24  ;;  %v2292_v10 = vsub.f32 %v2018_v40, %v5194_v4  ;;  %v2024_v16 = vsub.f32 %v902_v34, %v6127_v36  ;;  %v4474_v8 = vld [vmem:[%s4611_s28 + $0x78] sm:$0xff] }
 0x190   : > { %3802 = vmatmul.msk.f32.gmra.mxu0 %vm403_vm0, %v4474_v8  ;;  %v6145_v22 = vadd.f32 %v3138_v29, %v2958_v52  ;;  %v2964_v9 = vmul.f32 %v4108_v45, %v5237_v58  ;;  %v4110_v32 = vpop.eup %4109  ;;  %v6148_v18 = vmul.f32 1.442695, %v2290_v42  ;;  %v2789_v54 = vmul.f32 1.442695, %v2291_v27  ;;  %3834 = vmatmul.msk.f32.gmra.mxu1 %vm403_vm0, %v4474_v8  ;;  %v7204_v45 = vld [vmem:[#allocation53_spill] sm:$0xff]  ;;  %v7205_v42 = vld [vmem:[#allocation20_spill] sm:$0xff] }
 0x191   : > { %v2297_v60 = vsub.f32 %v2023_v30, %v5173_v28  ;;  %3866 = vmatmul.msk.f32.gmra.mxu2 %vm403_vm0, %v4474_v8  ;;  %4119 = vpow2.f32 %v5674_v50  ;;  %v6154_v15 = vpop.eup %4111  ;;  %v2791_v24 = vmul.f32 1.442695, %v2292_v10  ;;  %3898 = vmatmul.msk.f32.gmra.mxu3 %vm403_vm0, %v4474_v8  ;;  %v2583_v34 = vmul.f32 1.442695, %v2188_v5 }
 0x192   : > { %7203 = vst [vmem:[#allocation79_spill] sm:$0xff] %v6145_v22  ;;  %v3107_v29 = vadd.f32 %v2964_v9, %v2963_v21  ;;  %v7206_v38 = vsub.f32 %v7204_v45, %v7205_v42  ;;  %v4114_v40 = vpop.eup %4113  ;;  %v6162_v28 = vmul.f32 %v4110_v32, %v5259_v49  ;;  %4121 = vpow2.f32 %v2789_v54  ;;  %v1015_v5 = vpop.f32.mrf.mxu2 }
 0x193   : > { %v6164_v27 = vperm.slane %v4473_v63, 6  ;;  %v6166_v50 = vperm.slane %v4473_v63, 7  ;;  %v4116_v30 = vpop.eup %4115  ;;  %4123 = vpow2.f32 %v2791_v24  ;;  %v2298_v10 = vsub.f32 %v2024_v16, %v5175_v55  ;;  %v7207_v63 = vld [vmem:[#allocation19_spill] sm:$0xff] }
 0x194   : > { %v2195_v52 = vsub.f32 %v7206_v38, %v5182_v57  ;;  %v6169_v21 = vmul.f32 1.442695, %v2297_v60  ;;  %v2965_v8 = vmul.f32 %v4114_v40, %v5259_v49  ;;  %v4118_v9 = vpop.eup %4117  ;;  %v2025_v45 = vsub.f32 %v1015_v5, %v6127_v36  ;;  %v1128_v38 = vpop.f32.mrf.mxu3 }
 0x195   : > { %v2966_v32 = vmul.f32 %v4116_v30, %v5271_v62  ;;  %4125 = vpow2.f32 %v2581_v37  ;;  %v7208_v54 = vsub.f32 %v7207_v63, %v7205_v42  ;;  %v2026_v55 = vsub.f32 %v1128_v38, %v6127_v36  ;;  %v1148_v16 = vpop.f32.mrf.mxu0  ;;  %v1261_v30 = vpop.f32.mrf.mxu1 }
 0x196   : > { %v3139_v60 = vadd.f32 %v3107_v29, %v2965_v8  ;;  %4127 = vpow2.f32 %v2583_v34  ;;  %v2971_v40 = vmul.f32 %v4118_v9, %v5235_v46  ;;  %v2299_v5 = vsub.f32 %v2025_v45, %v5182_v57  ;;  %v4475_v34 = vld [vmem:[%s4611_s28 + $0x80] sm:$0xff] }
 0x197   : > { %v2196_v24 = vsub.f32 %v7208_v54, %v5194_v4  ;;  %v4120_v44 = vpop.eup %4119  ;;  %v1779_v22 = vsub.f32 %v1148_v16, %v7209_v23  ;;  %4129 = vpow2.f32 %v5599_v61  ;;  %v7210_v37 = vsub.f32 %v5608_v53, %v5676_v0 }
 0x198   : > { %v2300_v38 = vsub.f32 %v2026_v55, %v5194_v4  ;;  %v1780_v29 = vsub.f32 %v1261_v30, %v7209_v23  ;;  %3803 = vmatmul.msk.f32.gmra.mxu0 %vm403_vm0, %v4475_v34  ;;  %v6191_v8 = vadd.f32 %v3139_v60, %v2966_v32  ;;  %v2972_v9 = vmul.f32 %v4120_v44, %v5237_v58  ;;  %v4122_v45 = vpop.eup %4121 }
 0x199   : > { %v2203_v63 = vsub.f32 %v7210_v37, %v5182_v57  ;;  %v2805_v54 = vmul.f32 1.442695, %v2299_v5  ;;  %v2053_v61 = vsub.f32 %v1779_v22, %v6033_v33  ;;  %3835 = vmatmul.msk.f32.gmra.mxu1 %vm403_vm0, %v4475_v34  ;;  %3867 = vmatmul.msk.f32.gmra.mxu2 %vm403_vm0, %v4475_v34  ;;  %4131 = vpow2.f32 %v5601_v7  ;;  %v6198_v55 = vpop.eup %4123  ;;  %v7212_v37 = vld [vmem:[#allocation25_spill] sm:$0xff] }
 0x19a   : > { %7211 = vst [vmem:[#allocation53_spill] sm:$0xff] %v6191_v8  ;;  %v2597_v53 = vmul.f32 1.442695, %v2195_v52  ;;  %v6200_v16 = vmul.f32 1.442695, %v2298_v10  ;;  %v2054_v32 = vsub.f32 %v1780_v29, %v6063_v31  ;;  %3899 = vmatmul.msk.f32.gmra.mxu3 %vm403_vm0, %v4475_v34  ;;  %v3108_v44 = vadd.f32 %v2972_v9, %v2971_v40  ;;  %v1374_v10 = vpop.f32.mrf.mxu2 }
 0x19b   : > { %v2807_v30 = vmul.f32 1.442695, %v2300_v38  ;;  %v4126_v60 = vpop.eup %4125  ;;  %4133 = vpow2.f32 %v2805_v54  ;;  %v2313_v22 = vmul.f32 1.442695, %v2053_v61  ;;  %v2599_v5 = vmul.f32 1.442695, %v2196_v24 }
 0x19c   : > { %v7213_v36 = vsub.f32 %v7212_v37, %v5676_v0  ;;  %v4128_v52 = vpop.eup %4127  ;;  %v2315_v42 = vmul.f32 1.442695, %v2054_v32  ;;  %v2973_v38 = vmul.f32 %v4126_v60, %v5259_v49  ;;  %v6209_v8 = vmul.f32 1.442695, %v2203_v63  ;;  %v1487_v34 = vpop.f32.mrf.mxu3  ;;  %v7214_v24 = vld [vmem:[#allocation58_spill] sm:$0xff] }
 0x19d   : > { %4135 = vpow2.f32 %v2807_v30  ;;  %v4130_v29 = vpop.eup %4129  ;;  %v1781_v40 = vsub.f32 %v1374_v10, %v7209_v23  ;;  %v7215_v9 = vsub.f32 %v7214_v24, %v5697_v1  ;;  %v1782_v63 = vsub.f32 %v1487_v34, %v7209_v23  ;;  %v1151_v30 = vpop.f32.mrf.mxu0  ;;  %v7217_v10 = vld [vmem:[#allocation36_spill] sm:$0xff] }
 0x19e   : > { %v2204_v7 = vsub.f32 %v7213_v36, %v5194_v4  ;;  %4137 = vpow2.f32 %v2313_v22  ;;  %v7216_v36 = vsub.f32 %v5685_v12, %v5697_v1  ;;  %v2974_v32 = vmul.f32 %v4128_v52, %v5271_v62  ;;  %v1264_v24 = vpop.f32.mrf.mxu1  ;;  %v4476_v12 = vld [vmem:[%s4611_s28 + $0x88] sm:$0xff]  ;;  %v7222_v1 = vld [vmem:[#allocation37_spill] sm:$0xff] }
 0x19f   : > { %v2211_v54 = vsub.f32 %v7215_v9, %v5182_v57  ;;  %4139 = vpow2.f32 %v2315_v42  ;;  %v3140_v60 = vadd.f32 %v3108_v44, %v2973_v38  ;;  %v4132_v22 = vpop.eup %4131  ;;  %v2055_v37 = vsub.f32 %v1781_v40, %v6076_v59 }
 0x1a0   : > { %v2212_v61 = vsub.f32 %v7216_v36, %v5194_v4  ;;  %v1787_v0 = vsub.f32 %v1151_v30, %v7217_v10  ;;  %4141 = vpow2.f32 %v2597_v53  ;;  %v2979_v57 = vmul.f32 %v4130_v29, %v5235_v46  ;;  %3804 = vmatmul.msk.f32.gmra.mxu0 %vm403_vm0, %v4476_v12 }
 0x1a1   : > { %v2056_v9 = vsub.f32 %v1782_v63, %v6081_v14  ;;  %v1788_v4 = vsub.f32 %v1264_v24, %v7217_v10  ;;  %v6229_v23 = vadd.f32 %v3140_v60, %v2974_v32  ;;  %4143 = vpow2.f32 %v2599_v5  ;;  %v6231_v42 = vpop.eup %4133  ;;  %3836 = vmatmul.msk.f32.gmra.mxu1 %vm403_vm0, %v4476_v12  ;;  %3868 = vmatmul.msk.f32.gmra.mxu2 %vm403_vm0, %v4476_v12 }
 0x1a2   : > { %v2317_v44 = vmul.f32 1.442695, %v2055_v37  ;;  %v2061_v52 = vsub.f32 %v1787_v0, %v6033_v33  ;;  %v2980_v53 = vmul.f32 %v4132_v22, %v5237_v58  ;;  %4145 = vpow2.f32 %v5722_v26  ;;  %3900 = vmatmul.msk.f32.gmra.mxu3 %vm403_vm0, %v4476_v12  ;;  %v1377_v32 = vpop.f32.mrf.mxu2  ;;  %v7218_v12 = vld [vmem:[#allocation30_spill] sm:$0xff] }
 0x1a3   : > { %v6238_v38 = vpop.eup %4135  ;;  %v6241_v29 = vmul.f32 %v4122_v45, %v5259_v49  ;;  %v2319_v40 = vmul.f32 1.442695, %v2056_v9  ;;  %v2062_v5 = vsub.f32 %v1788_v4, %v6063_v31  ;;  %4147 = vpow2.f32 %v5729_v19 }
 0x1a4   : > { %v4138_v0 = vpop.eup %4137  ;;  %4149 = vpow2.f32 %v2317_v44  ;;  %v2329_v34 = vmul.f32 1.442695, %v2061_v52  ;;  %v3109_v36 = vadd.f32 %v2980_v53, %v2979_v57  ;;  %v2615_v63 = vmul.f32 1.442695, %v2204_v7  ;;  %v1490_v24 = vpop.f32.mrf.mxu3 }
 0x1a5   : > { %v4140_v30 = vpop.eup %4139  ;;  %4151 = vpow2.f32 %v2319_v40  ;;  %v2331_v26 = vmul.f32 1.442695, %v2062_v5  ;;  %v2839_v60 = vmul.f32 %v4138_v0, %v6120_v39  ;;  %v6247_v45 = vmul.f32 1.442695, %v2211_v54  ;;  %v1154_v4 = vpop.f32.mrf.mxu0  ;;  %v7219_v40 = vld [vmem:[#allocation26_spill] sm:$0xff] }
 0x1a6   : > { %v4142_v22 = vpop.eup %4141  ;;  %4153 = vpow2.f32 %v2329_v34  ;;  %v1789_v37 = vsub.f32 %v1377_v32, %v7217_v10  ;;  %v2840_v19 = vmul.f32 %v4140_v30, %v6122_v51  ;;  %v6251_v9 = vmul.f32 1.442695, %v2212_v61  ;;  %v1267_v0 = vpop.f32.mrf.mxu1 }
 0x1a7   : > { %v4144_v57 = vpop.eup %4143  ;;  %4155 = vpow2.f32 %v2331_v26  ;;  %v1790_v7 = vsub.f32 %v1490_v24, %v7217_v10  ;;  %v3187_v44 = vadd.f32 %v7218_v12, %v2839_v60  ;;  %v2981_v54 = vmul.f32 %v4142_v22, %v5259_v49  ;;  %v4477_v26 = vld [vmem:[%s4611_s28 + $0x90] sm:$0xff] }
 0x1a8   : > { %v4146_v52 = vpop.eup %4145  ;;  %v2063_v53 = vsub.f32 %v1789_v37, %v6076_v59  ;;  %v1795_v5 = vsub.f32 %v1154_v4, %v7219_v40  ;;  %v2982_v34 = vmul.f32 %v4144_v57, %v5271_v62  ;;  %4157 = vpow2.f32 %v6209_v8  ;;  %3805 = vmatmul.msk.f32.gmra.mxu0 %vm403_vm0, %v4477_v26 }
 0x1a9   : > { %v4148_v61 = vpop.eup %4147  ;;  %v2064_v30 = vsub.f32 %v1790_v7, %v6081_v14  ;;  %v1796_v10 = vsub.f32 %v1267_v0, %v7219_v40  ;;  %v3219_v32 = vadd.f32 %v3187_v44, %v2840_v19  ;;  %v3141_v60 = vadd.f32 %v3109_v36, %v2981_v54  ;;  %3837 = vmatmul.msk.f32.gmra.mxu1 %vm403_vm0, %v4477_v26 }
 0x1aa   : > { %v4150_v22 = vpop.eup %4149  ;;  %v2333_v24 = vmul.f32 1.442695, %v2063_v53  ;;  %v2069_v37 = vsub.f32 %v1795_v5, %v6033_v33  ;;  %3869 = vmatmul.msk.f32.gmra.mxu2 %vm403_vm0, %v4477_v26  ;;  %4159 = vpow2.f32 %v2615_v63  ;;  %v2987_v8 = vmul.f32 %v4146_v52, %v5235_v46  ;;  %3901 = vmatmul.msk.f32.gmra.mxu3 %vm403_vm0, %v4477_v26  ;;  %v1380_v5 = vpop.f32.mrf.mxu2 }
 0x1ab   : > { %v4152_v57 = vpop.eup %4151  ;;  %v2335_v7 = vmul.f32 1.442695, %v2064_v30  ;;  %v2070_v4 = vsub.f32 %v1796_v10, %v6063_v31  ;;  %v2841_v19 = vmul.f32 %v4150_v22, %v6164_v27  ;;  %v6271_v36 = vadd.f32 %v3141_v60, %v2982_v34 }
 0x1ac   : > { %v4154_v12 = vpop.eup %4153  ;;  %4161 = vpow2.f32 %v2333_v24  ;;  %v2345_v44 = vmul.f32 1.442695, %v2069_v37  ;;  %v2842_v54 = vmul.f32 %v4152_v57, %v6166_v50  ;;  %v2988_v53 = vmul.f32 %v4148_v61, %v5237_v58  ;;  %v1493_v34 = vpop.f32.mrf.mxu3  ;;  %v7220_v57 = vld [vmem:[#allocation56_spill] sm:$0xff] }
 0x1ad   : > { %v4156_v63 = vpop.eup %4155  ;;  %4163 = vpow2.f32 %v2335_v7  ;;  %v2347_v52 = vmul.f32 1.442695, %v2070_v4  ;;  %v3251_v0 = vadd.f32 %v3219_v32, %v2841_v19  ;;  %v2847_v30 = vmul.f32 %v4154_v12, %v6120_v39  ;;  %v1157_v61 = vpop.f32.mrf.mxu0  ;;  %v7221_v19 = vld [vmem:[#allocation18_spill] sm:$0xff] }
 0x1ae   : > { %v4158_v10 = vpop.eup %4157  ;;  %4165 = vpow2.f32 %v2345_v44  ;;  %v1797_v26 = vsub.f32 %v1380_v5, %v7219_v40  ;;  %v2848_v60 = vmul.f32 %v4156_v63, %v6122_v51  ;;  %v3110_v22 = vadd.f32 %v2988_v53, %v2987_v8  ;;  %v1270_v44 = vpop.f32.mrf.mxu1 }
 0x1af   : > { %4167 = vpow2.f32 %v2347_v52  ;;  %v1798_v24 = vsub.f32 %v1493_v34, %v7219_v40  ;;  %v3283_v37 = vadd.f32 %v3251_v0, %v2842_v54  ;;  %v3188_v7 = vadd.f32 %v7220_v57, %v2847_v30  ;;  %v4478_v40 = vld [vmem:[%s4611_s28 + $0x98] sm:$0xff] }
 0x1b0   : > { %v4160_v4 = vpop.eup %4159  ;;  %v2071_v32 = vsub.f32 %v1797_v26, %v6076_v59  ;;  %v1803_v12 = vsub.f32 %v1157_v61, %v7221_v19  ;;  %v2989_v5 = vmul.f32 %v4158_v10, %v5259_v49  ;;  %4169 = vpow2.f32 %v7222_v1  ;;  %3806 = vmatmul.msk.f32.gmra.mxu0 %vm403_vm0, %v4478_v40 }
 0x1b1   : > { %v2072_v63 = vsub.f32 %v1798_v24, %v6081_v14  ;;  %v1804_v8 = vsub.f32 %v1270_v44, %v7221_v19  ;;  %3446 = vadd.xlane.f32.xlu0 %v3283_v37  ;;  %v3220_v54 = vadd.f32 %v3188_v7, %v2848_v60  ;;  %4171 = vpow2.f32 %v5742_v56  ;;  %3838 = vmatmul.msk.f32.gmra.mxu1 %vm403_vm0, %v4478_v40 }
 0x1b2   : > { %v4162_v53 = vpop.eup %4161  ;;  %v2349_v52 = vmul.f32 1.442695, %v2071_v32  ;;  %v2077_v0 = vsub.f32 %v1803_v12, %v6033_v33  ;;  %3870 = vmatmul.msk.f32.gmra.mxu2 %vm403_vm0, %v4478_v40  ;;  %v2990_v1 = vmul.f32 %v4160_v4, %v5271_v62  ;;  %v3142_v30 = vadd.f32 %v3110_v22, %v2989_v5  ;;  %3902 = vmatmul.msk.f32.gmra.mxu3 %vm403_vm0, %v4478_v40  ;;  %v1383_v7 = vpop.f32.mrf.mxu2 }
 0x1b3   : > { %v4164_v10 = vpop.eup %4163  ;;  %v2351_v26 = vmul.f32 1.442695, %v2072_v63  ;;  %v2078_v34 = vsub.f32 %v1804_v8, %v6063_v31  ;;  %v2849_v60 = vmul.f32 %v4162_v53, %v6164_v27  ;;  %4173 = vpow2.f32 %v6247_v45 }
 0x1b4   : > { %v4166_v56 = vpop.eup %4165  ;;  %4175 = vpow2.f32 %v2349_v52  ;;  %v2361_v24 = vmul.f32 1.442695, %v2077_v0  ;;  %v2850_v61 = vmul.f32 %v4164_v10, %v6166_v50  ;;  %v6298_v37 = vadd.f32 %v3142_v30, %v2990_v1  ;;  %v1496_v5 = vpop.f32.mrf.mxu3  ;;  %v7223_v52 = vld [vmem:[#allocation55_spill] sm:$0xff] }
 0x1b5   : > { %v4168_v57 = vpop.eup %4167  ;;  %4177 = vpow2.f32 %v2351_v26  ;;  %v2363_v22 = vmul.f32 1.442695, %v2078_v34  ;;  %v3252_v4 = vadd.f32 %v3220_v54, %v2849_v60  ;;  %v2855_v32 = vmul.f32 %v4166_v56, %v6120_v39  ;;  %v1160_v53 = vpop.f32.mrf.mxu0  ;;  %v7224_v30 = vld [vmem:[#allocation23_spill] sm:$0xff] }
 0x1b6   : > { %v4170_v12 = vpop.eup %4169  ;;  %4179 = vpow2.f32 %v2361_v24  ;;  %v1805_v44 = vsub.f32 %v1383_v7, %v7221_v19  ;;  %v2856_v45 = vmul.f32 %v4168_v57, %v6122_v51  ;;  %v6305_v63 = vmul.f32 %v5827_v3, %v5271_v62  ;;  %v1273_v26 = vpop.f32.mrf.mxu1 }
 0x1b7   : > { %v4172_v8 = vpop.eup %4171  ;;  %4181 = vpow2.f32 %v2363_v22  ;;  %v1806_v40 = vsub.f32 %v1496_v5, %v7221_v19  ;;  %v3284_v54 = vadd.f32 %v3252_v4, %v2850_v61  ;;  %v3189_v0 = vadd.f32 %v7223_v52, %v2855_v32  ;;  %v4479_v19 = vld [vmem:[%s4611_s28 + $0xa0] sm:$0xff] }
 0x1b8   : > { %v2079_v1 = vsub.f32 %v1805_v44, %v6076_v59  ;;  %v1811_v10 = vsub.f32 %v1160_v53, %v7224_v30  ;;  %4183 = vpow2.f32 %v6251_v9  ;;  %v2995_v34 = vmul.f32 %v4170_v12, %v5235_v46  ;;  %3807 = vmatmul.msk.f32.gmra.mxu0 %vm403_vm0, %v4479_v19  ;;  %v7225_v44 = vld [vmem:[#allocation5_spill] sm:$0xff] }
 0x1b9   : > { %v4174_v3 = vpop.eup %4173  ;;  %v2080_v60 = vsub.f32 %v1806_v40, %v6081_v14  ;;  %v1812_v56 = vsub.f32 %v1273_v26, %v7224_v30  ;;  %3448 = vadd.xlane.f32.xlu2 %v3284_v54  ;;  %v3221_v24 = vadd.f32 %v3189_v0, %v2856_v45  ;;  %4185 = vpow2.f32 %v5749_v6  ;;  %3839 = vmatmul.msk.f32.gmra.mxu1 %vm403_vm0, %v4479_v19 }
 0x1ba   : > { %v4176_v61 = vpop.eup %4175  ;;  %v2365_v57 = vmul.f32 1.442695, %v2079_v1  ;;  %v2085_v22 = vsub.f32 %v1811_v10, %v6033_v33  ;;  %3871 = vmatmul.msk.f32.gmra.mxu2 %vm403_vm0, %v4479_v19  ;;  %v2996_v9 = vmul.f32 %v4172_v8, %v5237_v58  ;;  %v2997_v7 = vmul.f32 %v4174_v3, %v5259_v49  ;;  %3903 = vmatmul.msk.f32.gmra.mxu3 %vm403_vm0, %v4479_v19  ;;  %v1386_v52 = vpop.f32.mrf.mxu2 }
 0x1bb   : > { %v4178_v4 = vpop.eup %4177  ;;  %v2367_v32 = vmul.f32 1.442695, %v2080_v60  ;;  %v2086_v12 = vsub.f32 %v1812_v56, %v6063_v31  ;;  %v2857_v6 = vmul.f32 %v4176_v61, %v6164_v27  ;;  %4187 = vpow2.f32 %v7225_v44 }
 0x1bc   : > { %v4180_v5 = vpop.eup %4179  ;;  %4189 = vpow2.f32 %v2365_v57  ;;  %v2377_v45 = vmul.f32 1.442695, %v2085_v22  ;;  %v2858_v40 = vmul.f32 %v4178_v4, %v6166_v50  ;;  %v3111_v53 = vadd.f32 %v2996_v9, %v2995_v34  ;;  %v1499_v3 = vpop.f32.mrf.mxu3  ;;  %v7226_v22 = vld [vmem:[#allocation47_spill] sm:$0xff]  ;;  %v7227_v4 = vld [vmem:[#allocation32_spill] sm:$0xff] }
 0x1bd   : > { %v4182_v54 = vpop.eup %4181  ;;  %4191 = vpow2.f32 %v2367_v32  ;;  %v2379_v8 = vmul.f32 1.442695, %v2086_v12  ;;  %v3253_v0 = vadd.f32 %v3221_v24, %v2857_v6  ;;  %v2863_v1 = vmul.f32 %v4180_v5, %v6120_v39  ;;  %v1163_v61 = vpop.f32.mrf.mxu0 }
 0x1be   : > { %v4184_v10 = vpop.eup %4183  ;;  %4193 = vpow2.f32 %v2377_v45  ;;  %v1813_v26 = vsub.f32 %v1386_v52, %v7224_v30  ;;  %v2864_v60 = vmul.f32 %v4182_v54, %v6122_v51  ;;  %v3143_v56 = vadd.f32 %v3111_v53, %v2997_v7  ;;  %v1276_v12 = vpop.f32.mrf.mxu1  ;;  %v7228_v53 = vld [vmem:[#allocation64_spill] sm:$0xff] }
 0x1bf   : > { %v4186_v19 = vpop.eup %4185  ;;  %4195 = vpow2.f32 %v2379_v8  ;;  %v1814_v34 = vsub.f32 %v1499_v3, %v7224_v30  ;;  %v3285_v57 = vadd.f32 %v3253_v0, %v2858_v40  ;;  %v3190_v9 = vadd.f32 %v7226_v22, %v2863_v1  ;;  %v4480_v30 = vld [vmem:[%s4611_s28 + $0xa8] sm:$0xff] }
 0x1c0   : > { %v2087_v24 = vsub.f32 %v1813_v26, %v6076_v59  ;;  %v1819_v32 = vsub.f32 %v1163_v61, %v7227_v4  ;;  %v2998_v6 = vmul.f32 %v4184_v10, %v5271_v62  ;;  %v3003_v44 = vmul.f32 %v4186_v19, %v5235_v46  ;;  %3808 = vmatmul.msk.f32.gmra.mxu0 %vm403_vm0, %v4480_v30  ;;  %v7229_v19 = vld [vmem:[#allocation6_spill] sm:$0xff] }
 0x1c1   : > { %v4188_v5 = vpop.eup %4187  ;;  %v2088_v7 = vsub.f32 %v1814_v34, %v6081_v14  ;;  %v1820_v45 = vsub.f32 %v1276_v12, %v7227_v4  ;;  %3450 = vadd.xlane.f32.xlu1 %v3285_v57  ;;  %v3222_v40 = vadd.f32 %v3190_v9, %v2864_v60  ;;  %4197 = vpow2.f32 %v7228_v53  ;;  %3840 = vmatmul.msk.f32.gmra.mxu1 %vm403_vm0, %v4480_v30 }
 0x1c2   : > { %v4190_v54 = vpop.eup %4189  ;;  %v2381_v8 = vmul.f32 1.442695, %v2087_v24  ;;  %v2093_v52 = vsub.f32 %v1819_v32, %v6033_v33  ;;  %3872 = vmatmul.msk.f32.gmra.mxu2 %vm403_vm0, %v4480_v30  ;;  %v6345_v0 = vadd.f32 %v3143_v56, %v2998_v6  ;;  %v3004_v1 = vmul.f32 %v4188_v5, %v5237_v58  ;;  %3904 = vmatmul.msk.f32.gmra.mxu3 %vm403_vm0, %v4480_v30  ;;  %v1389_v24 = vpop.f32.mrf.mxu2 }
 0x1c3   : > { %v4192_v10 = vpop.eup %4191  ;;  %v2383_v26 = vmul.f32 1.442695, %v2088_v7  ;;  %v2094_v3 = vsub.f32 %v1820_v45, %v6063_v31  ;;  %v2865_v60 = vmul.f32 %v4190_v54, %v6164_v27  ;;  %4199 = vpow2.f32 %v7229_v19  ;;  %v7230_v45 = vld [vmem:[#allocation7_spill] sm:$0xff] }
 0x1c4   : > { %v4194_v34 = vpop.eup %4193  ;;  %4201 = vpow2.f32 %v2381_v8  ;;  %v2393_v61 = vmul.f32 1.442695, %v2093_v52  ;;  %v2866_v57 = vmul.f32 %v4192_v10, %v6166_v50  ;;  %v3112_v22 = vadd.f32 %v3004_v1, %v3003_v44  ;;  %v1502_v5 = vpop.f32.mrf.mxu3  ;;  %v7231_v52 = vld [vmem:[#allocation59_spill] sm:$0xff]  ;;  %v7232_v10 = vld [vmem:[#allocation29_spill] sm:$0xff] }
 0x1c5   : > { %v4196_v56 = vpop.eup %4195  ;;  %4203 = vpow2.f32 %v2383_v26  ;;  %v2395_v9 = vmul.f32 1.442695, %v2094_v3  ;;  %v3254_v32 = vadd.f32 %v3222_v40, %v2865_v60  ;;  %v2871_v12 = vmul.f32 %v4194_v34, %v6120_v39  ;;  %v1166_v54 = vpop.f32.mrf.mxu0 }
 0x1c6   : > { %4205 = vpow2.f32 %v2393_v61  ;;  %v1821_v6 = vsub.f32 %v1389_v24, %v7227_v4  ;;  %v2872_v7 = vmul.f32 %v4196_v56, %v6122_v51  ;;  %v3144_v30 = vadd.f32 %v3112_v22, %v7230_v45  ;;  %v1279_v3 = vpop.f32.mrf.mxu1  ;;  %v7233_v56 = vld [vmem:[#allocation66_spill] sm:$0xff] }
 0x1c7   : > { %v4198_v53 = vpop.eup %4197  ;;  %4207 = vpow2.f32 %v2395_v9  ;;  %v1822_v44 = vsub.f32 %v1502_v5, %v7227_v4  ;;  %v3286_v8 = vadd.f32 %v3254_v32, %v2866_v57  ;;  %v3191_v1 = vadd.f32 %v7231_v52, %v2871_v12  ;;  %v4481_v4 = vld [vmem:[%s4611_s28 + $0xb0] sm:$0xff] }
 0x1c8   : > { %v2095_v40 = vsub.f32 %v1821_v6, %v6076_v59  ;;  %v1827_v26 = vsub.f32 %v1166_v54, %v7232_v10  ;;  %v6362_v60 = vadd.f32 %v3144_v30, %v6305_v63  ;;  %v3011_v19 = vmul.f32 %v4198_v53, %v5235_v46  ;;  %3809 = vmatmul.msk.f32.gmra.mxu0 %vm403_vm0, %v4481_v4  ;;  %v7234_v30 = vld [vmem:[#allocation9_spill] sm:$0xff] }
 0x1c9   : > { %v4200_v34 = vpop.eup %4199  ;;  %v2096_v61 = vsub.f32 %v1822_v44, %v6081_v14  ;;  %v1828_v22 = vsub.f32 %v1279_v3, %v7232_v10  ;;  %3452 = vadd.xlane.f32.xlu2 %v3286_v8  ;;  %v3223_v57 = vadd.f32 %v3191_v1, %v2872_v7  ;;  %4209 = vpow2.f32 %v7233_v56  ;;  %3841 = vmatmul.msk.f32.gmra.mxu1 %vm403_vm0, %v4481_v4 }
 0x1ca   : > { %v4202_v9 = vpop.eup %4201  ;;  %v2397_v24 = vmul.f32 1.442695, %v2095_v40  ;;  %v2101_v32 = vsub.f32 %v1827_v26, %v6033_v33  ;;  %3873 = vmatmul.msk.f32.gmra.mxu2 %vm403_vm0, %v4481_v4  ;;  %v3012_v63 = vmul.f32 %v4200_v34, %v5237_v58  ;;  %v3014_v12 = vmul.f32 %v5873_v20, %v5271_v62  ;;  %3905 = vmatmul.msk.f32.gmra.mxu3 %vm403_vm0, %v4481_v4  ;;  %v1392_v20 = vpop.f32.mrf.mxu2 }
 0x1cb   : > { %v4204_v6 = vpop.eup %4203  ;;  %v2399_v5 = vmul.f32 1.442695, %v2096_v61  ;;  %v2102_v45 = vsub.f32 %v1828_v22, %v6063_v31  ;;  %v2873_v7 = vmul.f32 %v4202_v9, %v6164_v27  ;;  %4211 = vpow2.f32 %v7234_v30  ;;  %v7235_v22 = vld [vmem:[#allocation10_spill] sm:$0xff] }
 0x1cc   : > { %v4206_v53 = vpop.eup %4205  ;;  %4213 = vpow2.f32 %v2397_v24  ;;  %v2409_v44 = vmul.f32 1.442695, %v2101_v32  ;;  %v2874_v54 = vmul.f32 %v4204_v6, %v6166_v50  ;;  %v3113_v8 = vadd.f32 %v3012_v63, %v3011_v19  ;;  %v1505_v34 = vpop.f32.mrf.mxu3  ;;  %v7236_v32 = vld [vmem:[#allocation45_spill] sm:$0xff]  ;;  %v7237_v6 = vld [vmem:[#allocation40_spill] sm:$0xff] }
 0x1cd   : > { %v4208_v52 = vpop.eup %4207  ;;  %4215 = vpow2.f32 %v2399_v5  ;;  %v2411_v1 = vmul.f32 1.442695, %v2102_v45  ;;  %v3255_v40 = vadd.f32 %v3223_v57, %v2873_v7  ;;  %v2879_v26 = vmul.f32 %v4206_v53, %v6120_v39  ;;  %v1169_v9 = vpop.f32.mrf.mxu0 }
 0x1ce   : > { %4217 = vpow2.f32 %v2409_v44  ;;  %v1829_v3 = vsub.f32 %v1392_v20, %v7232_v10  ;;  %v2880_v61 = vmul.f32 %v4208_v52, %v6122_v51  ;;  %v3145_v4 = vadd.f32 %v3113_v8, %v7235_v22  ;;  %v1282_v45 = vpop.f32.mrf.mxu1 }
 0x1cf   : > { %v4210_v56 = vpop.eup %4209  ;;  %4219 = vpow2.f32 %v2411_v1  ;;  %v1830_v19 = vsub.f32 %v1505_v34, %v7232_v10  ;;  %v3287_v24 = vadd.f32 %v3255_v40, %v2874_v54  ;;  %v3192_v63 = vadd.f32 %v7236_v32, %v2879_v26  ;;  %v4482_v10 = vld [vmem:[%s4611_s28 + $0xb8] sm:$0xff]  ;;  %v7238_v40 = vld [vmem:[#allocation13_spill] sm:$0xff] }
 0x1d0   : > { %v2103_v57 = vsub.f32 %v1829_v3, %v6076_v59  ;;  %v1835_v5 = vsub.f32 %v1169_v9, %v7237_v6  ;;  %v6389_v7 = vadd.f32 %v3145_v4, %v3014_v12  ;;  %v3019_v30 = vmul.f32 %v4210_v56, %v5235_v46  ;;  %3810 = vmatmul.msk.f32.gmra.mxu0 %vm403_vm0, %v4482_v10 }
 0x1d1   : > { %v4212_v53 = vpop.eup %4211  ;;  %v2104_v44 = vsub.f32 %v1830_v19, %v6081_v14  ;;  %v1836_v8 = vsub.f32 %v1282_v45, %v7237_v6  ;;  %3454 = vadd.xlane.f32.xlu0 %v3287_v24  ;;  %v3224_v54 = vadd.f32 %v3192_v63, %v2880_v61  ;;  %4221 = vpow2.f32 %v5886_v25  ;;  %3842 = vmatmul.msk.f32.gmra.mxu1 %vm403_vm0, %v4482_v10  ;;  %v7239_v61 = vld [vmem:[#allocation14_spill] sm:$0xff] }
 0x1d2   : > { %v4214_v52 = vpop.eup %4213  ;;  %v2413_v1 = vmul.f32 1.442695, %v2103_v57  ;;  %v2109_v20 = vsub.f32 %v1835_v5, %v6033_v33  ;;  %3874 = vmatmul.msk.f32.gmra.mxu2 %vm403_vm0, %v4482_v10  ;;  %v3020_v12 = vmul.f32 %v4212_v53, %v5237_v58  ;;  %v3022_v26 = vmul.f32 %v7238_v40, %v5271_v62  ;;  %3906 = vmatmul.msk.f32.gmra.mxu3 %vm403_vm0, %v4482_v10  ;;  %v1395_v63 = vpop.f32.mrf.mxu2 }
 0x1d3   : > { %v4216_v3 = vpop.eup %4215  ;;  %v2415_v34 = vmul.f32 1.442695, %v2104_v44  ;;  %v2110_v22 = vsub.f32 %v1836_v8, %v6063_v31  ;;  %v2881_v25 = vmul.f32 %v4214_v52, %v6164_v27  ;;  %4223 = vpow2.f32 %v7239_v61  ;;  %v7240_v8 = vld [vmem:[#allocation12_spill] sm:$0xff] }
 0x1d4   : > { %v4218_v4 = vpop.eup %4217  ;;  %4225 = vpow2.f32 %v2413_v1  ;;  %v2425_v56 = vmul.f32 1.442695, %v2109_v20  ;;  %v2882_v19 = vmul.f32 %v4216_v3, %v6166_v50  ;;  %v3114_v9 = vadd.f32 %v3020_v12, %v3019_v30  ;;  %v1508_v53 = vpop.f32.mrf.mxu3  ;;  %v7241_v12 = vld [vmem:[#allocation63_spill] sm:$0xff]  ;;  %v7242_v3 = vld [vmem:[#allocation42_spill] sm:$0xff] }
 0x1d5   : > { %v4220_v24 = vpop.eup %4219  ;;  %4227 = vpow2.f32 %v2415_v34  ;;  %v2427_v32 = vmul.f32 1.442695, %v2110_v22  ;;  %v3256_v57 = vadd.f32 %v3224_v54, %v2881_v25  ;;  %v2887_v5 = vmul.f32 %v4218_v4, %v6120_v39  ;;  %v1172_v1 = vpop.f32.mrf.mxu0 }
 0x1d6   : > { %4229 = vpow2.f32 %v2425_v56  ;;  %v1837_v45 = vsub.f32 %v1395_v63, %v7237_v6  ;;  %v2888_v44 = vmul.f32 %v4220_v24, %v6122_v51  ;;  %v3146_v10 = vadd.f32 %v3114_v9, %v7240_v8  ;;  %v1285_v22 = vpop.f32.mrf.mxu1  ;;  %v7243_v24 = vld [vmem:[#allocation67_spill] sm:$0xff] }
 0x1d7   : > { %v4222_v52 = vpop.eup %4221  ;;  %4231 = vpow2.f32 %v2427_v32  ;;  %v1838_v30 = vsub.f32 %v1508_v53, %v7237_v6  ;;  %v3288_v20 = vadd.f32 %v3256_v57, %v2882_v19  ;;  %v3193_v40 = vadd.f32 %v7241_v12, %v2887_v5  ;;  %v4483_v6 = vld [vmem:[%s4611_s28 + $0xc0] sm:$0xff] }
 0x1d8   : > { %v2111_v54 = vsub.f32 %v1837_v45, %v6076_v59  ;;  %v1843_v34 = vsub.f32 %v1172_v1, %v7242_v3  ;;  %v6416_v25 = vadd.f32 %v3146_v10, %v3022_v26  ;;  %v3027_v61 = vmul.f32 %v4222_v52, %v5235_v46  ;;  %3811 = vmatmul.msk.f32.gmra.mxu0 %vm403_vm0, %v4483_v6  ;;  %v7244_v10 = vld [vmem:[#allocation16_spill] sm:$0xff] }
 0x1d9   : > { %v4224_v4 = vpop.eup %4223  ;;  %v2112_v56 = vsub.f32 %v1838_v30, %v6081_v14  ;;  %v1844_v9 = vsub.f32 %v1285_v22, %v7242_v3  ;;  %3456 = vadd.xlane.f32.xlu1 %v3288_v20  ;;  %v3225_v19 = vadd.f32 %v3193_v40, %v2888_v44  ;;  %4233 = vpow2.f32 %v7243_v24  ;;  %3843 = vmatmul.msk.f32.gmra.mxu1 %vm403_vm0, %v4483_v6 }
 0x1da   : > { %v4226_v32 = vpop.eup %4225  ;;  %v2429_v63 = vmul.f32 1.442695, %v2111_v54  ;;  %v2117_v57 = vsub.f32 %v1843_v34, %v6033_v33  ;;  %3875 = vmatmul.msk.f32.gmra.mxu2 %vm403_vm0, %v4483_v6  ;;  %v3028_v26 = vmul.f32 %v4224_v4, %v5237_v58  ;;  %v3030_v5 = vmul.f32 %v5956_v35, %v5271_v62  ;;  %3907 = vmatmul.msk.f32.gmra.mxu3 %vm403_vm0, %v4483_v6  ;;  %v1398_v35 = vpop.f32.mrf.mxu2 }
 0x1db   : > { %v4228_v45 = vpop.eup %4227  ;;  %v2431_v53 = vmul.f32 1.442695, %v2112_v56  ;;  %v2118_v8 = vsub.f32 %v1844_v9, %v6063_v31  ;;  %v2889_v44 = vmul.f32 %v4226_v32, %v6164_v27  ;;  %4235 = vpow2.f32 %v7244_v10  ;;  %v7245_v9 = vld [vmem:[#allocation43_spill] sm:$0xff] }
 0x1dc   : > { %v4230_v52 = vpop.eup %4229  ;;  %4237 = vpow2.f32 %v2429_v63  ;;  %v2441_v30 = vmul.f32 1.442695, %v2117_v57  ;;  %v2890_v1 = vmul.f32 %v4228_v45, %v6166_v50  ;;  %v3115_v20 = vadd.f32 %v3028_v26, %v3027_v61  ;;  %v1511_v4 = vpop.f32.mrf.mxu3  ;;  %v7246_v57 = vld [vmem:[#allocation38_spill] sm:$0xff]  ;;  %v7247_v45 = vld [vmem:[#allocation35_spill] sm:$0xff] }
 0x1dd   : > { %v4232_v12 = vpop.eup %4231  ;;  %4239 = vpow2.f32 %v2431_v53  ;;  %v2443_v40 = vmul.f32 1.442695, %v2118_v8  ;;  %v3257_v54 = vadd.f32 %v3225_v19, %v2889_v44  ;;  %v2895_v34 = vmul.f32 %v4230_v52, %v6120_v39  ;;  %v1175_v32 = vpop.f32.mrf.mxu0 }
 0x1de   : > { %4241 = vpow2.f32 %v2441_v30  ;;  %v1845_v22 = vsub.f32 %v1398_v35, %v7242_v3  ;;  %v2896_v56 = vmul.f32 %v4232_v12, %v6122_v51  ;;  %v3147_v6 = vadd.f32 %v3115_v20, %v7245_v9  ;;  %v1288_v8 = vpop.f32.mrf.mxu1 }
 0x1df   : > { %v4234_v24 = vpop.eup %4233  ;;  %4243 = vpow2.f32 %v2443_v40  ;;  %v1846_v61 = vsub.f32 %v1511_v4, %v7242_v3  ;;  %v3289_v63 = vadd.f32 %v3257_v54, %v2890_v1  ;;  %v3194_v26 = vadd.f32 %v7246_v57, %v2895_v34  ;;  %v4484_v3 = vld [vmem:[%s4611_s28 + $0xc8] sm:$0xff] }
 0x1e0   : > { %v2119_v19 = vsub.f32 %v1845_v22, %v6076_v59  ;;  %v1851_v53 = vsub.f32 %v1175_v32, %v7247_v45  ;;  %v6443_v44 = vadd.f32 %v3147_v6, %v3030_v5  ;;  %v3035_v10 = vmul.f32 %v4234_v24, %v5235_v46  ;;  %3812 = vmatmul.msk.f32.gmra.mxu0 %vm403_vm0, %v4484_v3 }
 0x1e1   : > { %v4236_v52 = vpop.eup %4235  ;;  %v2120_v30 = vsub.f32 %v1846_v61, %v6081_v14  ;;  %v1852_v20 = vsub.f32 %v1288_v8, %v7247_v45  ;;  %3458 = vadd.xlane.f32.xlu2 %v3289_v63  ;;  %v3226_v1 = vadd.f32 %v3194_v26, %v2896_v56  ;;  %4245 = vpow2.f32 %v5973_v13  ;;  %3844 = vmatmul.msk.f32.gmra.mxu1 %vm403_vm0, %v4484_v3 }
 0x1e2   : > { %v4238_v12 = vpop.eup %4237  ;;  %v2445_v40 = vmul.f32 1.442695, %v2119_v19  ;;  %v2125_v35 = vsub.f32 %v1851_v53, %v6033_v33  ;;  %3876 = vmatmul.msk.f32.gmra.mxu2 %vm403_vm0, %v4484_v3  ;;  %v3036_v5 = vmul.f32 %v4236_v52, %v5237_v58  ;;  %v3038_v54 = vmul.f32 %v6002_v47, %v5271_v62  ;;  %3908 = vmatmul.msk.f32.gmra.mxu3 %vm403_vm0, %v4484_v3  ;;  %v1401_v47 = vpop.f32.mrf.mxu2 }
 0x1e3   : > { %v4240_v34 = vpop.eup %4239  ;;  %v2447_v22 = vmul.f32 1.442695, %v2120_v30  ;;  %v2126_v4 = vsub.f32 %v1852_v20, %v6063_v31  ;;  %v2897_v13 = vmul.f32 %v4238_v12, %v6164_v27  ;;  %4247 = vpow2.f32 %v5979_v17  ;;  %v7248_v20 = vld [vmem:[#allocation39_spill] sm:$0xff]  ;;  %v7249_v12 = vld [vmem:[#allocation46_spill] sm:$0xff] }
 0x1e4   : > { %v4242_v56 = vpop.eup %4241  ;;  %4249 = vpow2.f32 %v2445_v40  ;;  %v2457_v9 = vmul.f32 1.442695, %v2125_v35  ;;  %v2898_v6 = vmul.f32 %v4240_v34, %v6166_v50  ;;  %v3116_v24 = vadd.f32 %v3036_v5, %v3035_v10  ;;  %v1514_v19 = vpop.f32.mrf.mxu3 }
 0x1e5   : > { %v4244_v61 = vpop.eup %4243  ;;  %4251 = vpow2.f32 %v2447_v22  ;;  %v2459_v32 = vmul.f32 1.442695, %v2126_v4  ;;  %v3258_v63 = vadd.f32 %v3226_v1, %v2897_v13  ;;  %v2903_v57 = vmul.f32 %v4242_v56, %v6120_v39  ;;  %v1178_v52 = vpop.f32.mrf.mxu0  ;;  %v7250_v56 = vld [vmem:[#allocation22_spill] sm:$0xff] }
 0x1e6   : > { %4253 = vpow2.f32 %v2457_v9  ;;  %v1853_v26 = vsub.f32 %v1401_v47, %v7247_v45  ;;  %v2904_v53 = vmul.f32 %v4244_v61, %v6122_v51  ;;  %v3148_v17 = vadd.f32 %v3116_v24, %v5977_v41  ;;  %v1291_v35 = vpop.f32.mrf.mxu1 }
 0x1e7   : > { %v4246_v8 = vpop.eup %4245  ;;  %4255 = vpow2.f32 %v2459_v32  ;;  %v1854_v10 = vsub.f32 %v1514_v19, %v7247_v45  ;;  %v3290_v30 = vadd.f32 %v3258_v63, %v2898_v6  ;;  %v3195_v3 = vadd.f32 %v7248_v20, %v2903_v57  ;;  %v4485_v45 = vld [vmem:[%s4611_s28 + $0xd0] sm:$0xff] }
 0x1e8   : > { %v2127_v1 = vsub.f32 %v1853_v26, %v6076_v59  ;;  %v1859_v40 = vsub.f32 %v1178_v52, %v7249_v12  ;;  %v6470_v5 = vadd.f32 %v3148_v17, %v3038_v54  ;;  %v3043_v34 = vmul.f32 %v4246_v8, %v5235_v46  ;;  %3813 = vmatmul.msk.f32.gmra.mxu0 %vm403_vm0, %v4485_v45 }
 0x1e9   : > { %v4248_v22 = vpop.eup %4247  ;;  %v2128_v41 = vsub.f32 %v1854_v10, %v6081_v14  ;;  %v1860_v4 = vsub.f32 %v1291_v35, %v7249_v12  ;;  %3460 = vadd.xlane.f32.xlu0 %v3290_v30  ;;  %v3227_v13 = vadd.f32 %v3195_v3, %v2904_v53  ;;  %4257 = vpow2.f32 %v7250_v56  ;;  %3845 = vmatmul.msk.f32.gmra.mxu1 %vm403_vm0, %v4485_v45 }
 0x1ea   : > { %v4250_v9 = vpop.eup %4249  ;;  %v2461_v6 = vmul.f32 1.442695, %v2127_v1  ;;  %v2133_v24 = vsub.f32 %v1859_v40, %v6033_v33  ;;  %3877 = vmatmul.msk.f32.gmra.mxu2 %vm403_vm0, %v4485_v45  ;;  %v3044_v54 = vmul.f32 %v4248_v22, %v5237_v58  ;;  %v3046_v61 = vmul.f32 %v6045_v11, %v5271_v62  ;;  %3909 = vmatmul.msk.f32.gmra.mxu3 %vm403_vm0, %v4485_v45  ;;  %v1404_v11 = vpop.f32.mrf.mxu2 }
 0x1eb   : > { %v4252_v32 = vpop.eup %4251  ;;  %v2463_v47 = vmul.f32 1.442695, %v2128_v41  ;;  %v2134_v63 = vsub.f32 %v1860_v4, %v6063_v31  ;;  %v2905_v57 = vmul.f32 %v4250_v9, %v6164_v27  ;;  %4259 = vpow2.f32 %v6019_v2  ;;  %v7251_v41 = vld [vmem:[#allocation51_spill] sm:$0xff] }
 0x1ec   : > { %v4254_v26 = vpop.eup %4253  ;;  %4261 = vpow2.f32 %v2461_v6  ;;  %v2473_v19 = vmul.f32 1.442695, %v2133_v24  ;;  %v2906_v53 = vmul.f32 %v4252_v32, %v6166_v50  ;;  %v3117_v17 = vadd.f32 %v3044_v54, %v3043_v34  ;;  %v1517_v3 = vpop.f32.mrf.mxu3 }
 0x1ed   : > { %v4256_v8 = vpop.eup %4255  ;;  %4263 = vpow2.f32 %v2463_v47  ;;  %v2475_v10 = vmul.f32 1.442695, %v2134_v63  ;;  %v3259_v52 = vadd.f32 %v3227_v13, %v2905_v57  ;;  %v2911_v30 = vmul.f32 %v4254_v26, %v6120_v39  ;;  %v1181_v34 = vpop.f32.mrf.mxu0  ;;  %v7252_v13 = vld [vmem:[#allocation48_spill] sm:$0xff]  ;;  %v7253_v63 = vld [vmem:[#allocation34_spill] sm:$0xff] }
 0x1ee   : > { %4265 = vpow2.f32 %v2473_v19  ;;  %v1861_v20 = vsub.f32 %v1404_v11, %v7249_v12  ;;  %v2912_v1 = vmul.f32 %v4256_v8, %v6122_v51  ;;  %v3149_v2 = vadd.f32 %v3117_v17, %v6023_v48  ;;  %v1294_v9 = vpop.f32.mrf.mxu1 }
 0x1ef   : > { %v4258_v40 = vpop.eup %4257  ;;  %4267 = vpow2.f32 %v2475_v10  ;;  %v1862_v35 = vsub.f32 %v1517_v3, %v7249_v12  ;;  %v3291_v22 = vadd.f32 %v3259_v52, %v2906_v53  ;;  %v3196_v4 = vadd.f32 %v7251_v41, %v2911_v30  ;;  %v4486_v12 = vld [vmem:[%s4611_s28 + $0xd8] sm:$0xff]  ;;  %v7254_v53 = vld [vmem:[#allocation50_spill] sm:$0xff]  ;;  %v7255_v30 = vld [vmem:[#allocation49_spill] sm:$0xff] }
 0x1f0   : > { %v2135_v45 = vsub.f32 %v1861_v20, %v6076_v59  ;;  %v1867_v56 = vsub.f32 %v1181_v34, %v7252_v13  ;;  %v6497_v6 = vadd.f32 %v3149_v2, %v3046_v61  ;;  %v3051_v24 = vmul.f32 %v4258_v40, %v5235_v46  ;;  %3814 = vmatmul.msk.f32.gmra.mxu0 %vm403_vm0, %v4486_v12 }
 0x1f1   : > { %v4260_v54 = vpop.eup %4259  ;;  %v2136_v48 = vsub.f32 %v1862_v35, %v6081_v14  ;;  %v1868_v32 = vsub.f32 %v1294_v9, %v7252_v13  ;;  %3462 = vadd.xlane.f32.xlu1 %v3291_v22  ;;  %v3228_v47 = vadd.f32 %v3196_v4, %v2912_v1  ;;  %4269 = vpow2.f32 %v7253_v63  ;;  %3846 = vmatmul.msk.f32.gmra.mxu1 %vm403_vm0, %v4486_v12  ;;  %v7256_v9 = vld [vmem:[#allocation71_spill] sm:$0xff]  ;;  %v7257_v63 = vld [vmem:[#allocation17_spill] sm:$0xff] }
 0x1f2   : > { %v4262_v57 = vpop.eup %4261  ;;  %v2477_v26 = vmul.f32 1.442695, %v2135_v45  ;;  %v2141_v19 = vsub.f32 %v1867_v56, %v6033_v33  ;;  %3878 = vmatmul.msk.f32.gmra.mxu2 %vm403_vm0, %v4486_v12  ;;  %v3052_v61 = vmul.f32 %v4260_v54, %v5237_v58  ;;  %v3054_v17 = vmul.f32 %v7254_v53, %v5271_v62  ;;  %3910 = vmatmul.msk.f32.gmra.mxu3 %vm403_vm0, %v4486_v12  ;;  %v1407_v34 = vpop.f32.mrf.mxu2 }
 0x1f3   : > { %v4264_v8 = vpop.eup %4263  ;;  %v2479_v10 = vmul.f32 1.442695, %v2136_v48  ;;  %v2142_v11 = vsub.f32 %v1868_v32, %v6063_v31  ;;  %v2913_v52 = vmul.f32 %v4262_v57, %v6164_v27  ;;  %4271 = vpow2.f32 %v7255_v30 }
 0x1f4   : > { %v4266_v20 = vpop.eup %4265  ;;  %4273 = vpow2.f32 %v2477_v26  ;;  %v2489_v3 = vmul.f32 1.442695, %v2141_v19  ;;  %v2914_v1 = vmul.f32 %v4264_v8, %v6166_v50  ;;  %v3118_v2 = vadd.f32 %v3052_v61, %v3051_v24  ;;  %v1520_v45 = vpop.f32.mrf.mxu3  ;;  %v7258_v26 = vld [vmem:[#allocation41_spill] sm:$0xff] }
 0x1f5   : > { %v4268_v40 = vpop.eup %4267  ;;  %4275 = vpow2.f32 %v2479_v10  ;;  %v2491_v35 = vmul.f32 1.442695, %v2142_v11  ;;  %v3260_v22 = vadd.f32 %v3228_v47, %v2913_v52  ;;  %v2919_v41 = vmul.f32 %v4266_v20, %v6120_v39  ;;  %v1184_v32 = vpop.f32.mrf.mxu0  ;;  %v7259_v20 = vld [vmem:[#allocation73_spill] sm:$0xff] }
 0x1f6   : > { %4277 = vpow2.f32 %v2489_v3  ;;  %v1869_v4 = vsub.f32 %v1407_v34, %v7252_v13  ;;  %v2920_v56 = vmul.f32 %v4268_v40, %v6122_v51  ;;  %v3150_v54 = vadd.f32 %v3118_v2, %v7256_v9  ;;  %v1297_v61 = vpop.f32.mrf.mxu1 }
 0x1f7   : > { %v4270_v48 = vpop.eup %4269  ;;  %4279 = vpow2.f32 %v2491_v35  ;;  %v1870_v24 = vsub.f32 %v1520_v45, %v7252_v13  ;;  %v3292_v12 = vadd.f32 %v3260_v22, %v2914_v1  ;;  %v3197_v57 = vadd.f32 %v7257_v63, %v2919_v41  ;;  %v4487_v13 = vld [vmem:[%s4611_s28 + $0xe0] sm:$0xff] }
 0x1f8   : > { %v2143_v47 = vsub.f32 %v1869_v4, %v6076_v59  ;;  %v1875_v19 = vsub.f32 %v1184_v32, %v7258_v26  ;;  %v6524_v53 = vadd.f32 %v3150_v54, %v3054_v17  ;;  %v3059_v8 = vmul.f32 %v4270_v48, %v5235_v46  ;;  %3815 = vmatmul.msk.f32.gmra.mxu0 %vm403_vm0, %v4487_v13  ;;  %v7260_v4 = vld [vmem:[#allocation75_spill] sm:$0xff] }
 0x1f9   : > { %v4272_v10 = vpop.eup %4271  ;;  %v2144_v11 = vsub.f32 %v1870_v24, %v6081_v14  ;;  %v1876_v52 = vsub.f32 %v1297_v61, %v7258_v26  ;;  %3464 = vadd.xlane.f32.xlu2 %v3292_v12  ;;  %v3229_v30 = vadd.f32 %v3197_v57, %v2920_v56  ;;  %4281 = vpow2.f32 %v7259_v20  ;;  %3847 = vmatmul.msk.f32.gmra.mxu1 %vm403_vm0, %v4487_v13 }
 0x1fa   : > { %v4274_v3 = vpop.eup %4273  ;;  %v2493_v1 = vmul.f32 1.442695, %v2143_v47  ;;  %v2149_v2 = vsub.f32 %v1875_v19, %v6033_v33  ;;  %3879 = vmatmul.msk.f32.gmra.mxu2 %vm403_vm0, %v4487_v13  ;;  %v3060_v17 = vmul.f32 %v4272_v10, %v5237_v58  ;;  %v3062_v40 = vmul.f32 %v6107_v43, %v5271_v62  ;;  %3911 = vmatmul.msk.f32.gmra.mxu3 %vm403_vm0, %v4487_v13  ;;  %v1410_v43 = vpop.f32.mrf.mxu2  ;;  %v7261_v19 = vld [vmem:[#allocation76_spill] sm:$0xff]  ;;  %v7262_v13 = vld [vmem:[#allocation21_spill] sm:$0xff] }
 0x1fb   : > { %v4276_v35 = vpop.eup %4275  ;;  %v2495_v34 = vmul.f32 1.442695, %v2144_v11  ;;  %v2150_v22 = vsub.f32 %v1876_v52, %v6063_v31  ;;  %v2921_v41 = vmul.f32 %v4274_v3, %v6164_v27  ;;  %4283 = vpow2.f32 %v7260_v4  ;;  %v7263_v3 = vld [vmem:[#allocation52_spill] sm:$0xff] }
 0x1fc   : > { %v4278_v45 = vpop.eup %4277  ;;  %4285 = vpow2.f32 %v2493_v1  ;;  %v2505_v56 = vmul.f32 1.442695, %v2149_v2  ;;  %v2922_v9 = vmul.f32 %v4276_v35, %v6166_v50  ;;  %v3119_v54 = vadd.f32 %v3060_v17, %v3059_v8  ;;  %v1523_v57 = vpop.f32.mrf.mxu3 }
 0x1fd   : > { %v4280_v48 = vpop.eup %4279  ;;  %4287 = vpow2.f32 %v2495_v34  ;;  %v2507_v24 = vmul.f32 1.442695, %v2150_v22  ;;  %v3261_v32 = vadd.f32 %v3229_v30, %v2921_v41  ;;  %v2927_v12 = vmul.f32 %v4278_v45, %v6120_v39  ;;  %v1187_v11 = vpop.f32.mrf.mxu0  ;;  %v7264_v45 = vld [vmem:[#allocation77_spill] sm:$0xff] }
 0x1fe   : > { %4289 = vpow2.f32 %v2505_v56  ;;  %v1877_v63 = vsub.f32 %v1410_v43, %v7258_v26  ;;  %v2928_v47 = vmul.f32 %v4280_v48, %v6122_v51  ;;  %v3151_v61 = vadd.f32 %v3119_v54, %v7261_v19  ;;  %v1300_v2 = vpop.f32.mrf.mxu1 }
 0x1ff   : > { %v4282_v10 = vpop.eup %4281  ;;  %4291 = vpow2.f32 %v2507_v24  ;;  %v1878_v8 = vsub.f32 %v1523_v57, %v7258_v26  ;;  %v3293_v52 = vadd.f32 %v3261_v32, %v2922_v9  ;;  %v3198_v20 = vadd.f32 %v7262_v13, %v2927_v12  ;;  %v4488_v26 = vld [vmem:[%s4611_s28 + $0xe8] sm:$0xff] }
 0x200   : > { %v2151_v30 = vsub.f32 %v1877_v63, %v6076_v59  ;;  %v1883_v1 = vsub.f32 %v1187_v11, %v7263_v3  ;;  %v6551_v17 = vadd.f32 %v3151_v61, %v3062_v40  ;;  %v3067_v35 = vmul.f32 %v4282_v10, %v5235_v46  ;;  %3816 = vmatmul.msk.f32.gmra.mxu0 %vm403_vm0, %v4488_v26 }
 0x201   : > { %v4284_v34 = vpop.eup %4283  ;;  %v2152_v22 = vsub.f32 %v1878_v8, %v6081_v14  ;;  %v1884_v41 = vsub.f32 %v1300_v2, %v7263_v3  ;;  %3466 = vadd.xlane.f32.xlu0 %v3293_v52  ;;  %v3230_v4 = vadd.f32 %v3198_v20, %v2928_v47  ;;  %4293 = vpow2.f32 %v7264_v45  ;;  %3848 = vmatmul.msk.f32.gmra.mxu1 %vm403_vm0, %v4488_v26 }
 0x202   : > { %v4286_v56 = vpop.eup %4285  ;;  %v2509_v9 = vmul.f32 1.442695, %v2151_v30  ;;  %v2157_v54 = vsub.f32 %v1883_v1, %v6033_v33  ;;  %3880 = vmatmul.msk.f32.gmra.mxu2 %vm403_vm0, %v4488_v26  ;;  %v3068_v40 = vmul.f32 %v4284_v34, %v5237_v58  ;;  %v3070_v48 = vmul.f32 %v6154_v15, %v5271_v62  ;;  %3912 = vmatmul.msk.f32.gmra.mxu3 %vm403_vm0, %v4488_v26  ;;  %v1413_v15 = vpop.f32.mrf.mxu2  ;;  %v7265_v34 = vld [vmem:[#allocation28_spill] sm:$0xff]  ;;  %v7266_v26 = vld [vmem:[#allocation54_spill] sm:$0xff] }
 0x203   : > { %v4288_v24 = vpop.eup %4287  ;;  %v2511_v43 = vmul.f32 1.442695, %v2152_v22  ;;  %v2158_v32 = vsub.f32 %v1884_v41, %v6063_v31  ;;  %v2929_v12 = vmul.f32 %v4286_v56, %v6164_v27  ;;  %4295 = vpow2.f32 %v6148_v18 }
 0x204   : > { %v4290_v63 = vpop.eup %4289  ;;  %4297 = vpow2.f32 %v2509_v9  ;;  %v2521_v57 = vmul.f32 1.442695, %v2157_v54  ;;  %v2930_v47 = vmul.f32 %v4288_v24, %v6166_v50  ;;  %v3120_v19 = vadd.f32 %v3068_v40, %v3067_v35  ;;  %v1526_v13 = vpop.f32.mrf.mxu3 }
 0x205   : > { %v4292_v61 = vpop.eup %4291  ;;  %4299 = vpow2.f32 %v2511_v43  ;;  %v2523_v10 = vmul.f32 1.442695, %v2158_v32  ;;  %v3262_v8 = vadd.f32 %v3230_v4, %v2929_v12  ;;  %v2935_v11 = vmul.f32 %v4290_v63, %v6120_v39  ;;  %v1190_v2 = vpop.f32.mrf.mxu0 }
 0x206   : > { %4301 = vpow2.f32 %v2521_v57  ;;  %v1885_v52 = vsub.f32 %v1413_v15, %v7263_v3  ;;  %v2936_v20 = vmul.f32 %v4292_v61, %v6122_v51  ;;  %v3152_v18 = vadd.f32 %v3120_v19, %v6162_v28  ;;  %v1303_v45 = vpop.f32.mrf.mxu1 }
 0x207   : > { %v4294_v30 = vpop.eup %4293  ;;  %4303 = vpow2.f32 %v2523_v10  ;;  %v1886_v1 = vsub.f32 %v1526_v13, %v7263_v3  ;;  %v3294_v35 = vadd.f32 %v3262_v8, %v2930_v47  ;;  %v3199_v22 = vadd.f32 %v7265_v34, %v2935_v11  ;;  %v4489_v3 = vld [vmem:[%s4611_s28 + $0xf0] sm:$0xff] }
 0x208   : > { %v2159_v41 = vsub.f32 %v1885_v52, %v6076_v59  ;;  %v1891_v4 = vsub.f32 %v1190_v2, %v7266_v26  ;;  %v6578_v56 = vadd.f32 %v3152_v18, %v3070_v48  ;;  %v3075_v9 = vmul.f32 %v4294_v30, %v5235_v46  ;;  %3817 = vmatmul.msk.f32.gmra.mxu0 %vm403_vm0, %v4489_v3 }
 0x209   : > { %v4296_v54 = vpop.eup %4295  ;;  %v2160_v28 = vsub.f32 %v1886_v1, %v6081_v14  ;;  %v1892_v40 = vsub.f32 %v1303_v45, %v7266_v26  ;;  %3468 = vadd.xlane.f32.xlu1 %v3294_v35  ;;  %v3231_v24 = vadd.f32 %v3199_v22, %v2936_v20  ;;  %4305 = vpow2.f32 %v6169_v21  ;;  %3849 = vmatmul.msk.f32.gmra.mxu1 %vm403_vm0, %v4489_v3 }
 0x20a   : > { %v4298_v43 = vpop.eup %4297  ;;  %v2525_v32 = vmul.f32 1.442695, %v2159_v41  ;;  %v2165_v12 = vsub.f32 %v1891_v4, %v6033_v33  ;;  %3881 = vmatmul.msk.f32.gmra.mxu2 %vm403_vm0, %v4489_v3  ;;  %v3076_v48 = vmul.f32 %v4296_v54, %v5237_v58  ;;  %v3078_v63 = vmul.f32 %v6198_v55, %v5271_v62  ;;  %3913 = vmatmul.msk.f32.gmra.mxu3 %vm403_vm0, %v4489_v3  ;;  %v1416_v55 = vpop.f32.mrf.mxu2  ;;  %v7267_v41 = vld [vmem:[#allocation70_spill] sm:$0xff] }
 0x20b   : > { %v4300_v57 = vpop.eup %4299  ;;  %v2527_v47 = vmul.f32 1.442695, %v2160_v28  ;;  %v2166_v19 = vsub.f32 %v1892_v40, %v6063_v31  ;;  %v2937_v21 = vmul.f32 %v4298_v43, %v6164_v27  ;;  %4307 = vpow2.f32 %v6200_v16 }
 0x20c   : > { %v4302_v61 = vpop.eup %4301  ;;  %4309 = vpow2.f32 %v2525_v32  ;;  %v2537_v10 = vmul.f32 1.442695, %v2165_v12  ;;  %v2938_v15 = vmul.f32 %v4300_v57, %v6166_v50  ;;  %v3121_v8 = vadd.f32 %v3076_v48, %v3075_v9  ;;  %v1529_v30 = vpop.f32.mrf.mxu3  ;;  %v7268_v9 = vld [vmem:[#allocation8_spill] sm:$0xff] }
 0x20d   : > { %v4304_v11 = vpop.eup %4303  ;;  %4311 = vpow2.f32 %v2527_v47  ;;  %v2539_v52 = vmul.f32 1.442695, %v2166_v19  ;;  %v3263_v13 = vadd.f32 %v3231_v24, %v2937_v21  ;;  %v2943_v20 = vmul.f32 %v4302_v61, %v6120_v39  ;;  %v1193_v34 = vpop.f32.mrf.mxu0  ;;  %v4490_v32 = vld [vmem:[%s4611_s28 + $0xf8] sm:$0xff]  ;;  %s6654_s28 = scalar_lea.vmem %s6933_s5, %s3656_s25 }
 0x20e   : > { %4313 = vpow2.f32 %v2537_v10  ;;  %v1893_v18 = vsub.f32 %v1416_v55, %v7266_v26  ;;  %v2944_v1 = vmul.f32 %v4304_v11, %v6122_v51  ;;  %v3153_v16 = vadd.f32 %v3121_v8, %v6241_v29  ;;  %v1306_v28 = vpop.f32.mrf.mxu1 }
 0x20f   : > { %v4306_v2 = vpop.eup %4305  ;;  %4315 = vpow2.f32 %v2539_v52  ;;  %v1894_v35 = vsub.f32 %v1529_v30, %v7266_v26  ;;  %v3295_v22 = vadd.f32 %v3263_v13, %v2938_v15  ;;  %v3200_v4 = vadd.f32 %v7267_v41, %v2943_v20 }
 0x210   : > { %v2167_v45 = vsub.f32 %v1893_v18, %v6076_v59  ;;  %v1899_v54 = vsub.f32 %v1193_v34, %v7268_v9  ;;  %v6605_v40 = vadd.f32 %v3153_v16, %v3078_v63  ;;  %v3083_v3 = vmul.f32 %v4306_v2, %v5235_v46  ;;  %3818 = vmatmul.msk.f32.gmra.mxu0 %vm403_vm0, %v4490_v32  ;;  %v7269_v2 = vld [vmem:[#allocation74_spill] sm:$0xff] }
 0x211   : > { %v4308_v24 = vpop.eup %4307  ;;  %v3085_v29 = vmul.f32 %v6231_v42, %v5259_v49  ;;  %v2168_v43 = vsub.f32 %v1894_v35, %v6081_v14  ;;  %v1900_v26 = vsub.f32 %v1306_v28, %v7268_v9  ;;  %3470 = vadd.xlane.f32.xlu2 %v3295_v22  ;;  %3850 = vmatmul.msk.f32.gmra.mxu1 %vm403_vm0, %v4490_v32  ;;  %v7270_v22 = vld [vmem:[#allocation24_spill] sm:$0xff] }
 0x212   : > { %v4310_v12 = vpop.eup %4309  ;;  %v2541_v48 = vmul.f32 1.442695, %v2167_v45  ;;  %v2173_v57 = vsub.f32 %v1899_v54, %v6033_v33  ;;  %3882 = vmatmul.msk.f32.gmra.mxu2 %vm403_vm0, %v4490_v32  ;;  %v3232_v46 = vadd.f32 %v3200_v4, %v2944_v1  ;;  %v3084_v63 = vmul.f32 %v4308_v24, %v5237_v58  ;;  %3914 = vmatmul.msk.f32.gmra.mxu3 %vm403_vm0, %v4490_v32 }
 0x213   : > { %v4312_v49 = vpop.eup %4311  ;;  %v2543_v42 = vmul.f32 1.442695, %v2168_v43  ;;  %v2174_v47 = vsub.f32 %v1900_v26, %v6063_v31  ;;  %v2945_v19 = vmul.f32 %v4310_v12, %v6164_v27  ;;  %v3086_v21 = vmul.f32 %v6238_v38, %v5271_v62 }
 0x214   : > { %v4314_v61 = vpop.eup %4313  ;;  %4317 = vpow2.f32 %v2541_v48  ;;  %v2553_v10 = vmul.f32 1.442695, %v2173_v57  ;;  %v2946_v15 = vmul.f32 %v4312_v49, %v6166_v50  ;;  %v3122_v8 = vadd.f32 %v3084_v63, %v3083_v3  ;;  %v1419_v52 = vpop.f32.mrf.mxu2 }
 0x215   : > { %v4316_v11 = vpop.eup %4315  ;;  %4319 = vpow2.f32 %v2543_v42  ;;  %v2555_v58 = vmul.f32 1.442695, %v2174_v47  ;;  %v3264_v55 = vadd.f32 %v3232_v46, %v2945_v19  ;;  %v2951_v13 = vmul.f32 %v4314_v61, %v6120_v39  ;;  %v1532_v18 = vpop.f32.mrf.mxu3 }
 0x216   : > { %4321 = vpow2.f32 %v2553_v10  ;;  %v1901_v20 = vsub.f32 %v1419_v52, %v7268_v9  ;;  %v2952_v30 = vmul.f32 %v4316_v11, %v6122_v51  ;;  %v3154_v62 = vadd.f32 %v3122_v8, %v3085_v29  ;;  %v1196_v1 = vpop.f32.mrf.mxu0  ;;  %v1309_v4 = vpop.f32.mrf.mxu1 }
 0x217   : > { %4323 = vpow2.f32 %v2555_v58  ;;  %v1902_v38 = vsub.f32 %v1532_v18, %v7268_v9  ;;  %v3296_v16 = vadd.f32 %v3264_v55, %v2946_v15  ;;  %v3201_v35 = vadd.f32 %v7269_v2, %v2951_v13  ;;  %v7271_v58 = vld [vmem:[#allocation79_spill] sm:$0xff] }
 0x218   : > { %v2175_v34 = vsub.f32 %v1901_v20, %v6076_v59  ;;  %v1907_v41 = vsub.f32 %v1196_v1, %v7270_v22  ;;  %v6631_v45 = vadd.f32 %v3154_v62, %v3086_v21  ;;  %v1908_v28 = vsub.f32 %v1309_v4, %v7270_v22  ;;  %v7272_v13 = vld [vmem:[#allocation27_spill] sm:$0xff] }
 0x219   : > { %v2176_v54 = vsub.f32 %v1902_v38, %v6081_v14  ;;  %3472 = vadd.xlane.f32.xlu0 %v3296_v16  ;;  %v3233_v12 = vadd.f32 %v3201_v35, %v2952_v30 }
 0x21a   : > { %v4318_v3 = vpop.eup %4317  ;;  %v2557_v24 = vmul.f32 1.442695, %v2175_v34  ;;  %v2181_v9 = vsub.f32 %v1907_v41, %v6033_v33  ;;  %v2182_v26 = vsub.f32 %v1908_v28, %v6063_v31 }
 0x21b   : > { %v4320_v29 = vpop.eup %4319  ;;  %v2559_v43 = vmul.f32 1.442695, %v2176_v54  ;;  %v2953_v32 = vmul.f32 %v4318_v3, %v6164_v27 }
 0x21c   : > { %v4322_v48 = vpop.eup %4321  ;;  %4325 = vpow2.f32 %v2557_v24  ;;  %v2569_v57 = vmul.f32 1.442695, %v2181_v9  ;;  %v2954_v46 = vmul.f32 %v4320_v29, %v6166_v50  ;;  %v2571_v49 = vmul.f32 1.442695, %v2182_v26  ;;  %v1422_v42 = vpop.f32.mrf.mxu2 }
 0x21d   : > { %v4324_v63 = vpop.eup %4323  ;;  %4327 = vpow2.f32 %v2559_v43  ;;  %v3265_v47 = vadd.f32 %v3233_v12, %v2953_v32  ;;  %v2959_v19 = vmul.f32 %v4322_v48, %v6120_v39  ;;  %v1909_v21 = vsub.f32 %v1422_v42, %v7270_v22  ;;  %v1535_v61 = vpop.f32.mrf.mxu3 }
 0x21e   : > { %4329 = vpow2.f32 %v2569_v57  ;;  %v2960_v10 = vmul.f32 %v4324_v63, %v6122_v51  ;;  %v1910_v15 = vsub.f32 %v1535_v61, %v7270_v22  ;;  %v1199_v8 = vpop.f32.mrf.mxu0  ;;  %v1312_v18 = vpop.f32.mrf.mxu1 }
 0x21f   : > { %4331 = vpow2.f32 %v2571_v49  ;;  %v3297_v11 = vadd.f32 %v3265_v47, %v2954_v46  ;;  %v3202_v52 = vadd.f32 %v7271_v58, %v2959_v19  ;;  %v2183_v55 = vsub.f32 %v1909_v21, %v6076_v59  ;;  %v7273_v49 = vld [vmem:[#allocation53_spill] sm:$0xff]  ;;  %v7274_v19 = vld [vmem:[#allocation20_spill] sm:$0xff] }
 0x220   : > { %v1915_v20 = vsub.f32 %v1199_v8, %v7272_v13  ;;  %v2184_v30 = vsub.f32 %v1910_v15, %v6081_v14  ;;  %v1916_v62 = vsub.f32 %v1312_v18, %v7272_v13 }
 0x221   : > { %3474 = vadd.xlane.f32.xlu1 %v3297_v11  ;;  %v2573_v1 = vmul.f32 1.442695, %v2183_v55  ;;  %v3234_v41 = vadd.f32 %v3202_v52, %v2960_v10 }
 0x222   : > { %v4326_v38 = vpop.eup %4325  ;;  %v2189_v16 = vsub.f32 %v1915_v20, %v6033_v33  ;;  %v2575_v35 = vmul.f32 1.442695, %v2184_v30  ;;  %v2190_v34 = vsub.f32 %v1916_v62, %v6063_v31 }
 0x223   : > { %v4328_v2 = vpop.eup %4327  ;;  %v2961_v22 = vmul.f32 %v4326_v38, %v6164_v27  ;;  %4333 = vpow2.f32 %v2573_v1 }
 0x224   : > { %v4330_v4 = vpop.eup %4329  ;;  %v2585_v54 = vmul.f32 1.442695, %v2189_v16  ;;  %v3447_v28 = vpop.xlane.xlu0 %3446  ;;  %v2962_v3 = vmul.f32 %v4328_v2, %v6166_v50  ;;  %4335 = vpow2.f32 %v2575_v35  ;;  %v2587_v9 = vmul.f32 1.442695, %v2190_v34 }
 0x225   : > { %v4332_v24 = vpop.eup %4331  ;;  %3511 = vst.msk [vmem:[%s6654_s28] sm:$0xff] %vm533_vm1, %v3447_v28  ;;  %v1425_v29 = vpop.f32.mrf.mxu2  ;;  %v3266_v43 = vadd.f32 %v3234_v41, %v2961_v22  ;;  %v2967_v26 = vmul.f32 %v4330_v4, %v6120_v39 }
 0x226   : > { %4337 = vpow2.f32 %v2585_v54  ;;  %v1917_v32 = vsub.f32 %v1425_v29, %v7272_v13  ;;  %v1538_v12 = vpop.f32.mrf.mxu3  ;;  %v2968_v48 = vmul.f32 %v4332_v24, %v6122_v51  ;;  %v1202_v46 = vpop.f32.mrf.mxu0 }
 0x227   : > { %4339 = vpow2.f32 %v2587_v9  ;;  %v1918_v57 = vsub.f32 %v1538_v12, %v7272_v13  ;;  %v3298_v63 = vadd.f32 %v3266_v43, %v2962_v3  ;;  %v3203_v42 = vadd.f32 %v7273_v49, %v2967_v26  ;;  %v1315_v61 = vpop.f32.mrf.mxu1  ;;  %v7275_v43 = vld [vmem:[#allocation57_spill] sm:$0xff] }
 0x228   : > { %v2191_v47 = vsub.f32 %v1917_v32, %v6076_v59  ;;  %v1923_v21 = vsub.f32 %v1202_v46, %v7274_v19  ;;  %v1924_v15 = vsub.f32 %v1315_v61, %v7274_v19 }
 0x229   : > { %v2192_v10 = vsub.f32 %v1918_v57, %v6081_v14  ;;  %3476 = vadd.xlane.f32.xlu2 %v3298_v63  ;;  %v4334_v8 = vpop.eup %4333  ;;  %v3235_v18 = vadd.f32 %v3203_v42, %v2968_v48 }
 0x22a   : > { %v2589_v11 = vmul.f32 1.442695, %v2191_v47  ;;  %v2197_v58 = vsub.f32 %v1923_v21, %v6033_v33  ;;  %v4336_v52 = vpop.eup %4335  ;;  %v2198_v13 = vsub.f32 %v1924_v15, %v6063_v31  ;;  %v2969_v20 = vmul.f32 %v4334_v8, %v6164_v27 }
 0x22b   : > { %v2591_v55 = vmul.f32 1.442695, %v2192_v10  ;;  %v2970_v1 = vmul.f32 %v4336_v52, %v6166_v50 }
 0x22c   : > { %v4338_v30 = vpop.eup %4337  ;;  %4341 = vpow2.f32 %v2589_v11  ;;  %v2601_v62 = vmul.f32 1.442695, %v2197_v58  ;;  %v3449_v38 = vpop.xlane.xlu2 %3448  ;;  %v2603_v2 = vmul.f32 1.442695, %v2198_v13  ;;  %v3267_v34 = vadd.f32 %v3235_v18, %v2969_v20 }
 0x22d   : > { %v4340_v16 = vpop.eup %4339  ;;  %4343 = vpow2.f32 %v2591_v55  ;;  %3512 = vst.msk [vmem:[%s6654_s28 + $0x8] sm:$0xff] %vm533_vm1, %v3449_v38  ;;  %v1428_v35 = vpop.f32.mrf.mxu2  ;;  %v2975_v22 = vmul.f32 %v4338_v30, %v6120_v39 }
 0x22e   : > { %4345 = vpow2.f32 %v2601_v62  ;;  %v1925_v41 = vsub.f32 %v1428_v35, %v7274_v19  ;;  %v1541_v4 = vpop.f32.mrf.mxu3  ;;  %v2976_v54 = vmul.f32 %v4340_v16, %v6122_v51  ;;  %v1205_v3 = vpop.f32.mrf.mxu0  ;;  %v3299_v24 = vadd.f32 %v3267_v34, %v2970_v1 }
 0x22f   : > { %4347 = vpow2.f32 %v2603_v2  ;;  %v1926_v28 = vsub.f32 %v1541_v4, %v7274_v19  ;;  %v3204_v9 = vadd.f32 %v6229_v23, %v2975_v22  ;;  %v1931_v26 = vsub.f32 %v1205_v3, %v7275_v43  ;;  %v1318_v32 = vpop.f32.mrf.mxu1  ;;  %v7276_v2 = vld [vmem:[#allocation60_spill] sm:$0xff] }
 0x230   : > { %v2199_v29 = vsub.f32 %v1925_v41, %v6076_v59  ;;  %v1932_v48 = vsub.f32 %v1318_v32, %v7275_v43  ;;  %3478 = vadd.xlane.f32.xlu0 %v3299_v24 }
 0x231   : > { %v2200_v12 = vsub.f32 %v1926_v28, %v6081_v14  ;;  %v2205_v63 = vsub.f32 %v1931_v26, %v6033_v33  ;;  %v3236_v19 = vadd.f32 %v3204_v9, %v2976_v54 }
 0x232   : > { %v4342_v57 = vpop.eup %4341  ;;  %v2605_v46 = vmul.f32 1.442695, %v2199_v29  ;;  %v2206_v47 = vsub.f32 %v1932_v48, %v6063_v31 }
 0x233   : > { %v4344_v49 = vpop.eup %4343  ;;  %v2607_v42 = vmul.f32 1.442695, %v2200_v12  ;;  %v2977_v23 = vmul.f32 %v4342_v57, %v6164_v27  ;;  %v2617_v61 = vmul.f32 1.442695, %v2205_v63 }
 0x234   : > { %v4346_v21 = vpop.eup %4345  ;;  %4349 = vpow2.f32 %v2605_v46  ;;  %v3451_v10 = vpop.xlane.xlu1 %3450  ;;  %v2978_v15 = vmul.f32 %v4344_v49, %v6166_v50  ;;  %v2619_v11 = vmul.f32 1.442695, %v2206_v47 }
 0x235   : > { %v4348_v8 = vpop.eup %4347  ;;  %4351 = vpow2.f32 %v2607_v42  ;;  %3513 = vst.msk [vmem:[%s6654_s28 + $0x10] sm:$0xff] %vm533_vm1, %v3451_v10  ;;  %v1431_v58 = vpop.f32.mrf.mxu2  ;;  %v3268_v52 = vadd.f32 %v3236_v19, %v2977_v23  ;;  %v2983_v55 = vmul.f32 %v4346_v21, %v6120_v39 }
 0x236   : > { %4353 = vpow2.f32 %v2617_v61  ;;  %v1933_v13 = vsub.f32 %v1431_v58, %v7275_v43  ;;  %v1544_v20 = vpop.f32.mrf.mxu3  ;;  %v2984_v18 = vmul.f32 %v4348_v8, %v6122_v51  ;;  %v1208_v62 = vpop.f32.mrf.mxu0  ;;  %v7277_v8 = vld [vmem:[#allocation31_spill] sm:$0xff] }
 0x237   : > { %4355 = vpow2.f32 %v2619_v11  ;;  %v1934_v30 = vsub.f32 %v1544_v20, %v7275_v43  ;;  %v3300_v38 = vadd.f32 %v3268_v52, %v2978_v15  ;;  %v3205_v1 = vadd.f32 %v6271_v36, %v2983_v55  ;;  %v1321_v34 = vpop.f32.mrf.mxu1 }
 0x238   : > { %v2207_v16 = vsub.f32 %v1933_v13, %v6076_v59  ;;  %v1939_v35 = vsub.f32 %v1208_v62, %v7276_v2  ;;  %v1940_v41 = vsub.f32 %v1321_v34, %v7276_v2 }
 0x239   : > { %v2208_v22 = vsub.f32 %v1934_v30, %v6081_v14  ;;  %3480 = vadd.xlane.f32.xlu1 %v3300_v38  ;;  %v3237_v29 = vadd.f32 %v3205_v1, %v2984_v18 }
 0x23a   : > { %v4350_v4 = vpop.eup %4349  ;;  %v2621_v54 = vmul.f32 1.442695, %v2207_v16  ;;  %v2213_v28 = vsub.f32 %v1939_v35, %v6033_v33  ;;  %v2214_v9 = vsub.f32 %v1940_v41, %v6063_v31 }
 0x23b   : > { %v4352_v3 = vpop.eup %4351  ;;  %v2623_v24 = vmul.f32 1.442695, %v2208_v22  ;;  %v2985_v36 = vmul.f32 %v4350_v4, %v6164_v27 }
 0x23c   : > { %v4354_v43 = vpop.eup %4353  ;;  %4357 = vpow2.f32 %v2621_v54  ;;  %v2633_v26 = vmul.f32 1.442695, %v2213_v28  ;;  %v3453_v32 = vpop.xlane.xlu2 %3452  ;;  %v2986_v12 = vmul.f32 %v4352_v3, %v6166_v50  ;;  %v2635_v57 = vmul.f32 1.442695, %v2214_v9 }
 0x23d   : > { %v4356_v48 = vpop.eup %4355  ;;  %4359 = vpow2.f32 %v2623_v24  ;;  %3514 = vst.msk [vmem:[%s6654_s28 + $0x18] sm:$0xff] %vm533_vm1, %v3453_v32  ;;  %v1434_v46 = vpop.f32.mrf.mxu2  ;;  %v3269_v63 = vadd.f32 %v3237_v29, %v2985_v36  ;;  %v2991_v49 = vmul.f32 %v4354_v43, %v6120_v39 }
 0x23e   : > { %4361 = vpow2.f32 %v2633_v26  ;;  %v1941_v42 = vsub.f32 %v1434_v46, %v7276_v2  ;;  %v1547_v47 = vpop.f32.mrf.mxu3  ;;  %v2992_v23 = vmul.f32 %v4356_v48, %v6122_v51  ;;  %v1211_v21 = vpop.f32.mrf.mxu0 }
 0x23f   : > { %4363 = vpow2.f32 %v2635_v57  ;;  %v1942_v19 = vsub.f32 %v1547_v47, %v7276_v2  ;;  %v3301_v61 = vadd.f32 %v3269_v63, %v2986_v12  ;;  %v3206_v10 = vadd.f32 %v6298_v37, %v2991_v49  ;;  %v1324_v58 = vpop.f32.mrf.mxu1  ;;  %v7278_v12 = vld [vmem:[#allocation61_spill] sm:$0xff] }
 0x240   : > { %v2215_v15 = vsub.f32 %v1941_v42, %v6076_v59  ;;  %v1947_v11 = vsub.f32 %v1211_v21, %v7277_v8  ;;  %v1948_v55 = vsub.f32 %v1324_v58, %v7277_v8 }
 0x241   : > { %v2216_v52 = vsub.f32 %v1942_v19, %v6081_v14  ;;  %3482 = vadd.xlane.f32.xlu2 %v3301_v61  ;;  %v3238_v1 = vadd.f32 %v3206_v10, %v2992_v23 }
 0x242   : > { %v4358_v13 = vpop.eup %4357  ;;  %v2637_v20 = vmul.f32 1.442695, %v2215_v15  ;;  %v2221_v18 = vsub.f32 %v1947_v11, %v6033_v33  ;;  %v2222_v38 = vsub.f32 %v1948_v55, %v6063_v31 }
 0x243   : > { %v4360_v30 = vpop.eup %4359  ;;  %v2639_v62 = vmul.f32 1.442695, %v2216_v52  ;;  %v2993_v37 = vmul.f32 %v4358_v13, %v6164_v27 }
 0x244   : > { %v4362_v16 = vpop.eup %4361  ;;  %4365 = vpow2.f32 %v2637_v20  ;;  %v2649_v2 = vmul.f32 1.442695, %v2221_v18  ;;  %v3455_v35 = vpop.xlane.xlu0 %3454  ;;  %v2994_v34 = vmul.f32 %v4360_v30, %v6166_v50  ;;  %v2651_v41 = vmul.f32 1.442695, %v2222_v38 }
 0x245   : > { %v4364_v22 = vpop.eup %4363  ;;  %4367 = vpow2.f32 %v2639_v62  ;;  %3515 = vst.msk [vmem:[%s6654_s28 + $0x20] sm:$0xff] %vm533_vm1, %v3455_v35  ;;  %v1437_v4 = vpop.f32.mrf.mxu2  ;;  %v3270_v54 = vadd.f32 %v3238_v1, %v2993_v37  ;;  %v2999_v28 = vmul.f32 %v4362_v16, %v6120_v39 }
 0x246   : > { %4369 = vpow2.f32 %v2649_v2  ;;  %v1949_v3 = vsub.f32 %v1437_v4, %v7277_v8  ;;  %v1550_v24 = vpop.f32.mrf.mxu3  ;;  %v1214_v36 = vpop.f32.mrf.mxu0  ;;  %v3000_v43 = vmul.f32 %v4364_v22, %v6122_v51  ;;  %v7279_v2 = vld [vmem:[#allocation62_spill] sm:$0xff] }
 0x247   : > { %v1950_v9 = vsub.f32 %v1550_v24, %v7277_v8  ;;  %v3302_v29 = vadd.f32 %v3270_v54, %v2994_v34  ;;  %v3207_v26 = vadd.f32 %v6345_v0, %v2999_v28  ;;  %4371 = vpow2.f32 %v2651_v41  ;;  %v1327_v57 = vpop.f32.mrf.mxu1 }
 0x248   : > { %v2223_v32 = vsub.f32 %v1949_v3, %v6076_v59  ;;  %v1955_v48 = vsub.f32 %v1214_v36, %v7278_v12  ;;  %v1956_v63 = vsub.f32 %v1327_v57, %v7278_v12 }
 0x249   : > { %v2224_v46 = vsub.f32 %v1950_v9, %v6081_v14  ;;  %3484 = vadd.xlane.f32.xlu0 %v3302_v29  ;;  %v3239_v61 = vadd.f32 %v3207_v26, %v3000_v43 }
 0x24a   : > { %v4366_v49 = vpop.eup %4365  ;;  %v2653_v42 = vmul.f32 1.442695, %v2223_v32  ;;  %v2229_v47 = vsub.f32 %v1955_v48, %v6033_v33  ;;  %v2230_v0 = vsub.f32 %v1956_v63, %v6063_v31 }
 0x24b   : > { %v4368_v23 = vpop.eup %4367  ;;  %v2655_v19 = vmul.f32 1.442695, %v2224_v46  ;;  %v3001_v21 = vmul.f32 %v4366_v49, %v6164_v27 }
 0x24c   : > { %v4370_v10 = vpop.eup %4369  ;;  %4373 = vpow2.f32 %v2653_v42  ;;  %v2665_v15 = vmul.f32 1.442695, %v2229_v47  ;;  %v3457_v8 = vpop.xlane.xlu1 %3456  ;;  %v3002_v11 = vmul.f32 %v4368_v23, %v6166_v50  ;;  %v2667_v58 = vmul.f32 1.442695, %v2230_v0 }
 0x24d   : > { %4375 = vpow2.f32 %v2655_v19  ;;  %3516 = vst.msk [vmem:[%s6654_s28 + $0x28] sm:$0xff] %vm533_vm1, %v3457_v8  ;;  %v1440_v52 = vpop.f32.mrf.mxu2  ;;  %v3271_v55 = vadd.f32 %v3239_v61, %v3001_v21  ;;  %v3007_v13 = vmul.f32 %v4370_v10, %v6120_v39  ;;  %v4372_v20 = vpop.eup %4371  ;;  %v7280_v10 = vld [vmem:[#allocation65_spill] sm:$0xff] }
 0x24e   : > { %4377 = vpow2.f32 %v2665_v15  ;;  %v1957_v18 = vsub.f32 %v1440_v52, %v7278_v12  ;;  %v1553_v30 = vpop.f32.mrf.mxu3  ;;  %v1217_v38 = vpop.f32.mrf.mxu0  ;;  %v3008_v4 = vmul.f32 %v4372_v20, %v6122_v51 }
 0x24f   : > { %v1958_v62 = vsub.f32 %v1553_v30, %v7278_v12  ;;  %v3303_v37 = vadd.f32 %v3271_v55, %v3002_v11  ;;  %v3208_v1 = vadd.f32 %v6362_v60, %v3007_v13  ;;  %4379 = vpow2.f32 %v2667_v58  ;;  %v1330_v34 = vpop.f32.mrf.mxu1 }
 0x250   : > { %v2231_v16 = vsub.f32 %v1957_v18, %v6076_v59  ;;  %v1963_v35 = vsub.f32 %v1217_v38, %v7279_v2  ;;  %v1964_v41 = vsub.f32 %v1330_v34, %v7279_v2 }
 0x251   : > { %v2232_v22 = vsub.f32 %v1958_v62, %v6081_v14  ;;  %3486 = vadd.xlane.f32.xlu1 %v3303_v37  ;;  %v3240_v29 = vadd.f32 %v3208_v1, %v3008_v4 }
 0x252   : > { %v4374_v54 = vpop.eup %4373  ;;  %v2669_v28 = vmul.f32 1.442695, %v2231_v16  ;;  %v2237_v3 = vsub.f32 %v1963_v35, %v6033_v33  ;;  %v2238_v9 = vsub.f32 %v1964_v41, %v6063_v31 }
 0x253   : > { %v4376_v24 = vpop.eup %4375  ;;  %v2671_v60 = vmul.f32 1.442695, %v2232_v22  ;;  %v3009_v36 = vmul.f32 %v4374_v54, %v6164_v27 }
 0x254   : > { %v4378_v43 = vpop.eup %4377  ;;  %4381 = vpow2.f32 %v2669_v28  ;;  %v2681_v26 = vmul.f32 1.442695, %v2237_v3  ;;  %v3459_v32 = vpop.xlane.xlu2 %3458  ;;  %v3010_v12 = vmul.f32 %v4376_v24, %v6166_v50  ;;  %v2683_v48 = vmul.f32 1.442695, %v2238_v9 }
 0x255   : > { %4383 = vpow2.f32 %v2671_v60  ;;  %3517 = vst.msk [vmem:[%s6654_s28 + $0x30] sm:$0xff] %vm533_vm1, %v3459_v32  ;;  %v1443_v57 = vpop.f32.mrf.mxu2  ;;  %v3272_v46 = vadd.f32 %v3240_v29, %v3009_v36  ;;  %v3015_v63 = vmul.f32 %v4378_v43, %v6120_v39  ;;  %v4380_v49 = vpop.eup %4379  ;;  %v7281_v29 = vld [vmem:[#allocation11_spill] sm:$0xff] }
 0x256   : > { %4385 = vpow2.f32 %v2681_v26  ;;  %v1965_v42 = vsub.f32 %v1443_v57, %v7279_v2  ;;  %v1556_v47 = vpop.f32.mrf.mxu3  ;;  %v1220_v19 = vpop.f32.mrf.mxu0  ;;  %v3016_v52 = vmul.f32 %v4380_v49, %v6122_v51 }
 0x257   : > { %v1966_v23 = vsub.f32 %v1556_v47, %v7279_v2  ;;  %v3304_v0 = vadd.f32 %v3272_v46, %v3010_v12  ;;  %v3209_v21 = vadd.f32 %v6389_v7, %v3015_v63  ;;  %4387 = vpow2.f32 %v2683_v48  ;;  %v1333_v8 = vpop.f32.mrf.mxu1 }
 0x258   : > { %v2239_v61 = vsub.f32 %v1965_v42, %v6076_v59  ;;  %v1971_v15 = vsub.f32 %v1220_v19, %v7280_v10  ;;  %v1972_v58 = vsub.f32 %v1333_v8, %v7280_v10 }
 0x259   : > { %v2240_v11 = vsub.f32 %v1966_v23, %v6081_v14  ;;  %3488 = vadd.xlane.f32.xlu2 %v3304_v0  ;;  %v3241_v38 = vadd.f32 %v3209_v21, %v3016_v52 }
 0x25a   : > { %v4382_v55 = vpop.eup %4381  ;;  %v2685_v13 = vmul.f32 1.442695, %v2239_v61  ;;  %v2245_v20 = vsub.f32 %v1971_v15, %v6033_v33  ;;  %v2246_v30 = vsub.f32 %v1972_v58, %v6063_v31 }
 0x25b   : > { %v4384_v18 = vpop.eup %4383  ;;  %v2687_v7 = vmul.f32 1.442695, %v2240_v11  ;;  %v3017_v62 = vmul.f32 %v4382_v55, %v6164_v27 }
 0x25c   : > { %v4386_v37 = vpop.eup %4385  ;;  %4389 = vpow2.f32 %v2685_v13  ;;  %v2697_v1 = vmul.f32 1.442695, %v2245_v20  ;;  %v3461_v16 = vpop.xlane.xlu0 %3460  ;;  %v3018_v2 = vmul.f32 %v4384_v18, %v6166_v50  ;;  %v2699_v35 = vmul.f32 1.442695, %v2246_v30 }
 0x25d   : > { %4391 = vpow2.f32 %v2687_v7  ;;  %3518 = vst.msk [vmem:[%s6654_s28 + $0x38] sm:$0xff] %vm533_vm1, %v3461_v16  ;;  %v1446_v34 = vpop.f32.mrf.mxu2  ;;  %v3273_v22 = vadd.f32 %v3241_v38, %v3017_v62  ;;  %v3023_v41 = vmul.f32 %v4386_v37, %v6120_v39  ;;  %v4388_v4 = vpop.eup %4387  ;;  %v7282_v62 = vld [vmem:[#allocation68_spill] sm:$0xff] }
 0x25e   : > { %4393 = vpow2.f32 %v2697_v1  ;;  %v1973_v54 = vsub.f32 %v1446_v34, %v7280_v10  ;;  %v1559_v28 = vpop.f32.mrf.mxu3  ;;  %v1223_v24 = vpop.f32.mrf.mxu0  ;;  %v3024_v48 = vmul.f32 %v4388_v4, %v6122_v51 }
 0x25f   : > { %v1974_v3 = vsub.f32 %v1559_v28, %v7280_v10  ;;  %v3305_v60 = vadd.f32 %v3273_v22, %v3018_v2  ;;  %v3210_v9 = vadd.f32 %v6416_v25, %v3023_v41  ;;  %4395 = vpow2.f32 %v2699_v35  ;;  %v1336_v26 = vpop.f32.mrf.mxu1 }
 0x260   : > { %v2247_v36 = vsub.f32 %v1973_v54, %v6076_v59  ;;  %v1979_v43 = vsub.f32 %v1223_v24, %v7281_v29  ;;  %v1980_v12 = vsub.f32 %v1336_v26, %v7281_v29 }
 0x261   : > { %v2248_v32 = vsub.f32 %v1974_v3, %v6081_v14  ;;  %3490 = vadd.xlane.f32.xlu0 %v3305_v60  ;;  %v3242_v23 = vadd.f32 %v3210_v9, %v3024_v48 }
 0x262   : > { %v4390_v57 = vpop.eup %4389  ;;  %v2701_v46 = vmul.f32 1.442695, %v2247_v36  ;;  %v2253_v63 = vsub.f32 %v1979_v43, %v6033_v33  ;;  %v2254_v42 = vsub.f32 %v1980_v12, %v6063_v31 }
 0x263   : > { %v4392_v49 = vpop.eup %4391  ;;  %v2703_v25 = vmul.f32 1.442695, %v2248_v32  ;;  %v3025_v47 = vmul.f32 %v4390_v57, %v6164_v27 }
 0x264   : > { %v4394_v19 = vpop.eup %4393  ;;  %4397 = vpow2.f32 %v2701_v46  ;;  %v2713_v0 = vmul.f32 1.442695, %v2253_v63  ;;  %v3463_v21 = vpop.xlane.xlu1 %3462  ;;  %v3026_v61 = vmul.f32 %v4392_v49, %v6166_v50  ;;  %v2715_v10 = vmul.f32 1.442695, %v2254_v42  ;;  %v7283_v42 = vld [vmem:[#allocation44_spill] sm:$0xff] }
 0x265   : > { %4399 = vpow2.f32 %v2703_v25  ;;  %3519 = vst.msk [vmem:[%s6654_s28 + $0x40] sm:$0xff] %vm533_vm1, %v3463_v21  ;;  %v1449_v15 = vpop.f32.mrf.mxu2  ;;  %v3274_v8 = vadd.f32 %v3242_v23, %v3025_v47  ;;  %v3031_v11 = vmul.f32 %v4394_v19, %v6120_v39  ;;  %v4396_v58 = vpop.eup %4395 }
 0x266   : > { %4401 = vpow2.f32 %v2713_v0  ;;  %v1981_v52 = vsub.f32 %v1449_v15, %v7281_v29  ;;  %v1562_v55 = vpop.f32.mrf.mxu3  ;;  %v1226_v20 = vpop.f32.mrf.mxu0  ;;  %v3032_v2 = vmul.f32 %v4396_v58, %v6122_v51 }
 0x267   : > { %v1982_v13 = vsub.f32 %v1562_v55, %v7281_v29  ;;  %v3306_v18 = vadd.f32 %v3274_v8, %v3026_v61  ;;  %v3211_v7 = vadd.f32 %v6443_v44, %v3031_v11  ;;  %4403 = vpow2.f32 %v2715_v10  ;;  %v1339_v37 = vpop.f32.mrf.mxu1 }
 0x268   : > { %v2255_v30 = vsub.f32 %v1981_v52, %v6076_v59  ;;  %v1987_v38 = vsub.f32 %v1226_v20, %v7282_v62  ;;  %v1988_v16 = vsub.f32 %v1339_v37, %v7282_v62 }
 0x269   : > { %v2256_v1 = vsub.f32 %v1982_v13, %v6081_v14  ;;  %3492 = vadd.xlane.f32.xlu1 %v3306_v18  ;;  %v3243_v28 = vadd.f32 %v3211_v7, %v3032_v2 }
 0x26a   : > { %v4398_v35 = vpop.eup %4397  ;;  %v2717_v34 = vmul.f32 1.442695, %v2255_v30  ;;  %v2261_v22 = vsub.f32 %v1987_v38, %v6033_v33  ;;  %v2262_v4 = vsub.f32 %v1988_v16, %v6063_v31 }
 0x26b   : > { %v4400_v41 = vpop.eup %4399  ;;  %v2719_v44 = vmul.f32 1.442695, %v2256_v1  ;;  %v3033_v54 = vmul.f32 %v4398_v35, %v6164_v27 }
 0x26c   : > { %v4402_v3 = vpop.eup %4401  ;;  %4405 = vpow2.f32 %v2717_v34  ;;  %v2729_v24 = vmul.f32 1.442695, %v2261_v22  ;;  %v3465_v60 = vpop.xlane.xlu2 %3464  ;;  %v3034_v9 = vmul.f32 %v4400_v41, %v6166_v50  ;;  %v2731_v36 = vmul.f32 1.442695, %v2262_v4 }
 0x26d   : > { %4407 = vpow2.f32 %v2719_v44  ;;  %3520 = vst.msk [vmem:[%s6654_s28 + $0x48] sm:$0xff] %vm533_vm1, %v3465_v60  ;;  %v1452_v29 = vpop.f32.mrf.mxu2  ;;  %v3275_v43 = vadd.f32 %v3243_v28, %v3033_v54  ;;  %v3039_v26 = vmul.f32 %v4402_v3, %v6120_v39  ;;  %v4404_v32 = vpop.eup %4403  ;;  %v7284_v44 = vld [vmem:[#allocation69_spill] sm:$0xff] }
 0x26e   : > { %4409 = vpow2.f32 %v2729_v24  ;;  %v1989_v12 = vsub.f32 %v1452_v29, %v7282_v62  ;;  %v1565_v48 = vpop.f32.mrf.mxu3  ;;  %v1229_v46 = vpop.f32.mrf.mxu0  ;;  %v3040_v21 = vmul.f32 %v4404_v32, %v6122_v51 }
 0x26f   : > { %v1990_v57 = vsub.f32 %v1565_v48, %v7282_v62  ;;  %v3307_v63 = vadd.f32 %v3275_v43, %v3034_v9  ;;  %v3212_v49 = vadd.f32 %v6470_v5, %v3039_v26  ;;  %4411 = vpow2.f32 %v2731_v36  ;;  %v1342_v23 = vpop.f32.mrf.mxu1 }
 0x270   : > { %v2263_v25 = vsub.f32 %v1989_v12, %v6076_v59  ;;  %v1995_v47 = vsub.f32 %v1229_v46, %v7283_v42  ;;  %v1996_v0 = vsub.f32 %v1342_v23, %v7283_v42 }
 0x271   : > { %v2264_v19 = vsub.f32 %v1990_v57, %v6081_v14  ;;  %3494 = vadd.xlane.f32.xlu2 %v3307_v63  ;;  %v3244_v52 = vadd.f32 %v3212_v49, %v3040_v21 }
 0x272   : > { %v4406_v61 = vpop.eup %4405  ;;  %v2733_v10 = vmul.f32 1.442695, %v2263_v25  ;;  %v2269_v15 = vsub.f32 %v1995_v47, %v6033_v33  ;;  %v2270_v11 = vsub.f32 %v1996_v0, %v6063_v31 }
 0x273   : > { %v4408_v8 = vpop.eup %4407  ;;  %v2735_v5 = vmul.f32 1.442695, %v2264_v19  ;;  %v3041_v58 = vmul.f32 %v4406_v61, %v6164_v27 }
 0x274   : > { %v4410_v55 = vpop.eup %4409  ;;  %4413 = vpow2.f32 %v2733_v10  ;;  %v2745_v13 = vmul.f32 1.442695, %v2269_v15  ;;  %v3467_v20 = vpop.xlane.xlu0 %3466  ;;  %v3042_v18 = vmul.f32 %v4408_v8, %v6166_v50  ;;  %v2747_v7 = vmul.f32 1.442695, %v2270_v11  ;;  %v7285_v8 = vld [vmem:[#allocation33_spill] sm:$0xff] }
 0x275   : > { %4415 = vpow2.f32 %v2735_v5  ;;  %3521 = vst.msk [vmem:[%s6654_s28 + $0x50] sm:$0xff] %vm533_vm1, %v3467_v20  ;;  %v1455_v30 = vpop.f32.mrf.mxu2  ;;  %v3276_v62 = vadd.f32 %v3244_v52, %v3041_v58  ;;  %v3047_v38 = vmul.f32 %v4410_v55, %v6120_v39  ;;  %v4412_v37 = vpop.eup %4411 }
 0x276   : > { %4417 = vpow2.f32 %v2745_v13  ;;  %v1997_v1 = vsub.f32 %v1455_v30, %v7283_v42  ;;  %v1568_v16 = vpop.f32.mrf.mxu3  ;;  %v1232_v35 = vpop.f32.mrf.mxu0  ;;  %v3048_v24 = vmul.f32 %v4412_v37, %v6122_v51 }
 0x277   : > { %v1998_v2 = vsub.f32 %v1568_v16, %v7283_v42  ;;  %v3308_v34 = vadd.f32 %v3276_v62, %v3042_v18  ;;  %v3213_v22 = vadd.f32 %v6497_v6, %v3047_v38  ;;  %4419 = vpow2.f32 %v2747_v7  ;;  %v1345_v54 = vpop.f32.mrf.mxu1 }
 0x278   : > { %v2271_v41 = vsub.f32 %v1997_v1, %v6076_v59  ;;  %v2003_v4 = vsub.f32 %v1232_v35, %v7284_v44  ;;  %v2004_v3 = vsub.f32 %v1345_v54, %v7284_v44 }
 0x279   : > { %v2272_v28 = vsub.f32 %v1998_v2, %v6081_v14  ;;  %3496 = vadd.xlane.f32.xlu0 %v3308_v34  ;;  %v3245_v32 = vadd.f32 %v3213_v22, %v3048_v24 }
 0x27a   : > { %v4414_v60 = vpop.eup %4413  ;;  %v2749_v9 = vmul.f32 1.442695, %v2271_v41  ;;  %v2277_v36 = vsub.f32 %v2003_v4, %v6033_v33  ;;  %v2278_v43 = vsub.f32 %v2004_v3, %v6063_v31 }
 0x27b   : > { %v4416_v29 = vpop.eup %4415  ;;  %v2751_v6 = vmul.f32 1.442695, %v2272_v28  ;;  %v3049_v26 = vmul.f32 %v4414_v60, %v6164_v27 }
 0x27c   : > { %v4418_v12 = vpop.eup %4417  ;;  %4421 = vpow2.f32 %v2749_v9  ;;  %v2761_v48 = vmul.f32 1.442695, %v2277_v36  ;;  %v3469_v57 = vpop.xlane.xlu1 %3468  ;;  %v3050_v46 = vmul.f32 %v4416_v29, %v6166_v50  ;;  %v2763_v63 = vmul.f32 1.442695, %v2278_v43  ;;  %v7286_v36 = vld [vmem:[#allocation72_spill] sm:$0xff] }
 0x27d   : > { %4423 = vpow2.f32 %v2751_v6  ;;  %3522 = vst.msk [vmem:[%s6654_s28 + $0x58] sm:$0xff] %vm533_vm1, %v3469_v57  ;;  %v1458_v49 = vpop.f32.mrf.mxu2  ;;  %v3277_v25 = vadd.f32 %v3245_v32, %v3049_v26  ;;  %v3055_v42 = vmul.f32 %v4418_v12, %v6120_v39  ;;  %v4420_v47 = vpop.eup %4419 }
 0x27e   : > { %4425 = vpow2.f32 %v2761_v48  ;;  %v2005_v23 = vsub.f32 %v1458_v49, %v7284_v44  ;;  %v1571_v19 = vpop.f32.mrf.mxu3  ;;  %v1235_v21 = vpop.f32.mrf.mxu0  ;;  %v3056_v55 = vmul.f32 %v4420_v47, %v6122_v51 }
 0x27f   : > { %v2006_v0 = vsub.f32 %v1571_v19, %v7284_v44  ;;  %v3309_v61 = vadd.f32 %v3277_v25, %v3050_v46  ;;  %v3214_v10 = vadd.f32 %v6524_v53, %v3055_v42  ;;  %4427 = vpow2.f32 %v2763_v63  ;;  %v1348_v11 = vpop.f32.mrf.mxu1 }
 0x280   : > { %v2279_v15 = vsub.f32 %v2005_v23, %v6076_v59  ;;  %v2011_v5 = vsub.f32 %v1235_v21, %v7285_v8  ;;  %v2012_v52 = vsub.f32 %v1348_v11, %v7285_v8 }
 0x281   : > { %v2280_v58 = vsub.f32 %v2006_v0, %v6081_v14  ;;  %3498 = vadd.xlane.f32.xlu1 %v3309_v61  ;;  %v3246_v38 = vadd.f32 %v3214_v10, %v3056_v55 }
 0x282   : > { %v4422_v13 = vpop.eup %4421  ;;  %v2765_v20 = vmul.f32 1.442695, %v2279_v15  ;;  %v2285_v18 = vsub.f32 %v2011_v5, %v6033_v33  ;;  %v2286_v30 = vsub.f32 %v2012_v52, %v6063_v31 }
 0x283   : > { %v4424_v7 = vpop.eup %4423  ;;  %v2767_v53 = vmul.f32 1.442695, %v2280_v58  ;;  %v3057_v62 = vmul.f32 %v4422_v13, %v6164_v27 }
 0x284   : > { %v4426_v37 = vpop.eup %4425  ;;  %4429 = vpow2.f32 %v2765_v20  ;;  %v2777_v1 = vmul.f32 1.442695, %v2285_v18  ;;  %v3471_v16 = vpop.xlane.xlu2 %3470  ;;  %v3058_v2 = vmul.f32 %v4424_v7, %v6166_v50  ;;  %v2779_v35 = vmul.f32 1.442695, %v2286_v30  ;;  %v7287_v20 = vld [vmem:[#allocation78_spill] sm:$0xff] }
 0x285   : > { %4431 = vpow2.f32 %v2767_v53  ;;  %3523 = vst.msk [vmem:[%s6654_s28 + $0x60] sm:$0xff] %vm533_vm1, %v3471_v16  ;;  %v1461_v34 = vpop.f32.mrf.mxu2  ;;  %v3278_v22 = vadd.f32 %v3246_v38, %v3057_v62  ;;  %v3063_v41 = vmul.f32 %v4426_v37, %v6120_v39  ;;  %v4428_v44 = vpop.eup %4427 }
 0x286   : > { %4433 = vpow2.f32 %v2777_v1  ;;  %v2013_v4 = vsub.f32 %v1461_v34, %v7285_v8  ;;  %v1574_v54 = vpop.f32.mrf.mxu3  ;;  %v1238_v3 = vpop.f32.mrf.mxu0  ;;  %v3064_v32 = vmul.f32 %v4428_v44, %v6122_v51 }
 0x287   : > { %v2014_v28 = vsub.f32 %v1574_v54, %v7285_v8  ;;  %v3310_v24 = vadd.f32 %v3278_v22, %v3058_v2  ;;  %v3215_v60 = vadd.f32 %v6551_v17, %v3063_v41  ;;  %4435 = vpow2.f32 %v2779_v35  ;;  %v1351_v6 = vpop.f32.mrf.mxu1 }
 0x288   : > { %v2287_v9 = vsub.f32 %v2013_v4, %v6076_v59  ;;  %v2019_v29 = vsub.f32 %v1238_v3, %v7286_v36  ;;  %v2020_v26 = vsub.f32 %v1351_v6, %v7286_v36 }
 0x289   : > { %v2288_v43 = vsub.f32 %v2014_v28, %v6081_v14  ;;  %3500 = vadd.xlane.f32.xlu2 %v3310_v24  ;;  %v3247_v25 = vadd.f32 %v3215_v60, %v3064_v32 }
 0x28a   : > { %v4430_v12 = vpop.eup %4429  ;;  %v2781_v48 = vmul.f32 1.442695, %v2287_v9  ;;  %v2293_v57 = vsub.f32 %v2019_v29, %v6033_v33  ;;  %v2294_v63 = vsub.f32 %v2020_v26, %v6063_v31 }
 0x28b   : > { %v4432_v46 = vpop.eup %4431  ;;  %v2783_v17 = vmul.f32 1.442695, %v2288_v43  ;;  %v3065_v49 = vmul.f32 %v4430_v12, %v6164_v27 }
 0x28c   : > { %v4434_v42 = vpop.eup %4433  ;;  %4437 = vpow2.f32 %v2781_v48  ;;  %v2793_v47 = vmul.f32 1.442695, %v2293_v57  ;;  %v3473_v23 = vpop.xlane.xlu0 %3472  ;;  %v3066_v19 = vmul.f32 %v4432_v46, %v6166_v50  ;;  %v2795_v0 = vmul.f32 1.442695, %v2294_v63 }
 0x28d   : > { %4439 = vpow2.f32 %v2783_v17  ;;  %3524 = vst.msk [vmem:[%s6654_s28 + $0x68] sm:$0xff] %vm533_vm1, %v3473_v23  ;;  %v1464_v21 = vpop.f32.mrf.mxu2  ;;  %v3279_v61 = vadd.f32 %v3247_v25, %v3065_v49  ;;  %v3071_v10 = vmul.f32 %v4434_v42, %v6120_v39  ;;  %v4436_v15 = vpop.eup %4435 }
 0x28e   : > { %4441 = vpow2.f32 %v2793_v47  ;;  %v2021_v8 = vsub.f32 %v1464_v21, %v7286_v36  ;;  %v1577_v5 = vpop.f32.mrf.mxu3  ;;  %v1241_v58 = vpop.f32.mrf.mxu0  ;;  %v3072_v62 = vmul.f32 %v4436_v15, %v6122_v51 }
 0x28f   : > { %v2022_v11 = vsub.f32 %v1577_v5, %v7286_v36  ;;  %v3311_v52 = vadd.f32 %v3279_v61, %v3066_v19  ;;  %v3216_v55 = vadd.f32 %v6578_v56, %v3071_v10  ;;  %4443 = vpow2.f32 %v2795_v0  ;;  %v1354_v7 = vpop.f32.mrf.mxu1 }
 0x290   : > { %v2295_v13 = vsub.f32 %v2021_v8, %v6076_v59  ;;  %v2027_v18 = vsub.f32 %v1241_v58, %v7287_v20  ;;  %v2028_v30 = vsub.f32 %v1354_v7, %v7287_v20 }
 0x291   : > { %v2296_v53 = vsub.f32 %v2022_v11, %v6081_v14  ;;  %3502 = vadd.xlane.f32.xlu0 %v3311_v52  ;;  %v3248_v34 = vadd.f32 %v3216_v55, %v3072_v62 }
 0x292   : > { %v4438_v38 = vpop.eup %4437  ;;  %v2797_v37 = vmul.f32 1.442695, %v2295_v13  ;;  %v2301_v1 = vsub.f32 %v2027_v18, %v6033_v33  ;;  %v2302_v2 = vsub.f32 %v2028_v30, %v6063_v31 }
 0x293   : > { %v4440_v16 = vpop.eup %4439  ;;  %v2799_v56 = vmul.f32 1.442695, %v2296_v53  ;;  %v3073_v35 = vmul.f32 %v4438_v38, %v6164_v27 }
 0x294   : > { %v4442_v22 = vpop.eup %4441  ;;  %4445 = vpow2.f32 %v2797_v37  ;;  %v2809_v41 = vmul.f32 1.442695, %v2301_v1  ;;  %v3475_v44 = vpop.xlane.xlu1 %3474  ;;  %v3074_v4 = vmul.f32 %v4440_v16, %v6166_v50  ;;  %v2811_v54 = vmul.f32 1.442695, %v2302_v2 }
 0x295   : > { %4447 = vpow2.f32 %v2799_v56  ;;  %3525 = vst.msk [vmem:[%s6654_s28 + $0x70] sm:$0xff] %vm533_vm1, %v3475_v44  ;;  %v1467_v28 = vpop.f32.mrf.mxu2  ;;  %v3280_v3 = vadd.f32 %v3248_v34, %v3073_v35  ;;  %v3079_v33 = vmul.f32 %v4442_v22, %v6120_v39  ;;  %v4444_v24 = vpop.eup %4443 }
 0x296   : > { %4449 = vpow2.f32 %v2809_v41  ;;  %v2029_v31 = vsub.f32 %v1467_v28, %v7287_v20  ;;  %v1580_v60 = vpop.f32.mrf.mxu3  ;;  %v3080_v26 = vmul.f32 %v4444_v24, %v6122_v51 }
 0x297   : > { %v2030_v9 = vsub.f32 %v1580_v60, %v7287_v20  ;;  %v3312_v36 = vadd.f32 %v3280_v3, %v3074_v4  ;;  %v3217_v29 = vadd.f32 %v6605_v40, %v3079_v33  ;;  %4451 = vpow2.f32 %v2811_v54 }
 0x298   : > { %v2303_v6 = vsub.f32 %v2029_v31, %v6076_v59 }
 0x299   : > { %v2304_v43 = vsub.f32 %v2030_v9, %v6081_v14  ;;  %3504 = vadd.xlane.f32.xlu1 %v3312_v36  ;;  %v3249_v17 = vadd.f32 %v3217_v29, %v3080_v26 }
 0x29a   : > { %v4446_v32 = vpop.eup %4445  ;;  %v2813_v12 = vmul.f32 1.442695, %v2303_v6 }
 0x29b   : > { %v4448_v48 = vpop.eup %4447  ;;  %v2815_v57 = vmul.f32 1.442695, %v2304_v43  ;;  %v3081_v46 = vmul.f32 %v4446_v32, %v6164_v27 }
 0x29c   : > { %v4450_v63 = vpop.eup %4449  ;;  %4453 = vpow2.f32 %v2813_v12  ;;  %v3477_v49 = vpop.xlane.xlu2 %3476  ;;  %v3082_v59 = vmul.f32 %v4448_v48, %v6166_v50 }
 0x29d   : > { %4455 = vpow2.f32 %v2815_v57  ;;  %3526 = vst.msk [vmem:[%s6654_s28 + $0x78] sm:$0xff] %vm533_vm1, %v3477_v49  ;;  %v3281_v14 = vadd.f32 %v3249_v17, %v3081_v46  ;;  %v3087_v40 = vmul.f32 %v4450_v63, %v6120_v39  ;;  %v4452_v25 = vpop.eup %4451 }
 0x29e   : > { %v3088_v23 = vmul.f32 %v4452_v25, %v6122_v51 }
 0x29f   : > { %v3313_v42 = vadd.f32 %v3281_v14, %v3082_v59  ;;  %v3218_v47 = vadd.f32 %v6631_v45, %v3087_v40 }
 0x2a1   : > { %3506 = vadd.xlane.f32.xlu2 %v3313_v42  ;;  %v3250_v61 = vadd.f32 %v3218_v47, %v3088_v23 }
 0x2a2   : > { %v4454_v19 = vpop.eup %4453 }
 0x2a3   : > { %v4456_v0 = vpop.eup %4455  ;;  %v3089_v21 = vmul.f32 %v4454_v19, %v6164_v27  ;;  %v3479_v10 = vpop.xlane.xlu0 %3478 }
 0x2a4   : > { %3527 = vst.msk [vmem:[%s6654_s28 + $0x80] sm:$0xff] %vm533_vm1, %v3479_v10  ;;  %v3090_v39 = vmul.f32 %v4456_v0, %v6166_v50 }
 0x2a5   : > { %v3282_v15 = vadd.f32 %v3250_v61, %v3089_v21 }
 0x2a7   : > { %v3314_v45 = vadd.f32 %v3282_v15, %v3090_v39 }
 0x2a9   : > { %3508 = vadd.xlane.f32.xlu0 %v3314_v45 }
 0x2ac   : > { %v3481_v51 = vpop.xlane.xlu1 %3480 }
 0x2ad   : > { %3528 = vst.msk [vmem:[%s6654_s28 + $0x88] sm:$0xff] %vm533_vm1, %v3481_v51 }
 0x2b4   : > { %v3483_v8 = vpop.xlane.xlu2 %3482 }
 0x2b5   : > { %3529 = vst.msk [vmem:[%s6654_s28 + $0x90] sm:$0xff] %vm533_vm1, %v3483_v8 }
 0x2bc   : > { %v3485_v27 = vpop.xlane.xlu0 %3484 }
 0x2bd   : > { %3530 = vst.msk [vmem:[%s6654_s28 + $0x98] sm:$0xff] %vm533_vm1, %v3485_v27 }
 0x2c4   : > { %v3487_v5 = vpop.xlane.xlu1 %3486 }
 0x2c5   : > { %3531 = vst.msk [vmem:[%s6654_s28 + $0xa0] sm:$0xff] %vm533_vm1, %v3487_v5 }
 0x2cc   : > { %v3489_v50 = vpop.xlane.xlu2 %3488 }
 0x2cd   : > { %3532 = vst.msk [vmem:[%s6654_s28 + $0xa8] sm:$0xff] %vm533_vm1, %v3489_v50 }
 0x2d4   : > { %v3491_v11 = vpop.xlane.xlu0 %3490 }
 0x2d5   : > { %3533 = vst.msk [vmem:[%s6654_s28 + $0xb0] sm:$0xff] %vm533_vm1, %v3491_v11 }
 0x2dc   : > { %v3493_v58 = vpop.xlane.xlu1 %3492 }
 0x2dd   : > { %3534 = vst.msk [vmem:[%s6654_s28 + $0xb8] sm:$0xff] %vm533_vm1, %v3493_v58 }
 0x2e4   : > { %v3495_v52 = vpop.xlane.xlu2 %3494 }
 0x2e5   : > { %3535 = vst.msk [vmem:[%s6654_s28 + $0xc0] sm:$0xff] %vm533_vm1, %v3495_v52 }
 0x2ec   : > { %v3497_v55 = vpop.xlane.xlu0 %3496 }
 0x2ed   : > { %3536 = vst.msk [vmem:[%s6654_s28 + $0xc8] sm:$0xff] %vm533_vm1, %v3497_v55 }
 0x2f4   : > { %v3499_v13 = vpop.xlane.xlu1 %3498 }
 0x2f5   : > { %3537 = vst.msk [vmem:[%s6654_s28 + $0xd0] sm:$0xff] %vm533_vm1, %v3499_v13 }
 0x2fc   : > { %v3501_v20 = vpop.xlane.xlu2 %3500 }
 0x2fd   : > { %3538 = vst.msk [vmem:[%s6654_s28 + $0xd8] sm:$0xff] %vm533_vm1, %v3501_v20 }
 0x304   : > { %v3503_v18 = vpop.xlane.xlu0 %3502 }
 0x305   : > { %3539 = vst.msk [vmem:[%s6654_s28 + $0xe0] sm:$0xff] %vm533_vm1, %v3503_v18 }
 0x30c   : > { %v3505_v7 = vpop.xlane.xlu1 %3504 }
 0x30d   : > { %3540 = vst.msk [vmem:[%s6654_s28 + $0xe8] sm:$0xff] %vm533_vm1, %v3505_v7 }
 0x314   : > { %v3507_v53 = vpop.xlane.xlu2 %3506 }
 0x315   : > { %3541 = vst.msk [vmem:[%s6654_s28 + $0xf0] sm:$0xff] %vm533_vm1, %v3507_v53 }
 0x31c   : > { %v3509_v30 = vpop.xlane.xlu0 %3508 }
 0x31d   : > { %3542 = vst.msk [vmem:[%s6654_s28 + $0xf8] sm:$0xff] %vm533_vm1, %v3509_v30 }
 0x31e PF: > { %s16_s22 = sadd.s32 1, %s4513_s22   ;;  %s7288_s20 = smov %s4509_s21 }
 0x31f   : > { %p13_p5 = scmp.ge.s32.totalorder %s16_s22, 4   ;;  %s7289_s21 = smov %s7291_s0 }
 0x321   :  { %15 = sbr.rel (!%p13_p5) target bundleno = 2 (0x2), region = 87 }

</bundles_post_ra>
